<compile_context>
chip_gen: v7x
topology: tpu7x:2x2x1
jax: 0.10.0
libtpu: 0.0.40
codegen_flags: <defaults>
</compile_context>

<pallas_src>
import functools

import jax
import jax.numpy as jnp
from jax.experimental import pallas as pl
from jax.experimental.pallas import tpu as pltpu


# ----------------------------- model config --------------------------------
VOCAB = 64
VOCAB_PAD = 128                        # lane-dense LM-head output
D_MODEL = 32
N_HEADS = 4
HEAD_DIM = D_MODEL // N_HEADS          # 8
N_LAYERS = 2
FF_DIM = 64
SEQ = 8
BATCH = 2
BS = BATCH * SEQ
CACHE_SIZE = 64                        # neurocache slots per batch element
COMPRESSION = 4
D_CACHE = D_MODEL // COMPRESSION       # 8  (compressed hidden dim)
RETRIEVAL_LAYER = 1                    # layer index with cache attention
EPS = 1e-5

ATTN_SCALE = 1.0 / float(HEAD_DIM) ** 0.5
NC_SCALE = 1.0 / float(D_CACHE) ** 0.5


# --------------------------- in-kernel helpers ------------------------------
def _bf16(x):
    return x.astype(jnp.bfloat16)


def _ln(x, g, b):
    # x: (M, D) f32, g/b: (1, D) f32 — VPU math stays f32 (v5e-friendly)
    mean = jnp.mean(x, axis=-1, keepdims=True)
    var = jnp.mean(jnp.square(x - mean), axis=-1, keepdims=True)
    return (x - mean) * jax.lax.rsqrt(var + EPS) * g + b


def _softmax_lastdim(s):
    s = s - jnp.max(s, axis=-1, keepdims=True)
    p = jnp.exp(s)
    # approx reciprocal -> EUP slot (otherwise idle)
    return p * pl.reciprocal(jnp.sum(p, axis=-1, keepdims=True), approx=True)


def _causal_mha(qkv, causal):
    """qkv: (BS, 3*D) f32.  Heads are folded onto the LEADING batch axis so a
    single batched einsum pair + ONE softmax cover all heads (4x fewer
    EUP/XLU reduce pushes than a per-head loop)."""
    def split_heads(x2d):                      # (BS, D) -> (H*B, S, Hd)
        return jnp.concatenate(
            [x2d[:, hd * HEAD_DIM:(hd + 1) * HEAD_DIM]
             .reshape(BATCH, SEQ, HEAD_DIM) for hd in range(N_HEADS)],
            axis=0)

    q = split_heads(qkv[:, :D_MODEL])
    k = split_heads(qkv[:, D_MODEL:2 * D_MODEL])
    v = split_heads(qkv[:, 2 * D_MODEL:])

    s = jnp.einsum("bqd,bkd->bqk", _bf16(q), _bf16(k),
                   preferred_element_type=jnp.float32) * ATTN_SCALE
    s = jnp.where(causal, s, -1e30)            # (H*B, S, S)
    p = _softmax_lastdim(s)                    # one softmax for all heads
    o = jnp.einsum("bqk,bkd->bqd", _bf16(p), _bf16(v),
                   preferred_element_type=jnp.float32)   # (H*B, S, Hd)
    # merge heads back to (BS, D)
    return jnp.concatenate(
        [o[hd * BATCH:(hd + 1) * BATCH].reshape(BS, HEAD_DIM)
         for hd in range(N_HEADS)], axis=-1)


# ------------------------------ fused kernel --------------------------------
def _fused_forward_kernel(
        ids_ref, tgt_ref, keep_ref, embed_ref,
        ln1_g_ref, ln1_b_ref, qkv_w_ref, qkv_b_ref, o_w_ref, o_b_ref,
        ln2_g_ref, ln2_b_ref, fc1_w_ref, fc1_b_ref, fc2_w_ref, fc2_b_ref,
        cache_ref,
        nc_ln_g_ref, nc_ln_b_ref, nc_q_w_ref, nc_q_b_ref,
        nc_kv_w_ref, nc_kv_b_ref, nc_o_w_ref, nc_o_b_ref,
        fln_g_ref, fln_b_ref, head_w_ref, head_b_ref,
        logits_ref, loss_ref):
    # ---- token embedding: one-hot @ table (MXU gather, stays in VMEM) ----
    ids = ids_ref[...]                                          # (BS, 1) i32
    vocab_iota = jax.lax.broadcasted_iota(jnp.int32, (BS, VOCAB), 1)
    onehot = jnp.where(vocab_iota == ids, 1.0, 0.0)             # (BS, V) f32
    h = jnp.dot(_bf16(onehot), _bf16(embed_ref[...]),
                preferred_element_type=jnp.float32)             # (BS, D) f32

    # causal mask shared by all layers / heads
    qi = jax.lax.broadcasted_iota(jnp.int32, (SEQ, SEQ), 0)
    ki = jax.lax.broadcasted_iota(jnp.int32, (SEQ, SEQ), 1)
    causal = (ki <= qi)[None, :, :]                             # (1, S, S)

    for li in range(N_LAYERS):                                  # static unroll
        # -------- self attention --------
        hn = _ln(h, ln1_g_ref[li], ln1_b_ref[li])
        qkv = jnp.dot(_bf16(hn), _bf16(qkv_w_ref[li]),
                      preferred_element_type=jnp.float32) + qkv_b_ref[li]
        attn = _causal_mha(qkv, causal)                         # (BS, D)
        h = h + jnp.dot(_bf16(attn), _bf16(o_w_ref[li]),
                        preferred_element_type=jnp.float32) + o_b_ref[li]

        # -------- Neurocache retrieval (cache attention) --------
        if li == RETRIEVAL_LAYER:
            # reset_sequence_cache: zero cached states of fresh sequences
            # (keep = 1 - start_of_sequence, read from SMEM scalars).
            b_iota = jax.lax.broadcasted_iota(
                jnp.int32, (BATCH, CACHE_SIZE, D_CACHE), 0)
            keep_c = jnp.full((BATCH, CACHE_SIZE, D_CACHE), keep_ref[0],
                              dtype=jnp.float32)
            for b in range(1, BATCH):
                keep_c = jnp.where(b_iota == b, keep_ref[b], keep_c)
            cache_eff = cache_ref[...] * keep_c                 # (B, C, Dc)

            hn = _ln(h, nc_ln_g_ref[...], nc_ln_b_ref[...])
            qc = jnp.dot(_bf16(hn), _bf16(nc_q_w_ref[...]),
                         preferred_element_type=jnp.float32) + nc_q_b_ref[...]
            kv = jnp.dot(
                _bf16(cache_eff.reshape(BATCH * CACHE_SIZE, D_CACHE)),
                _bf16(nc_kv_w_ref[...]),
                preferred_element_type=jnp.float32) + nc_kv_b_ref[...]
            kv3 = kv.reshape(BATCH, CACHE_SIZE, 2 * D_CACHE)
            kc, vc = kv3[..., :D_CACHE], kv3[..., D_CACHE:]
            q3 = qc.reshape(BATCH, SEQ, D_CACHE)

            s = jnp.einsum("bqd,bkd->bqk", _bf16(q3), _bf16(kc),
                           preferred_element_type=jnp.float32) * NC_SCALE
            p = _softmax_lastdim(s)                             # (B, S, C)
            nc = jnp.einsum("bqk,bkd->bqd", _bf16(p), _bf16(vc),
                            preferred_element_type=jnp.float32)
            nc = jnp.dot(_bf16(nc.reshape(BS, D_CACHE)), _bf16(nc_o_w_ref[...]),
                         preferred_element_type=jnp.float32) + nc_o_b_ref[...]
            h = h + nc

        # -------- MLP --------
        hn = _ln(h, ln2_g_ref[li], ln2_b_ref[li])
        ff = jnp.dot(_bf16(hn), _bf16(fc1_w_ref[li]),
                     preferred_element_type=jnp.float32) + fc1_b_ref[li]
        ff = jax.nn.gelu(ff, approximate=True)
        h = h + jnp.dot(_bf16(ff), _bf16(fc2_w_ref[li]),
                        preferred_element_type=jnp.float32) + fc2_b_ref[li]

    # ---- final LayerNorm + lane-dense (128-wide) LM head ----
    hn = _ln(h, fln_g_ref[...], fln_b_ref[...])
    logits = jnp.dot(_bf16(hn), _bf16(head_w_ref[...]),
                     preferred_element_type=jnp.float32) + head_b_ref[...]
    logits_ref[...] = logits.reshape(BATCH, SEQ, VOCAB_PAD).astype(
        logits_ref.dtype)

    # ---- fused shifted causal-LM cross-entropy (last position masked) ----
    lv = logits[:, :VOCAB]                                      # (BS, V)
    z = lv - jnp.max(lv, axis=-1, keepdims=True)
    lse = jnp.log(jnp.sum(jnp.exp(z), axis=-1, keepdims=True))
    tgt = tgt_ref[...]                                          # (BS, 1) i32
    picked = jnp.sum(jnp.where(vocab_iota == tgt, z, 0.0),
                     axis=-1, keepdims=True)                    # (BS, 1)
    nll = lse - picked
    pos = jax.lax.broadcasted_iota(jnp.int32, (BATCH, SEQ, 1), 1).reshape(BS, 1)
    valid = jnp.where(pos < SEQ - 1, 1.0, 0.0)
    loss = jnp.sum(nll * valid, axis=0, keepdims=True) / float(
        BATCH * (SEQ - 1))
    loss_ref[...] = loss.astype(loss_ref.dtype)


# --------------------------- parameter construction -------------------------
def init_params(key):
    def nrm(k, shape, scale=0.02):
        return (scale * jax.random.normal(k, shape)).astype(jnp.float32)

    keys = iter(jax.random.split(key, 16))
    L = N_LAYERS
    return {
        "embed": nrm(next(keys), (VOCAB, D_MODEL)),
        # transformer layers, stacked along a leading layer axis
        "ln1_g": jnp.ones((L, 1, D_MODEL), jnp.float32),
        "ln1_b": jnp.zeros((L, 1, D_MODEL), jnp.float32),
        "qkv_w": nrm(next(keys), (L, D_MODEL, 3 * D_MODEL)),   # [Q | K | V]
        "qkv_b": jnp.zeros((L, 1, 3 * D_MODEL), jnp.float32),
        "o_w": nrm(next(keys), (L, D_MODEL, D_MODEL)),
        "o_b": jnp.zeros((L, 1, D_MODEL), jnp.float32),
        "ln2_g": jnp.ones((L, 1, D_MODEL), jnp.float32),
        "ln2_b": jnp.zeros((L, 1, D_MODEL), jnp.float32),
        "fc1_w": nrm(next(keys), (L, D_MODEL, FF_DIM)),
        "fc1_b": jnp.zeros((L, 1, FF_DIM), jnp.float32),
        "fc2_w": nrm(next(keys), (L, FF_DIM, D_MODEL)),
        "fc2_b": jnp.zeros((L, 1, D_MODEL), jnp.float32),
        # Neurocache projections (the trainable neurocache params)
        "nc_ln_g": jnp.ones((1, D_MODEL), jnp.float32),
        "nc_ln_b": jnp.zeros((1, D_MODEL), jnp.float32),
        "nc_q_w": nrm(next(keys), (D_MODEL, D_CACHE)),
        "nc_q_b": jnp.zeros((1, D_CACHE), jnp.float32),
        "nc_kv_w": nrm(next(keys), (D_CACHE, 2 * D_CACHE)),    # [K | V] fused
        "nc_kv_b": jnp.zeros((1, 2 * D_CACHE), jnp.float32),
        "nc_o_w": nrm(next(keys), (D_CACHE, D_MODEL)),
        "nc_o_b": jnp.zeros((1, D_MODEL), jnp.float32),
        # final LayerNorm + lane-dense (128-col padded) LM head
        "final_ln_g": jnp.ones((1, D_MODEL), jnp.float32),
        "final_ln_b": jnp.zeros((1, D_MODEL), jnp.float32),
        "lm_head_w": jnp.pad(nrm(next(keys), (D_MODEL, VOCAB)),
                             ((0, 0), (0, VOCAB_PAD - VOCAB))),
        "lm_head_b": jnp.zeros((1, VOCAB_PAD), jnp.float32),
    }


# ------------------------------- forward pass -------------------------------
def neurocache_forward(params, input_ids, cache, labels=None,
                       start_of_sequence=None):
    """Forward pass of NeurocacheModelForCausalLM (single fused pallas_call).

    input_ids:         (B, S) int32
    cache:             (B, CACHE_SIZE, D_CACHE) float32  (compressed states)
    labels:            (B, S) int32 or None
    start_of_sequence: (B,) bool or None -> cached states of those rows are
                       zeroed inside the kernel (reset_sequence_cache).
    """
    B, S = input_ids.shape
    assert (B, S) == (BATCH, SEQ)

    ids2 = input_ids.reshape(BS, 1).astype(jnp.int32)
    if labels is not None:
        # next-token targets; the last position per sequence is masked
        # out inside the kernel, so the wrapped-around value is irrelevant.
        tgt2 = jnp.roll(labels, -1, axis=1).reshape(BS, 1).astype(jnp.int32)
    else:
        tgt2 = jnp.zeros((BS, 1), jnp.int32)

    if start_of_sequence is not None:
        keep = 1.0 - start_of_sequence.astype(jnp.float32)     # (B,)
    else:
        keep = jnp.ones((B,), jnp.float32)

    args = (ids2, tgt2, keep,
            params["embed"],
            params["ln1_g"], params["ln1_b"], params["qkv_w"], params["qkv_b"],
            params["o_w"], params["o_b"], params["ln2_g"], params["ln2_b"],
            params["fc1_w"], params["fc1_b"], params["fc2_w"], params["fc2_b"],
            cache,
            params["nc_ln_g"], params["nc_ln_b"],
            params["nc_q_w"], params["nc_q_b"],
            params["nc_kv_w"], params["nc_kv_b"],
            params["nc_o_w"], params["nc_o_b"],
            params["final_ln_g"], params["final_ln_b"],
            params["lm_head_w"], params["lm_head_b"])

    vmem = pl.BlockSpec(memory_space=pltpu.MemorySpace.VMEM)
    smem = pl.BlockSpec(memory_space=pltpu.MemorySpace.SMEM)
    in_specs = [vmem] * len(args)
    in_specs[2] = smem                              # `keep` -> SMEM scalars

    out_shape = (jax.ShapeDtypeStruct((B, S, VOCAB_PAD), jnp.float32),
                 jax.ShapeDtypeStruct((1, 1), jnp.float32))
    out_specs = (vmem, vmem)

    # Advisory cost estimate for the surrounding XLA scheduler.
    bytes_accessed = (sum(a.size * a.dtype.itemsize for a in args)
                      + B * S * VOCAB_PAD * 4 + 4)
    flops = (2 * BS * VOCAB * D_MODEL
             + N_LAYERS * (2 * BS * D_MODEL * (4 * D_MODEL + 2 * FF_DIM)
                           + 4 * N_HEADS * BATCH * SEQ * SEQ * HEAD_DIM)
             + 4 * BATCH * CACHE_SIZE * D_CACHE * D_CACHE
             + 4 * BATCH * SEQ * CACHE_SIZE * D_CACHE
             + 4 * BS * D_CACHE * D_MODEL
             + 2 * BS * D_MODEL * VOCAB_PAD)
    transcendentals = (N_LAYERS * (N_HEADS * BATCH * SEQ * SEQ + BS * FF_DIM)
                       + BATCH * SEQ * CACHE_SIZE + BS * VOCAB)

    logits_pad, loss_arr = pl.pallas_call(
        _fused_forward_kernel,
        out_shape=out_shape,
        in_specs=in_specs,
        out_specs=out_specs,
        compiler_params=pltpu.CompilerParams(
            vmem_limit_bytes=8 * 1024 * 1024),
        cost_estimate=pl.CostEstimate(
            flops=int(flops),
            transcendentals=int(transcendentals),
            bytes_accessed=int(bytes_accessed)),
    )(*args)

    logits = logits_pad[..., :VOCAB]                           # (B, S, VOCAB)
    loss = loss_arr[0, 0] if labels is not None else None
    return loss, logits


# ---------------------------------- main ------------------------------------
if __name__ == "__main__":
    key = jax.random.PRNGKey(0)
    pk, ik, ck = jax.random.split(key, 3)

    params = init_params(pk)
    input_ids = jax.random.randint(ik, (BATCH, SEQ), 0, VOCAB, dtype=jnp.int32)
    labels = input_ids
    cache = (0.1 * jax.random.normal(
        ck, (BATCH, CACHE_SIZE, D_CACHE))).astype(jnp.float32)
    start_of_sequence = jnp.array([True, False])

    fwd = jax.jit(functools.partial(neurocache_forward, params))
    loss, logits = fwd(input_ids, cache, labels=labels,
                       start_of_sequence=start_of_sequence)
    jax.block_until_ready((loss, logits))

    assert logits.shape == (BATCH, SEQ, VOCAB)
    assert jnp.isfinite(loss)
    assert bool(jnp.all(jnp.isfinite(logits)))
    print("KERNEL_OK")
</pallas_src>

<mosaic_0001>
module attributes {stable_mosaic.version = 11 : i64} {
  func.func @_fused_forward_kernel(%arg0: memref<16x1xi32, #tpu.memory_space<vmem>>, %arg1: memref<16x1xi32, #tpu.memory_space<vmem>>, %arg2: memref<2xf32, #tpu.memory_space<smem>>, %arg3: memref<64x32xf32, #tpu.memory_space<vmem>>, %arg4: memref<2x1x32xf32, #tpu.memory_space<vmem>>, %arg5: memref<2x1x32xf32, #tpu.memory_space<vmem>>, %arg6: memref<2x32x96xf32, #tpu.memory_space<vmem>>, %arg7: memref<2x1x96xf32, #tpu.memory_space<vmem>>, %arg8: memref<2x32x32xf32, #tpu.memory_space<vmem>>, %arg9: memref<2x1x32xf32, #tpu.memory_space<vmem>>, %arg10: memref<2x1x32xf32, #tpu.memory_space<vmem>>, %arg11: memref<2x1x32xf32, #tpu.memory_space<vmem>>, %arg12: memref<2x32x64xf32, #tpu.memory_space<vmem>>, %arg13: memref<2x1x64xf32, #tpu.memory_space<vmem>>, %arg14: memref<2x64x32xf32, #tpu.memory_space<vmem>>, %arg15: memref<2x1x32xf32, #tpu.memory_space<vmem>>, %arg16: memref<2x64x8xf32, #tpu.memory_space<vmem>>, %arg17: memref<1x32xf32, #tpu.memory_space<vmem>>, %arg18: memref<1x32xf32, #tpu.memory_space<vmem>>, %arg19: memref<32x8xf32, #tpu.memory_space<vmem>>, %arg20: memref<1x8xf32, #tpu.memory_space<vmem>>, %arg21: memref<8x16xf32, #tpu.memory_space<vmem>>, %arg22: memref<1x16xf32, #tpu.memory_space<vmem>>, %arg23: memref<8x32xf32, #tpu.memory_space<vmem>>, %arg24: memref<1x32xf32, #tpu.memory_space<vmem>>, %arg25: memref<1x32xf32, #tpu.memory_space<vmem>>, %arg26: memref<1x32xf32, #tpu.memory_space<vmem>>, %arg27: memref<32x128xf32, #tpu.memory_space<vmem>>, %arg28: memref<1x128xf32, #tpu.memory_space<vmem>>, %arg29: memref<2x8x128xf32, #tpu.memory_space<vmem>>, %arg30: memref<1x1xf32, #tpu.memory_space<vmem>>) attributes {dimension_semantics = [], scalar_prefetch = 0 : i64, scratch_operands = 0 : i64, tpu.core_type = #tpu.core_type<tc>} {
    %c0 = arith.constant 0 : index
    %c0_0 = arith.constant 0 : index
    %0 = vector.load %arg0[%c0, %c0_0] : memref<16x1xi32, #tpu.memory_space<vmem>>, vector<16x1xi32>
    %1 = tpu.iota {dimensions = array<i32: 1>} : vector<16x64xi32>
    %2 = vector.broadcast %0 : vector<16x1xi32> to vector<16x64xi32>
    %3 = arith.cmpi eq, %1, %2 : vector<16x64xi32>
    %cst = arith.constant 1.000000e+00 : f32
    %cst_1 = arith.constant 0.000000e+00 : f32
    %4 = vector.broadcast %cst : f32 to vector<16x64xf32>
    %5 = vector.broadcast %cst_1 : f32 to vector<16x64xf32>
    %6 = arith.select %3, %4, %5 : vector<16x64xi1>, vector<16x64xf32>
    %7 = arith.truncf %6 : vector<16x64xf32> to vector<16x64xbf16>
    %c0_2 = arith.constant 0 : index
    %c0_3 = arith.constant 0 : index
    %8 = vector.load %arg3[%c0_2, %c0_3] : memref<64x32xf32, #tpu.memory_space<vmem>>, vector<64x32xf32>
    %9 = arith.truncf %8 : vector<64x32xf32> to vector<64x32xbf16>
    %cst_4 = arith.constant dense<0.000000e+00> : vector<16x32xf32>
    %10 = tpu.matmul %7, %9, %cst_4 {dimension_numbers = #tpu.dot_dimension_numbers<[1], [0], [0], [1], [0, 0, 1, 1], [], []>} : vector<16x64xbf16>, vector<64x32xbf16>, vector<16x32xf32> -> vector<16x32xf32>
    %11 = tpu.iota {dimensions = array<i32: 0>} : vector<8x8xi32>
    %12 = tpu.iota {dimensions = array<i32: 1>} : vector<8x8xi32>
    %13 = arith.cmpi sle, %12, %11 : vector<8x8xi32>
    %14 = vector.shape_cast %13 : vector<8x8xi1> to vector<1x8x8xi1>
    %c0_5 = arith.constant 0 : index
    %c0_6 = arith.constant 0 : index
    %c0_7 = arith.constant 0 : index
    %15 = vector.load %arg4[%c0_5, %c0_6, %c0_7] : memref<2x1x32xf32, #tpu.memory_space<vmem>>, vector<1x1x32xf32>
    %16 = vector.shape_cast %15 : vector<1x1x32xf32> to vector<1x32xf32>
    %c0_8 = arith.constant 0 : index
    %c0_9 = arith.constant 0 : index
    %c0_10 = arith.constant 0 : index
    %17 = vector.load %arg5[%c0_8, %c0_9, %c0_10] : memref<2x1x32xf32, #tpu.memory_space<vmem>>, vector<1x1x32xf32>
    %18 = vector.shape_cast %17 : vector<1x1x32xf32> to vector<1x32xf32>
    %cst_11 = arith.constant dense<0.000000e+00> : vector<16xf32>
    %19 = vector.multi_reduction <add>, %10, %cst_11 [1] : vector<16x32xf32> to vector<16xf32>
    %20 = vector.shape_cast %19 : vector<16xf32> to vector<16x1xf32>
    %cst_12 = arith.constant 3.200000e+01 : f32
    %21 = vector.broadcast %cst_12 : f32 to vector<16x1xf32>
    %22 = arith.divf %20, %21 : vector<16x1xf32>
    %23 = vector.broadcast %22 : vector<16x1xf32> to vector<16x32xf32>
    %24 = arith.subf %10, %23 : vector<16x32xf32>
    %25 = arith.mulf %24, %24 : vector<16x32xf32>
    %cst_13 = arith.constant dense<0.000000e+00> : vector<16xf32>
    %26 = vector.multi_reduction <add>, %25, %cst_13 [1] : vector<16x32xf32> to vector<16xf32>
    %27 = vector.shape_cast %26 : vector<16xf32> to vector<16x1xf32>
    %cst_14 = arith.constant 3.200000e+01 : f32
    %28 = vector.broadcast %cst_14 : f32 to vector<16x1xf32>
    %29 = arith.divf %27, %28 : vector<16x1xf32>
    %30 = vector.broadcast %22 : vector<16x1xf32> to vector<16x32xf32>
    %31 = arith.subf %10, %30 : vector<16x32xf32>
    %cst_15 = arith.constant 9.99999974E-6 : f32
    %32 = vector.broadcast %cst_15 : f32 to vector<16x1xf32>
    %33 = arith.addf %29, %32 : vector<16x1xf32>
    %34 = math.rsqrt %33 : vector<16x1xf32>
    %35 = vector.broadcast %34 : vector<16x1xf32> to vector<16x32xf32>
    %36 = arith.mulf %31, %35 : vector<16x32xf32>
    %37 = vector.broadcast %16 : vector<1x32xf32> to vector<16x32xf32>
    %38 = arith.mulf %36, %37 : vector<16x32xf32>
    %39 = vector.broadcast %18 : vector<1x32xf32> to vector<16x32xf32>
    %40 = arith.addf %38, %39 : vector<16x32xf32>
    %41 = arith.truncf %40 : vector<16x32xf32> to vector<16x32xbf16>
    %c0_16 = arith.constant 0 : index
    %c0_17 = arith.constant 0 : index
    %c0_18 = arith.constant 0 : index
    %42 = vector.load %arg6[%c0_16, %c0_17, %c0_18] : memref<2x32x96xf32, #tpu.memory_space<vmem>>, vector<1x32x96xf32>
    %43 = vector.shape_cast %42 : vector<1x32x96xf32> to vector<32x96xf32>
    %44 = arith.truncf %43 : vector<32x96xf32> to vector<32x96xbf16>
    %cst_19 = arith.constant dense<0.000000e+00> : vector<16x96xf32>
    %45 = tpu.matmul %41, %44, %cst_19 {dimension_numbers = #tpu.dot_dimension_numbers<[1], [0], [0], [1], [0, 0, 1, 1], [], []>} : vector<16x32xbf16>, vector<32x96xbf16>, vector<16x96xf32> -> vector<16x96xf32>
    %c0_20 = arith.constant 0 : index
    %c0_21 = arith.constant 0 : index
    %c0_22 = arith.constant 0 : index
    %46 = vector.load %arg7[%c0_20, %c0_21, %c0_22] : memref<2x1x96xf32, #tpu.memory_space<vmem>>, vector<1x1x96xf32>
    %47 = vector.shape_cast %46 : vector<1x1x96xf32> to vector<1x96xf32>
    %48 = vector.broadcast %47 : vector<1x96xf32> to vector<16x96xf32>
    %49 = arith.addf %45, %48 : vector<16x96xf32>
    %50 = vector.extract_strided_slice %49 {offsets = [0, 0], sizes = [16, 32], strides = [1, 1]} : vector<16x96xf32> to vector<16x32xf32>
    %51 = vector.extract_strided_slice %50 {offsets = [0, 0], sizes = [16, 8], strides = [1, 1]} : vector<16x32xf32> to vector<16x8xf32>
    %52 = vector.shape_cast %51 : vector<16x8xf32> to vector<2x8x8xf32>
    %53 = vector.extract_strided_slice %50 {offsets = [0, 8], sizes = [16, 8], strides = [1, 1]} : vector<16x32xf32> to vector<16x8xf32>
    %54 = vector.shape_cast %53 : vector<16x8xf32> to vector<2x8x8xf32>
    %55 = vector.extract_strided_slice %50 {offsets = [0, 16], sizes = [16, 8], strides = [1, 1]} : vector<16x32xf32> to vector<16x8xf32>
    %56 = vector.shape_cast %55 : vector<16x8xf32> to vector<2x8x8xf32>
    %57 = vector.extract_strided_slice %50 {offsets = [0, 24], sizes = [16, 8], strides = [1, 1]} : vector<16x32xf32> to vector<16x8xf32>
    %58 = vector.shape_cast %57 : vector<16x8xf32> to vector<2x8x8xf32>
    %59 = tpu.concatenate %52, %54, %56, %58 in 0 : vector<2x8x8xf32>, vector<2x8x8xf32>, vector<2x8x8xf32>, vector<2x8x8xf32> -> vector<8x8x8xf32>
    %60 = vector.extract_strided_slice %49 {offsets = [0, 32], sizes = [16, 32], strides = [1, 1]} : vector<16x96xf32> to vector<16x32xf32>
    %61 = vector.extract_strided_slice %60 {offsets = [0, 0], sizes = [16, 8], strides = [1, 1]} : vector<16x32xf32> to vector<16x8xf32>
    %62 = vector.shape_cast %61 : vector<16x8xf32> to vector<2x8x8xf32>
    %63 = vector.extract_strided_slice %60 {offsets = [0, 8], sizes = [16, 8], strides = [1, 1]} : vector<16x32xf32> to vector<16x8xf32>
    %64 = vector.shape_cast %63 : vector<16x8xf32> to vector<2x8x8xf32>
    %65 = vector.extract_strided_slice %60 {offsets = [0, 16], sizes = [16, 8], strides = [1, 1]} : vector<16x32xf32> to vector<16x8xf32>
    %66 = vector.shape_cast %65 : vector<16x8xf32> to vector<2x8x8xf32>
    %67 = vector.extract_strided_slice %60 {offsets = [0, 24], sizes = [16, 8], strides = [1, 1]} : vector<16x32xf32> to vector<16x8xf32>
    %68 = vector.shape_cast %67 : vector<16x8xf32> to vector<2x8x8xf32>
    %69 = tpu.concatenate %62, %64, %66, %68 in 0 : vector<2x8x8xf32>, vector<2x8x8xf32>, vector<2x8x8xf32>, vector<2x8x8xf32> -> vector<8x8x8xf32>
    %70 = vector.extract_strided_slice %49 {offsets = [0, 64], sizes = [16, 32], strides = [1, 1]} : vector<16x96xf32> to vector<16x32xf32>
    %71 = vector.extract_strided_slice %70 {offsets = [0, 0], sizes = [16, 8], strides = [1, 1]} : vector<16x32xf32> to vector<16x8xf32>
    %72 = vector.shape_cast %71 : vector<16x8xf32> to vector<2x8x8xf32>
    %73 = vector.extract_strided_slice %70 {offsets = [0, 8], sizes = [16, 8], strides = [1, 1]} : vector<16x32xf32> to vector<16x8xf32>
    %74 = vector.shape_cast %73 : vector<16x8xf32> to vector<2x8x8xf32>
    %75 = vector.extract_strided_slice %70 {offsets = [0, 16], sizes = [16, 8], strides = [1, 1]} : vector<16x32xf32> to vector<16x8xf32>
    %76 = vector.shape_cast %75 : vector<16x8xf32> to vector<2x8x8xf32>
    %77 = vector.extract_strided_slice %70 {offsets = [0, 24], sizes = [16, 8], strides = [1, 1]} : vector<16x32xf32> to vector<16x8xf32>
    %78 = vector.shape_cast %77 : vector<16x8xf32> to vector<2x8x8xf32>
    %79 = tpu.concatenate %72, %74, %76, %78 in 0 : vector<2x8x8xf32>, vector<2x8x8xf32>, vector<2x8x8xf32>, vector<2x8x8xf32> -> vector<8x8x8xf32>
    %80 = arith.truncf %59 : vector<8x8x8xf32> to vector<8x8x8xbf16>
    %81 = arith.truncf %69 : vector<8x8x8xf32> to vector<8x8x8xbf16>
    "tpu.trace_start"() <{level = 10 : i32, message = "bqd,bkd->bqk"}> : () -> ()
    %cst_23 = arith.constant dense<0.000000e+00> : vector<8x8x8xf32>
    %82 = tpu.matmul %80, %81, %cst_23 {dimension_numbers = #tpu.dot_dimension_numbers<[2], [2], [1], [1], [0, 0, 0, 1, 1, 1], [0], [0]>} : vector<8x8x8xbf16>, vector<8x8x8xbf16>, vector<8x8x8xf32> -> vector<8x8x8xf32>
    "tpu.trace_stop"() : () -> ()
    %cst_24 = arith.constant 0.353553385 : f32
    %83 = vector.broadcast %cst_24 : f32 to vector<8x8x8xf32>
    %84 = arith.mulf %82, %83 : vector<8x8x8xf32>
    %cst_25 = arith.constant -1.000000e+30 : f32
    %85 = vector.shape_cast %14 : vector<1x8x8xi1> to vector<1x8x8xi1>
    %86 = vector.broadcast %85 : vector<1x8x8xi1> to vector<8x8x8xi1>
    %87 = vector.broadcast %cst_25 : f32 to vector<8x8x8xf32>
    %88 = arith.select %86, %84, %87 : vector<8x8x8xi1>, vector<8x8x8xf32>
    %cst_26 = arith.constant dense<0xFF800000> : vector<8x8xf32>
    %89 = vector.multi_reduction <maximumf>, %88, %cst_26 [2] : vector<8x8x8xf32> to vector<8x8xf32>
    %90 = vector.shape_cast %89 : vector<8x8xf32> to vector<8x8x1xf32>
    %91 = vector.broadcast %90 : vector<8x8x1xf32> to vector<8x8x8xf32>
    %92 = arith.subf %88, %91 : vector<8x8x8xf32>
    %93 = math.exp %92 : vector<8x8x8xf32>
    %cst_27 = arith.constant dense<0.000000e+00> : vector<8x8xf32>
    %94 = vector.multi_reduction <add>, %93, %cst_27 [2] : vector<8x8x8xf32> to vector<8x8xf32>
    %95 = vector.shape_cast %94 : vector<8x8xf32> to vector<8x8x1xf32>
    %96 = tpu.reciprocal %95 {approx = true} : vector<8x8x1xf32> -> vector<8x8x1xf32>
    %97 = vector.broadcast %96 : vector<8x8x1xf32> to vector<8x8x8xf32>
    %98 = arith.mulf %93, %97 : vector<8x8x8xf32>
    %99 = arith.truncf %98 : vector<8x8x8xf32> to vector<8x8x8xbf16>
    %100 = arith.truncf %79 : vector<8x8x8xf32> to vector<8x8x8xbf16>
    "tpu.trace_start"() <{level = 10 : i32, message = "bqk,bkd->bqd"}> : () -> ()
    %cst_28 = arith.constant dense<0.000000e+00> : vector<8x8x8xf32>
    %101 = tpu.matmul %99, %100, %cst_28 {dimension_numbers = #tpu.dot_dimension_numbers<[2], [1], [1], [2], [0, 0, 0, 1, 1, 2], [0], [0]>} : vector<8x8x8xbf16>, vector<8x8x8xbf16>, vector<8x8x8xf32> -> vector<8x8x8xf32>
    "tpu.trace_stop"() : () -> ()
    %102 = vector.extract_strided_slice %101 {offsets = [0, 0, 0], sizes = [2, 8, 8], strides = [1, 1, 1]} : vector<8x8x8xf32> to vector<2x8x8xf32>
    %103 = vector.shape_cast %102 : vector<2x8x8xf32> to vector<16x8xf32>
    %104 = vector.extract_strided_slice %101 {offsets = [2, 0, 0], sizes = [2, 8, 8], strides = [1, 1, 1]} : vector<8x8x8xf32> to vector<2x8x8xf32>
    %105 = vector.shape_cast %104 : vector<2x8x8xf32> to vector<16x8xf32>
    %106 = vector.extract_strided_slice %101 {offsets = [4, 0, 0], sizes = [2, 8, 8], strides = [1, 1, 1]} : vector<8x8x8xf32> to vector<2x8x8xf32>
    %107 = vector.shape_cast %106 : vector<2x8x8xf32> to vector<16x8xf32>
    %108 = vector.extract_strided_slice %101 {offsets = [6, 0, 0], sizes = [2, 8, 8], strides = [1, 1, 1]} : vector<8x8x8xf32> to vector<2x8x8xf32>
    %109 = vector.shape_cast %108 : vector<2x8x8xf32> to vector<16x8xf32>
    %110 = tpu.concatenate %103, %105, %107, %109 in 1 : vector<16x8xf32>, vector<16x8xf32>, vector<16x8xf32>, vector<16x8xf32> -> vector<16x32xf32>
    %111 = arith.truncf %110 : vector<16x32xf32> to vector<16x32xbf16>
    %c0_29 = arith.constant 0 : index
    %c0_30 = arith.constant 0 : index
    %c0_31 = arith.constant 0 : index
    %112 = vector.load %arg8[%c0_29, %c0_30, %c0_31] : memref<2x32x32xf32, #tpu.memory_space<vmem>>, vector<1x32x32xf32>
    %113 = vector.shape_cast %112 : vector<1x32x32xf32> to vector<32x32xf32>
    %114 = arith.truncf %113 : vector<32x32xf32> to vector<32x32xbf16>
    %cst_32 = arith.constant dense<0.000000e+00> : vector<16x32xf32>
    %115 = tpu.matmul %111, %114, %cst_32 {dimension_numbers = #tpu.dot_dimension_numbers<[1], [0], [0], [1], [0, 0, 1, 1], [], []>} : vector<16x32xbf16>, vector<32x32xbf16>, vector<16x32xf32> -> vector<16x32xf32>
    %116 = arith.addf %10, %115 : vector<16x32xf32>
    %c0_33 = arith.constant 0 : index
    %c0_34 = arith.constant 0 : index
    %c0_35 = arith.constant 0 : index
    %117 = vector.load %arg9[%c0_33, %c0_34, %c0_35] : memref<2x1x32xf32, #tpu.memory_space<vmem>>, vector<1x1x32xf32>
    %118 = vector.shape_cast %117 : vector<1x1x32xf32> to vector<1x32xf32>
    %119 = vector.broadcast %118 : vector<1x32xf32> to vector<16x32xf32>
    %120 = arith.addf %116, %119 : vector<16x32xf32>
    %c0_36 = arith.constant 0 : index
    %c0_37 = arith.constant 0 : index
    %c0_38 = arith.constant 0 : index
    %121 = vector.load %arg10[%c0_36, %c0_37, %c0_38] : memref<2x1x32xf32, #tpu.memory_space<vmem>>, vector<1x1x32xf32>
    %122 = vector.shape_cast %121 : vector<1x1x32xf32> to vector<1x32xf32>
    %c0_39 = arith.constant 0 : index
    %c0_40 = arith.constant 0 : index
    %c0_41 = arith.constant 0 : index
    %123 = vector.load %arg11[%c0_39, %c0_40, %c0_41] : memref<2x1x32xf32, #tpu.memory_space<vmem>>, vector<1x1x32xf32>
    %124 = vector.shape_cast %123 : vector<1x1x32xf32> to vector<1x32xf32>
    %cst_42 = arith.constant dense<0.000000e+00> : vector<16xf32>
    %125 = vector.multi_reduction <add>, %120, %cst_42 [1] : vector<16x32xf32> to vector<16xf32>
    %126 = vector.shape_cast %125 : vector<16xf32> to vector<16x1xf32>
    %cst_43 = arith.constant 3.200000e+01 : f32
    %127 = vector.broadcast %cst_43 : f32 to vector<16x1xf32>
    %128 = arith.divf %126, %127 : vector<16x1xf32>
    %129 = vector.broadcast %128 : vector<16x1xf32> to vector<16x32xf32>
    %130 = arith.subf %120, %129 : vector<16x32xf32>
    %131 = arith.mulf %130, %130 : vector<16x32xf32>
    %cst_44 = arith.constant dense<0.000000e+00> : vector<16xf32>
    %132 = vector.multi_reduction <add>, %131, %cst_44 [1] : vector<16x32xf32> to vector<16xf32>
    %133 = vector.shape_cast %132 : vector<16xf32> to vector<16x1xf32>
    %cst_45 = arith.constant 3.200000e+01 : f32
    %134 = vector.broadcast %cst_45 : f32 to vector<16x1xf32>
    %135 = arith.divf %133, %134 : vector<16x1xf32>
    %136 = vector.broadcast %128 : vector<16x1xf32> to vector<16x32xf32>
    %137 = arith.subf %120, %136 : vector<16x32xf32>
    %cst_46 = arith.constant 9.99999974E-6 : f32
    %138 = vector.broadcast %cst_46 : f32 to vector<16x1xf32>
    %139 = arith.addf %135, %138 : vector<16x1xf32>
    %140 = math.rsqrt %139 : vector<16x1xf32>
    %141 = vector.broadcast %140 : vector<16x1xf32> to vector<16x32xf32>
    %142 = arith.mulf %137, %141 : vector<16x32xf32>
    %143 = vector.broadcast %122 : vector<1x32xf32> to vector<16x32xf32>
    %144 = arith.mulf %142, %143 : vector<16x32xf32>
    %145 = vector.broadcast %124 : vector<1x32xf32> to vector<16x32xf32>
    %146 = arith.addf %144, %145 : vector<16x32xf32>
    %147 = arith.truncf %146 : vector<16x32xf32> to vector<16x32xbf16>
    %c0_47 = arith.constant 0 : index
    %c0_48 = arith.constant 0 : index
    %c0_49 = arith.constant 0 : index
    %148 = vector.load %arg12[%c0_47, %c0_48, %c0_49] : memref<2x32x64xf32, #tpu.memory_space<vmem>>, vector<1x32x64xf32>
    %149 = vector.shape_cast %148 : vector<1x32x64xf32> to vector<32x64xf32>
    %150 = arith.truncf %149 : vector<32x64xf32> to vector<32x64xbf16>
    %cst_50 = arith.constant dense<0.000000e+00> : vector<16x64xf32>
    %151 = tpu.matmul %147, %150, %cst_50 {dimension_numbers = #tpu.dot_dimension_numbers<[1], [0], [0], [1], [0, 0, 1, 1], [], []>} : vector<16x32xbf16>, vector<32x64xbf16>, vector<16x64xf32> -> vector<16x64xf32>
    %c0_51 = arith.constant 0 : index
    %c0_52 = arith.constant 0 : index
    %c0_53 = arith.constant 0 : index
    %152 = vector.load %arg13[%c0_51, %c0_52, %c0_53] : memref<2x1x64xf32, #tpu.memory_space<vmem>>, vector<1x1x64xf32>
    %153 = vector.shape_cast %152 : vector<1x1x64xf32> to vector<1x64xf32>
    %154 = vector.broadcast %153 : vector<1x64xf32> to vector<16x64xf32>
    %155 = arith.addf %151, %154 : vector<16x64xf32>
    %156 = arith.mulf %155, %155 : vector<16x64xf32>
    %157 = arith.mulf %155, %156 : vector<16x64xf32>
    %cst_54 = arith.constant 4.471500e-02 : f32
    %158 = vector.broadcast %cst_54 : f32 to vector<16x64xf32>
    %159 = arith.mulf %158, %157 : vector<16x64xf32>
    %160 = arith.addf %155, %159 : vector<16x64xf32>
    %cst_55 = arith.constant 0.797884583 : f32
    %161 = vector.broadcast %cst_55 : f32 to vector<16x64xf32>
    %162 = arith.mulf %161, %160 : vector<16x64xf32>
    %163 = math.tanh %162 : vector<16x64xf32>
    %cst_56 = arith.constant 1.000000e+00 : f32
    %164 = vector.broadcast %cst_56 : f32 to vector<16x64xf32>
    %165 = arith.addf %164, %163 : vector<16x64xf32>
    %cst_57 = arith.constant 5.000000e-01 : f32
    %166 = vector.broadcast %cst_57 : f32 to vector<16x64xf32>
    %167 = arith.mulf %166, %165 : vector<16x64xf32>
    %168 = arith.mulf %155, %167 : vector<16x64xf32>
    %169 = arith.truncf %168 : vector<16x64xf32> to vector<16x64xbf16>
    %c0_58 = arith.constant 0 : index
    %c0_59 = arith.constant 0 : index
    %c0_60 = arith.constant 0 : index
    %170 = vector.load %arg14[%c0_58, %c0_59, %c0_60] : memref<2x64x32xf32, #tpu.memory_space<vmem>>, vector<1x64x32xf32>
    %171 = vector.shape_cast %170 : vector<1x64x32xf32> to vector<64x32xf32>
    %172 = arith.truncf %171 : vector<64x32xf32> to vector<64x32xbf16>
    %cst_61 = arith.constant dense<0.000000e+00> : vector<16x32xf32>
    %173 = tpu.matmul %169, %172, %cst_61 {dimension_numbers = #tpu.dot_dimension_numbers<[1], [0], [0], [1], [0, 0, 1, 1], [], []>} : vector<16x64xbf16>, vector<64x32xbf16>, vector<16x32xf32> -> vector<16x32xf32>
    %174 = arith.addf %120, %173 : vector<16x32xf32>
    %c0_62 = arith.constant 0 : index
    %c0_63 = arith.constant 0 : index
    %c0_64 = arith.constant 0 : index
    %175 = vector.load %arg15[%c0_62, %c0_63, %c0_64] : memref<2x1x32xf32, #tpu.memory_space<vmem>>, vector<1x1x32xf32>
    %176 = vector.shape_cast %175 : vector<1x1x32xf32> to vector<1x32xf32>
    %177 = vector.broadcast %176 : vector<1x32xf32> to vector<16x32xf32>
    %178 = arith.addf %174, %177 : vector<16x32xf32>
    %c1 = arith.constant 1 : index
    %c0_65 = arith.constant 0 : index
    %c0_66 = arith.constant 0 : index
    %179 = vector.load %arg4[%c1, %c0_65, %c0_66] : memref<2x1x32xf32, #tpu.memory_space<vmem>>, vector<1x1x32xf32>
    %180 = vector.shape_cast %179 : vector<1x1x32xf32> to vector<1x32xf32>
    %c1_67 = arith.constant 1 : index
    %c0_68 = arith.constant 0 : index
    %c0_69 = arith.constant 0 : index
    %181 = vector.load %arg5[%c1_67, %c0_68, %c0_69] : memref<2x1x32xf32, #tpu.memory_space<vmem>>, vector<1x1x32xf32>
    %182 = vector.shape_cast %181 : vector<1x1x32xf32> to vector<1x32xf32>
    %cst_70 = arith.constant dense<0.000000e+00> : vector<16xf32>
    %183 = vector.multi_reduction <add>, %178, %cst_70 [1] : vector<16x32xf32> to vector<16xf32>
    %184 = vector.shape_cast %183 : vector<16xf32> to vector<16x1xf32>
    %cst_71 = arith.constant 3.200000e+01 : f32
    %185 = vector.broadcast %cst_71 : f32 to vector<16x1xf32>
    %186 = arith.divf %184, %185 : vector<16x1xf32>
    %187 = vector.broadcast %186 : vector<16x1xf32> to vector<16x32xf32>
    %188 = arith.subf %178, %187 : vector<16x32xf32>
    %189 = arith.mulf %188, %188 : vector<16x32xf32>
    %cst_72 = arith.constant dense<0.000000e+00> : vector<16xf32>
    %190 = vector.multi_reduction <add>, %189, %cst_72 [1] : vector<16x32xf32> to vector<16xf32>
    %191 = vector.shape_cast %190 : vector<16xf32> to vector<16x1xf32>
    %cst_73 = arith.constant 3.200000e+01 : f32
    %192 = vector.broadcast %cst_73 : f32 to vector<16x1xf32>
    %193 = arith.divf %191, %192 : vector<16x1xf32>
    %194 = vector.broadcast %186 : vector<16x1xf32> to vector<16x32xf32>
    %195 = arith.subf %178, %194 : vector<16x32xf32>
    %cst_74 = arith.constant 9.99999974E-6 : f32
    %196 = vector.broadcast %cst_74 : f32 to vector<16x1xf32>
    %197 = arith.addf %193, %196 : vector<16x1xf32>
    %198 = math.rsqrt %197 : vector<16x1xf32>
    %199 = vector.broadcast %198 : vector<16x1xf32> to vector<16x32xf32>
    %200 = arith.mulf %195, %199 : vector<16x32xf32>
    %201 = vector.broadcast %180 : vector<1x32xf32> to vector<16x32xf32>
    %202 = arith.mulf %200, %201 : vector<16x32xf32>
    %203 = vector.broadcast %182 : vector<1x32xf32> to vector<16x32xf32>
    %204 = arith.addf %202, %203 : vector<16x32xf32>
    %205 = arith.truncf %204 : vector<16x32xf32> to vector<16x32xbf16>
    %c1_75 = arith.constant 1 : index
    %c0_76 = arith.constant 0 : index
    %c0_77 = arith.constant 0 : index
    %206 = vector.load %arg6[%c1_75, %c0_76, %c0_77] : memref<2x32x96xf32, #tpu.memory_space<vmem>>, vector<1x32x96xf32>
    %207 = vector.shape_cast %206 : vector<1x32x96xf32> to vector<32x96xf32>
    %208 = arith.truncf %207 : vector<32x96xf32> to vector<32x96xbf16>
    %cst_78 = arith.constant dense<0.000000e+00> : vector<16x96xf32>
    %209 = tpu.matmul %205, %208, %cst_78 {dimension_numbers = #tpu.dot_dimension_numbers<[1], [0], [0], [1], [0, 0, 1, 1], [], []>} : vector<16x32xbf16>, vector<32x96xbf16>, vector<16x96xf32> -> vector<16x96xf32>
    %c1_79 = arith.constant 1 : index
    %c0_80 = arith.constant 0 : index
    %c0_81 = arith.constant 0 : index
    %210 = vector.load %arg7[%c1_79, %c0_80, %c0_81] : memref<2x1x96xf32, #tpu.memory_space<vmem>>, vector<1x1x96xf32>
    %211 = vector.shape_cast %210 : vector<1x1x96xf32> to vector<1x96xf32>
    %212 = vector.broadcast %211 : vector<1x96xf32> to vector<16x96xf32>
    %213 = arith.addf %209, %212 : vector<16x96xf32>
    %214 = vector.extract_strided_slice %213 {offsets = [0, 0], sizes = [16, 32], strides = [1, 1]} : vector<16x96xf32> to vector<16x32xf32>
    %215 = vector.extract_strided_slice %214 {offsets = [0, 0], sizes = [16, 8], strides = [1, 1]} : vector<16x32xf32> to vector<16x8xf32>
    %216 = vector.shape_cast %215 : vector<16x8xf32> to vector<2x8x8xf32>
    %217 = vector.extract_strided_slice %214 {offsets = [0, 8], sizes = [16, 8], strides = [1, 1]} : vector<16x32xf32> to vector<16x8xf32>
    %218 = vector.shape_cast %217 : vector<16x8xf32> to vector<2x8x8xf32>
    %219 = vector.extract_strided_slice %214 {offsets = [0, 16], sizes = [16, 8], strides = [1, 1]} : vector<16x32xf32> to vector<16x8xf32>
    %220 = vector.shape_cast %219 : vector<16x8xf32> to vector<2x8x8xf32>
    %221 = vector.extract_strided_slice %214 {offsets = [0, 24], sizes = [16, 8], strides = [1, 1]} : vector<16x32xf32> to vector<16x8xf32>
    %222 = vector.shape_cast %221 : vector<16x8xf32> to vector<2x8x8xf32>
    %223 = tpu.concatenate %216, %218, %220, %222 in 0 : vector<2x8x8xf32>, vector<2x8x8xf32>, vector<2x8x8xf32>, vector<2x8x8xf32> -> vector<8x8x8xf32>
    %224 = vector.extract_strided_slice %213 {offsets = [0, 32], sizes = [16, 32], strides = [1, 1]} : vector<16x96xf32> to vector<16x32xf32>
    %225 = vector.extract_strided_slice %224 {offsets = [0, 0], sizes = [16, 8], strides = [1, 1]} : vector<16x32xf32> to vector<16x8xf32>
    %226 = vector.shape_cast %225 : vector<16x8xf32> to vector<2x8x8xf32>
    %227 = vector.extract_strided_slice %224 {offsets = [0, 8], sizes = [16, 8], strides = [1, 1]} : vector<16x32xf32> to vector<16x8xf32>
    %228 = vector.shape_cast %227 : vector<16x8xf32> to vector<2x8x8xf32>
    %229 = vector.extract_strided_slice %224 {offsets = [0, 16], sizes = [16, 8], strides = [1, 1]} : vector<16x32xf32> to vector<16x8xf32>
    %230 = vector.shape_cast %229 : vector<16x8xf32> to vector<2x8x8xf32>
    %231 = vector.extract_strided_slice %224 {offsets = [0, 24], sizes = [16, 8], strides = [1, 1]} : vector<16x32xf32> to vector<16x8xf32>
    %232 = vector.shape_cast %231 : vector<16x8xf32> to vector<2x8x8xf32>
    %233 = tpu.concatenate %226, %228, %230, %232 in 0 : vector<2x8x8xf32>, vector<2x8x8xf32>, vector<2x8x8xf32>, vector<2x8x8xf32> -> vector<8x8x8xf32>
    %234 = vector.extract_strided_slice %213 {offsets = [0, 64], sizes = [16, 32], strides = [1, 1]} : vector<16x96xf32> to vector<16x32xf32>
    %235 = vector.extract_strided_slice %234 {offsets = [0, 0], sizes = [16, 8], strides = [1, 1]} : vector<16x32xf32> to vector<16x8xf32>
    %236 = vector.shape_cast %235 : vector<16x8xf32> to vector<2x8x8xf32>
    %237 = vector.extract_strided_slice %234 {offsets = [0, 8], sizes = [16, 8], strides = [1, 1]} : vector<16x32xf32> to vector<16x8xf32>
    %238 = vector.shape_cast %237 : vector<16x8xf32> to vector<2x8x8xf32>
    %239 = vector.extract_strided_slice %234 {offsets = [0, 16], sizes = [16, 8], strides = [1, 1]} : vector<16x32xf32> to vector<16x8xf32>
    %240 = vector.shape_cast %239 : vector<16x8xf32> to vector<2x8x8xf32>
    %241 = vector.extract_strided_slice %234 {offsets = [0, 24], sizes = [16, 8], strides = [1, 1]} : vector<16x32xf32> to vector<16x8xf32>
    %242 = vector.shape_cast %241 : vector<16x8xf32> to vector<2x8x8xf32>
    %243 = tpu.concatenate %236, %238, %240, %242 in 0 : vector<2x8x8xf32>, vector<2x8x8xf32>, vector<2x8x8xf32>, vector<2x8x8xf32> -> vector<8x8x8xf32>
    %244 = arith.truncf %223 : vector<8x8x8xf32> to vector<8x8x8xbf16>
    %245 = arith.truncf %233 : vector<8x8x8xf32> to vector<8x8x8xbf16>
    "tpu.trace_start"() <{level = 10 : i32, message = "bqd,bkd->bqk"}> : () -> ()
    %cst_82 = arith.constant dense<0.000000e+00> : vector<8x8x8xf32>
    %246 = tpu.matmul %244, %245, %cst_82 {dimension_numbers = #tpu.dot_dimension_numbers<[2], [2], [1], [1], [0, 0, 0, 1, 1, 1], [0], [0]>} : vector<8x8x8xbf16>, vector<8x8x8xbf16>, vector<8x8x8xf32> -> vector<8x8x8xf32>
    "tpu.trace_stop"() : () -> ()
    %cst_83 = arith.constant 0.353553385 : f32
    %247 = vector.broadcast %cst_83 : f32 to vector<8x8x8xf32>
    %248 = arith.mulf %246, %247 : vector<8x8x8xf32>
    %cst_84 = arith.constant -1.000000e+30 : f32
    %249 = vector.shape_cast %14 : vector<1x8x8xi1> to vector<1x8x8xi1>
    %250 = vector.broadcast %249 : vector<1x8x8xi1> to vector<8x8x8xi1>
    %251 = vector.broadcast %cst_84 : f32 to vector<8x8x8xf32>
    %252 = arith.select %250, %248, %251 : vector<8x8x8xi1>, vector<8x8x8xf32>
    %cst_85 = arith.constant dense<0xFF800000> : vector<8x8xf32>
    %253 = vector.multi_reduction <maximumf>, %252, %cst_85 [2] : vector<8x8x8xf32> to vector<8x8xf32>
    %254 = vector.shape_cast %253 : vector<8x8xf32> to vector<8x8x1xf32>
    %255 = vector.broadcast %254 : vector<8x8x1xf32> to vector<8x8x8xf32>
    %256 = arith.subf %252, %255 : vector<8x8x8xf32>
    %257 = math.exp %256 : vector<8x8x8xf32>
    %cst_86 = arith.constant dense<0.000000e+00> : vector<8x8xf32>
    %258 = vector.multi_reduction <add>, %257, %cst_86 [2] : vector<8x8x8xf32> to vector<8x8xf32>
    %259 = vector.shape_cast %258 : vector<8x8xf32> to vector<8x8x1xf32>
    %260 = tpu.reciprocal %259 {approx = true} : vector<8x8x1xf32> -> vector<8x8x1xf32>
    %261 = vector.broadcast %260 : vector<8x8x1xf32> to vector<8x8x8xf32>
    %262 = arith.mulf %257, %261 : vector<8x8x8xf32>
    %263 = arith.truncf %262 : vector<8x8x8xf32> to vector<8x8x8xbf16>
    %264 = arith.truncf %243 : vector<8x8x8xf32> to vector<8x8x8xbf16>
    "tpu.trace_start"() <{level = 10 : i32, message = "bqk,bkd->bqd"}> : () -> ()
    %cst_87 = arith.constant dense<0.000000e+00> : vector<8x8x8xf32>
    %265 = tpu.matmul %263, %264, %cst_87 {dimension_numbers = #tpu.dot_dimension_numbers<[2], [1], [1], [2], [0, 0, 0, 1, 1, 2], [0], [0]>} : vector<8x8x8xbf16>, vector<8x8x8xbf16>, vector<8x8x8xf32> -> vector<8x8x8xf32>
    "tpu.trace_stop"() : () -> ()
    %266 = vector.extract_strided_slice %265 {offsets = [0, 0, 0], sizes = [2, 8, 8], strides = [1, 1, 1]} : vector<8x8x8xf32> to vector<2x8x8xf32>
    %267 = vector.shape_cast %266 : vector<2x8x8xf32> to vector<16x8xf32>
    %268 = vector.extract_strided_slice %265 {offsets = [2, 0, 0], sizes = [2, 8, 8], strides = [1, 1, 1]} : vector<8x8x8xf32> to vector<2x8x8xf32>
    %269 = vector.shape_cast %268 : vector<2x8x8xf32> to vector<16x8xf32>
    %270 = vector.extract_strided_slice %265 {offsets = [4, 0, 0], sizes = [2, 8, 8], strides = [1, 1, 1]} : vector<8x8x8xf32> to vector<2x8x8xf32>
    %271 = vector.shape_cast %270 : vector<2x8x8xf32> to vector<16x8xf32>
    %272 = vector.extract_strided_slice %265 {offsets = [6, 0, 0], sizes = [2, 8, 8], strides = [1, 1, 1]} : vector<8x8x8xf32> to vector<2x8x8xf32>
    %273 = vector.shape_cast %272 : vector<2x8x8xf32> to vector<16x8xf32>
    %274 = tpu.concatenate %267, %269, %271, %273 in 1 : vector<16x8xf32>, vector<16x8xf32>, vector<16x8xf32>, vector<16x8xf32> -> vector<16x32xf32>
    %275 = arith.truncf %274 : vector<16x32xf32> to vector<16x32xbf16>
    %c1_88 = arith.constant 1 : index
    %c0_89 = arith.constant 0 : index
    %c0_90 = arith.constant 0 : index
    %276 = vector.load %arg8[%c1_88, %c0_89, %c0_90] : memref<2x32x32xf32, #tpu.memory_space<vmem>>, vector<1x32x32xf32>
    %277 = vector.shape_cast %276 : vector<1x32x32xf32> to vector<32x32xf32>
    %278 = arith.truncf %277 : vector<32x32xf32> to vector<32x32xbf16>
    %cst_91 = arith.constant dense<0.000000e+00> : vector<16x32xf32>
    %279 = tpu.matmul %275, %278, %cst_91 {dimension_numbers = #tpu.dot_dimension_numbers<[1], [0], [0], [1], [0, 0, 1, 1], [], []>} : vector<16x32xbf16>, vector<32x32xbf16>, vector<16x32xf32> -> vector<16x32xf32>
    %280 = arith.addf %178, %279 : vector<16x32xf32>
    %c1_92 = arith.constant 1 : index
    %c0_93 = arith.constant 0 : index
    %c0_94 = arith.constant 0 : index
    %281 = vector.load %arg9[%c1_92, %c0_93, %c0_94] : memref<2x1x32xf32, #tpu.memory_space<vmem>>, vector<1x1x32xf32>
    %282 = vector.shape_cast %281 : vector<1x1x32xf32> to vector<1x32xf32>
    %283 = vector.broadcast %282 : vector<1x32xf32> to vector<16x32xf32>
    %284 = arith.addf %280, %283 : vector<16x32xf32>
    %285 = tpu.iota {dimensions = array<i32: 0>} : vector<2x64x8xi32>
    %c0_95 = arith.constant 0 : index
    %286 = memref.load %arg2[%c0_95] : memref<2xf32, #tpu.memory_space<smem>>
    %287 = vector.broadcast %286 : f32 to vector<2x64x8xf32>
    %c1_i32 = arith.constant 1 : i32
    %288 = vector.broadcast %c1_i32 : i32 to vector<2x64x8xi32>
    %289 = arith.cmpi eq, %285, %288 : vector<2x64x8xi32>
    %c1_96 = arith.constant 1 : index
    %290 = memref.load %arg2[%c1_96] : memref<2xf32, #tpu.memory_space<smem>>
    %291 = vector.broadcast %290 : f32 to vector<2x64x8xf32>
    %292 = arith.select %289, %291, %287 : vector<2x64x8xi1>, vector<2x64x8xf32>
    %c0_97 = arith.constant 0 : index
    %c0_98 = arith.constant 0 : index
    %c0_99 = arith.constant 0 : index
    %293 = vector.load %arg16[%c0_97, %c0_98, %c0_99] : memref<2x64x8xf32, #tpu.memory_space<vmem>>, vector<2x64x8xf32>
    %294 = arith.mulf %293, %292 : vector<2x64x8xf32>
    %c0_100 = arith.constant 0 : index
    %c0_101 = arith.constant 0 : index
    %295 = vector.load %arg17[%c0_100, %c0_101] : memref<1x32xf32, #tpu.memory_space<vmem>>, vector<1x32xf32>
    %c0_102 = arith.constant 0 : index
    %c0_103 = arith.constant 0 : index
    %296 = vector.load %arg18[%c0_102, %c0_103] : memref<1x32xf32, #tpu.memory_space<vmem>>, vector<1x32xf32>
    %cst_104 = arith.constant dense<0.000000e+00> : vector<16xf32>
    %297 = vector.multi_reduction <add>, %284, %cst_104 [1] : vector<16x32xf32> to vector<16xf32>
    %298 = vector.shape_cast %297 : vector<16xf32> to vector<16x1xf32>
    %cst_105 = arith.constant 3.200000e+01 : f32
    %299 = vector.broadcast %cst_105 : f32 to vector<16x1xf32>
    %300 = arith.divf %298, %299 : vector<16x1xf32>
    %301 = vector.broadcast %300 : vector<16x1xf32> to vector<16x32xf32>
    %302 = arith.subf %284, %301 : vector<16x32xf32>
    %303 = arith.mulf %302, %302 : vector<16x32xf32>
    %cst_106 = arith.constant dense<0.000000e+00> : vector<16xf32>
    %304 = vector.multi_reduction <add>, %303, %cst_106 [1] : vector<16x32xf32> to vector<16xf32>
    %305 = vector.shape_cast %304 : vector<16xf32> to vector<16x1xf32>
    %cst_107 = arith.constant 3.200000e+01 : f32
    %306 = vector.broadcast %cst_107 : f32 to vector<16x1xf32>
    %307 = arith.divf %305, %306 : vector<16x1xf32>
    %308 = vector.broadcast %300 : vector<16x1xf32> to vector<16x32xf32>
    %309 = arith.subf %284, %308 : vector<16x32xf32>
    %cst_108 = arith.constant 9.99999974E-6 : f32
    %310 = vector.broadcast %cst_108 : f32 to vector<16x1xf32>
    %311 = arith.addf %307, %310 : vector<16x1xf32>
    %312 = math.rsqrt %311 : vector<16x1xf32>
    %313 = vector.broadcast %312 : vector<16x1xf32> to vector<16x32xf32>
    %314 = arith.mulf %309, %313 : vector<16x32xf32>
    %315 = vector.broadcast %295 : vector<1x32xf32> to vector<16x32xf32>
    %316 = arith.mulf %314, %315 : vector<16x32xf32>
    %317 = vector.broadcast %296 : vector<1x32xf32> to vector<16x32xf32>
    %318 = arith.addf %316, %317 : vector<16x32xf32>
    %319 = arith.truncf %318 : vector<16x32xf32> to vector<16x32xbf16>
    %c0_109 = arith.constant 0 : index
    %c0_110 = arith.constant 0 : index
    %320 = vector.load %arg19[%c0_109, %c0_110] : memref<32x8xf32, #tpu.memory_space<vmem>>, vector<32x8xf32>
    %321 = arith.truncf %320 : vector<32x8xf32> to vector<32x8xbf16>
    %cst_111 = arith.constant dense<0.000000e+00> : vector<16x8xf32>
    %322 = tpu.matmul %319, %321, %cst_111 {dimension_numbers = #tpu.dot_dimension_numbers<[1], [0], [0], [1], [0, 0, 1, 1], [], []>} : vector<16x32xbf16>, vector<32x8xbf16>, vector<16x8xf32> -> vector<16x8xf32>
    %c0_112 = arith.constant 0 : index
    %c0_113 = arith.constant 0 : index
    %323 = vector.load %arg20[%c0_112, %c0_113] : memref<1x8xf32, #tpu.memory_space<vmem>>, vector<1x8xf32>
    %324 = vector.broadcast %323 : vector<1x8xf32> to vector<16x8xf32>
    %325 = arith.addf %322, %324 : vector<16x8xf32>
    %326 = vector.shape_cast %294 : vector<2x64x8xf32> to vector<128x8xf32>
    %327 = arith.truncf %326 : vector<128x8xf32> to vector<128x8xbf16>
    %c0_114 = arith.constant 0 : index
    %c0_115 = arith.constant 0 : index
    %328 = vector.load %arg21[%c0_114, %c0_115] : memref<8x16xf32, #tpu.memory_space<vmem>>, vector<8x16xf32>
    %329 = arith.truncf %328 : vector<8x16xf32> to vector<8x16xbf16>
    %cst_116 = arith.constant dense<0.000000e+00> : vector<128x16xf32>
    %330 = tpu.matmul %327, %329, %cst_116 {dimension_numbers = #tpu.dot_dimension_numbers<[1], [0], [0], [1], [0, 0, 1, 1], [], []>} : vector<128x8xbf16>, vector<8x16xbf16>, vector<128x16xf32> -> vector<128x16xf32>
    %c0_117 = arith.constant 0 : index
    %c0_118 = arith.constant 0 : index
    %331 = vector.load %arg22[%c0_117, %c0_118] : memref<1x16xf32, #tpu.memory_space<vmem>>, vector<1x16xf32>
    %332 = vector.broadcast %331 : vector<1x16xf32> to vector<128x16xf32>
    %333 = arith.addf %330, %332 : vector<128x16xf32>
    %334 = vector.shape_cast %333 : vector<128x16xf32> to vector<2x64x16xf32>
    %335 = vector.extract_strided_slice %334 {offsets = [0, 0, 0], sizes = [2, 64, 8], strides = [1, 1, 1]} : vector<2x64x16xf32> to vector<2x64x8xf32>
    %336 = vector.extract_strided_slice %334 {offsets = [0, 0, 8], sizes = [2, 64, 8], strides = [1, 1, 1]} : vector<2x64x16xf32> to vector<2x64x8xf32>
    %337 = vector.shape_cast %325 : vector<16x8xf32> to vector<2x8x8xf32>
    %338 = arith.truncf %337 : vector<2x8x8xf32> to vector<2x8x8xbf16>
    %339 = arith.truncf %335 : vector<2x64x8xf32> to vector<2x64x8xbf16>
    "tpu.trace_start"() <{level = 10 : i32, message = "bqd,bkd->bqk"}> : () -> ()
    %cst_119 = arith.constant dense<0.000000e+00> : vector<2x8x64xf32>
    %340 = tpu.matmul %338, %339, %cst_119 {dimension_numbers = #tpu.dot_dimension_numbers<[2], [2], [1], [1], [0, 0, 0, 1, 1, 1], [0], [0]>} : vector<2x8x8xbf16>, vector<2x64x8xbf16>, vector<2x8x64xf32> -> vector<2x8x64xf32>
    "tpu.trace_stop"() : () -> ()
    %cst_120 = arith.constant 0.353553385 : f32
    %341 = vector.broadcast %cst_120 : f32 to vector<2x8x64xf32>
    %342 = arith.mulf %340, %341 : vector<2x8x64xf32>
    %cst_121 = arith.constant dense<0xFF800000> : vector<2x8xf32>
    %343 = vector.multi_reduction <maximumf>, %342, %cst_121 [2] : vector<2x8x64xf32> to vector<2x8xf32>
    %344 = vector.shape_cast %343 : vector<2x8xf32> to vector<2x8x1xf32>
    %345 = vector.broadcast %344 : vector<2x8x1xf32> to vector<2x8x64xf32>
    %346 = arith.subf %342, %345 : vector<2x8x64xf32>
    %347 = math.exp %346 : vector<2x8x64xf32>
    %cst_122 = arith.constant dense<0.000000e+00> : vector<2x8xf32>
    %348 = vector.multi_reduction <add>, %347, %cst_122 [2] : vector<2x8x64xf32> to vector<2x8xf32>
    %349 = vector.shape_cast %348 : vector<2x8xf32> to vector<2x8x1xf32>
    %350 = tpu.reciprocal %349 {approx = true} : vector<2x8x1xf32> -> vector<2x8x1xf32>
    %351 = vector.broadcast %350 : vector<2x8x1xf32> to vector<2x8x64xf32>
    %352 = arith.mulf %347, %351 : vector<2x8x64xf32>
    %353 = arith.truncf %352 : vector<2x8x64xf32> to vector<2x8x64xbf16>
    %354 = arith.truncf %336 : vector<2x64x8xf32> to vector<2x64x8xbf16>
    "tpu.trace_start"() <{level = 10 : i32, message = "bqk,bkd->bqd"}> : () -> ()
    %cst_123 = arith.constant dense<0.000000e+00> : vector<2x8x8xf32>
    %355 = tpu.matmul %353, %354, %cst_123 {dimension_numbers = #tpu.dot_dimension_numbers<[2], [1], [1], [2], [0, 0, 0, 1, 1, 2], [0], [0]>} : vector<2x8x64xbf16>, vector<2x64x8xbf16>, vector<2x8x8xf32> -> vector<2x8x8xf32>
    "tpu.trace_stop"() : () -> ()
    %356 = vector.shape_cast %355 : vector<2x8x8xf32> to vector<16x8xf32>
    %357 = arith.truncf %356 : vector<16x8xf32> to vector<16x8xbf16>
    %c0_124 = arith.constant 0 : index
    %c0_125 = arith.constant 0 : index
    %358 = vector.load %arg23[%c0_124, %c0_125] : memref<8x32xf32, #tpu.memory_space<vmem>>, vector<8x32xf32>
    %359 = arith.truncf %358 : vector<8x32xf32> to vector<8x32xbf16>
    %cst_126 = arith.constant dense<0.000000e+00> : vector<16x32xf32>
    %360 = tpu.matmul %357, %359, %cst_126 {dimension_numbers = #tpu.dot_dimension_numbers<[1], [0], [0], [1], [0, 0, 1, 1], [], []>} : vector<16x8xbf16>, vector<8x32xbf16>, vector<16x32xf32> -> vector<16x32xf32>
    %c0_127 = arith.constant 0 : index
    %c0_128 = arith.constant 0 : index
    %361 = vector.load %arg24[%c0_127, %c0_128] : memref<1x32xf32, #tpu.memory_space<vmem>>, vector<1x32xf32>
    %362 = vector.broadcast %361 : vector<1x32xf32> to vector<16x32xf32>
    %363 = arith.addf %360, %362 : vector<16x32xf32>
    %364 = arith.addf %284, %363 : vector<16x32xf32>
    %c1_129 = arith.constant 1 : index
    %c0_130 = arith.constant 0 : index
    %c0_131 = arith.constant 0 : index
    %365 = vector.load %arg10[%c1_129, %c0_130, %c0_131] : memref<2x1x32xf32, #tpu.memory_space<vmem>>, vector<1x1x32xf32>
    %366 = vector.shape_cast %365 : vector<1x1x32xf32> to vector<1x32xf32>
    %c1_132 = arith.constant 1 : index
    %c0_133 = arith.constant 0 : index
    %c0_134 = arith.constant 0 : index
    %367 = vector.load %arg11[%c1_132, %c0_133, %c0_134] : memref<2x1x32xf32, #tpu.memory_space<vmem>>, vector<1x1x32xf32>
    %368 = vector.shape_cast %367 : vector<1x1x32xf32> to vector<1x32xf32>
    %cst_135 = arith.constant dense<0.000000e+00> : vector<16xf32>
    %369 = vector.multi_reduction <add>, %364, %cst_135 [1] : vector<16x32xf32> to vector<16xf32>
    %370 = vector.shape_cast %369 : vector<16xf32> to vector<16x1xf32>
    %cst_136 = arith.constant 3.200000e+01 : f32
    %371 = vector.broadcast %cst_136 : f32 to vector<16x1xf32>
    %372 = arith.divf %370, %371 : vector<16x1xf32>
    %373 = vector.broadcast %372 : vector<16x1xf32> to vector<16x32xf32>
    %374 = arith.subf %364, %373 : vector<16x32xf32>
    %375 = arith.mulf %374, %374 : vector<16x32xf32>
    %cst_137 = arith.constant dense<0.000000e+00> : vector<16xf32>
    %376 = vector.multi_reduction <add>, %375, %cst_137 [1] : vector<16x32xf32> to vector<16xf32>
    %377 = vector.shape_cast %376 : vector<16xf32> to vector<16x1xf32>
    %cst_138 = arith.constant 3.200000e+01 : f32
    %378 = vector.broadcast %cst_138 : f32 to vector<16x1xf32>
    %379 = arith.divf %377, %378 : vector<16x1xf32>
    %380 = vector.broadcast %372 : vector<16x1xf32> to vector<16x32xf32>
    %381 = arith.subf %364, %380 : vector<16x32xf32>
    %cst_139 = arith.constant 9.99999974E-6 : f32
    %382 = vector.broadcast %cst_139 : f32 to vector<16x1xf32>
    %383 = arith.addf %379, %382 : vector<16x1xf32>
    %384 = math.rsqrt %383 : vector<16x1xf32>
    %385 = vector.broadcast %384 : vector<16x1xf32> to vector<16x32xf32>
    %386 = arith.mulf %381, %385 : vector<16x32xf32>
    %387 = vector.broadcast %366 : vector<1x32xf32> to vector<16x32xf32>
    %388 = arith.mulf %386, %387 : vector<16x32xf32>
    %389 = vector.broadcast %368 : vector<1x32xf32> to vector<16x32xf32>
    %390 = arith.addf %388, %389 : vector<16x32xf32>
    %391 = arith.truncf %390 : vector<16x32xf32> to vector<16x32xbf16>
    %c1_140 = arith.constant 1 : index
    %c0_141 = arith.constant 0 : index
    %c0_142 = arith.constant 0 : index
    %392 = vector.load %arg12[%c1_140, %c0_141, %c0_142] : memref<2x32x64xf32, #tpu.memory_space<vmem>>, vector<1x32x64xf32>
    %393 = vector.shape_cast %392 : vector<1x32x64xf32> to vector<32x64xf32>
    %394 = arith.truncf %393 : vector<32x64xf32> to vector<32x64xbf16>
    %cst_143 = arith.constant dense<0.000000e+00> : vector<16x64xf32>
    %395 = tpu.matmul %391, %394, %cst_143 {dimension_numbers = #tpu.dot_dimension_numbers<[1], [0], [0], [1], [0, 0, 1, 1], [], []>} : vector<16x32xbf16>, vector<32x64xbf16>, vector<16x64xf32> -> vector<16x64xf32>
    %c1_144 = arith.constant 1 : index
    %c0_145 = arith.constant 0 : index
    %c0_146 = arith.constant 0 : index
    %396 = vector.load %arg13[%c1_144, %c0_145, %c0_146] : memref<2x1x64xf32, #tpu.memory_space<vmem>>, vector<1x1x64xf32>
    %397 = vector.shape_cast %396 : vector<1x1x64xf32> to vector<1x64xf32>
    %398 = vector.broadcast %397 : vector<1x64xf32> to vector<16x64xf32>
    %399 = arith.addf %395, %398 : vector<16x64xf32>
    %400 = arith.mulf %399, %399 : vector<16x64xf32>
    %401 = arith.mulf %399, %400 : vector<16x64xf32>
    %cst_147 = arith.constant 4.471500e-02 : f32
    %402 = vector.broadcast %cst_147 : f32 to vector<16x64xf32>
    %403 = arith.mulf %402, %401 : vector<16x64xf32>
    %404 = arith.addf %399, %403 : vector<16x64xf32>
    %cst_148 = arith.constant 0.797884583 : f32
    %405 = vector.broadcast %cst_148 : f32 to vector<16x64xf32>
    %406 = arith.mulf %405, %404 : vector<16x64xf32>
    %407 = math.tanh %406 : vector<16x64xf32>
    %cst_149 = arith.constant 1.000000e+00 : f32
    %408 = vector.broadcast %cst_149 : f32 to vector<16x64xf32>
    %409 = arith.addf %408, %407 : vector<16x64xf32>
    %cst_150 = arith.constant 5.000000e-01 : f32
    %410 = vector.broadcast %cst_150 : f32 to vector<16x64xf32>
    %411 = arith.mulf %410, %409 : vector<16x64xf32>
    %412 = arith.mulf %399, %411 : vector<16x64xf32>
    %413 = arith.truncf %412 : vector<16x64xf32> to vector<16x64xbf16>
    %c1_151 = arith.constant 1 : index
    %c0_152 = arith.constant 0 : index
    %c0_153 = arith.constant 0 : index
    %414 = vector.load %arg14[%c1_151, %c0_152, %c0_153] : memref<2x64x32xf32, #tpu.memory_space<vmem>>, vector<1x64x32xf32>
    %415 = vector.shape_cast %414 : vector<1x64x32xf32> to vector<64x32xf32>
    %416 = arith.truncf %415 : vector<64x32xf32> to vector<64x32xbf16>
    %cst_154 = arith.constant dense<0.000000e+00> : vector<16x32xf32>
    %417 = tpu.matmul %413, %416, %cst_154 {dimension_numbers = #tpu.dot_dimension_numbers<[1], [0], [0], [1], [0, 0, 1, 1], [], []>} : vector<16x64xbf16>, vector<64x32xbf16>, vector<16x32xf32> -> vector<16x32xf32>
    %418 = arith.addf %364, %417 : vector<16x32xf32>
    %c1_155 = arith.constant 1 : index
    %c0_156 = arith.constant 0 : index
    %c0_157 = arith.constant 0 : index
    %419 = vector.load %arg15[%c1_155, %c0_156, %c0_157] : memref<2x1x32xf32, #tpu.memory_space<vmem>>, vector<1x1x32xf32>
    %420 = vector.shape_cast %419 : vector<1x1x32xf32> to vector<1x32xf32>
    %421 = vector.broadcast %420 : vector<1x32xf32> to vector<16x32xf32>
    %422 = arith.addf %418, %421 : vector<16x32xf32>
    %c0_158 = arith.constant 0 : index
    %c0_159 = arith.constant 0 : index
    %423 = vector.load %arg25[%c0_158, %c0_159] : memref<1x32xf32, #tpu.memory_space<vmem>>, vector<1x32xf32>
    %c0_160 = arith.constant 0 : index
    %c0_161 = arith.constant 0 : index
    %424 = vector.load %arg26[%c0_160, %c0_161] : memref<1x32xf32, #tpu.memory_space<vmem>>, vector<1x32xf32>
    %cst_162 = arith.constant dense<0.000000e+00> : vector<16xf32>
    %425 = vector.multi_reduction <add>, %422, %cst_162 [1] : vector<16x32xf32> to vector<16xf32>
    %426 = vector.shape_cast %425 : vector<16xf32> to vector<16x1xf32>
    %cst_163 = arith.constant 3.200000e+01 : f32
    %427 = vector.broadcast %cst_163 : f32 to vector<16x1xf32>
    %428 = arith.divf %426, %427 : vector<16x1xf32>
    %429 = vector.broadcast %428 : vector<16x1xf32> to vector<16x32xf32>
    %430 = arith.subf %422, %429 : vector<16x32xf32>
    %431 = arith.mulf %430, %430 : vector<16x32xf32>
    %cst_164 = arith.constant dense<0.000000e+00> : vector<16xf32>
    %432 = vector.multi_reduction <add>, %431, %cst_164 [1] : vector<16x32xf32> to vector<16xf32>
    %433 = vector.shape_cast %432 : vector<16xf32> to vector<16x1xf32>
    %cst_165 = arith.constant 3.200000e+01 : f32
    %434 = vector.broadcast %cst_165 : f32 to vector<16x1xf32>
    %435 = arith.divf %433, %434 : vector<16x1xf32>
    %436 = vector.broadcast %428 : vector<16x1xf32> to vector<16x32xf32>
    %437 = arith.subf %422, %436 : vector<16x32xf32>
    %cst_166 = arith.constant 9.99999974E-6 : f32
    %438 = vector.broadcast %cst_166 : f32 to vector<16x1xf32>
    %439 = arith.addf %435, %438 : vector<16x1xf32>
    %440 = math.rsqrt %439 : vector<16x1xf32>
    %441 = vector.broadcast %440 : vector<16x1xf32> to vector<16x32xf32>
    %442 = arith.mulf %437, %441 : vector<16x32xf32>
    %443 = vector.broadcast %423 : vector<1x32xf32> to vector<16x32xf32>
    %444 = arith.mulf %442, %443 : vector<16x32xf32>
    %445 = vector.broadcast %424 : vector<1x32xf32> to vector<16x32xf32>
    %446 = arith.addf %444, %445 : vector<16x32xf32>
    %447 = arith.truncf %446 : vector<16x32xf32> to vector<16x32xbf16>
    %c0_167 = arith.constant 0 : index
    %c0_168 = arith.constant 0 : index
    %448 = vector.load %arg27[%c0_167, %c0_168] : memref<32x128xf32, #tpu.memory_space<vmem>>, vector<32x128xf32>
    %449 = arith.truncf %448 : vector<32x128xf32> to vector<32x128xbf16>
    %cst_169 = arith.constant dense<0.000000e+00> : vector<16x128xf32>
    %450 = tpu.matmul %447, %449, %cst_169 {dimension_numbers = #tpu.dot_dimension_numbers<[1], [0], [0], [1], [0, 0, 1, 1], [], []>} : vector<16x32xbf16>, vector<32x128xbf16>, vector<16x128xf32> -> vector<16x128xf32>
    %c0_170 = arith.constant 0 : index
    %c0_171 = arith.constant 0 : index
    %451 = vector.load %arg28[%c0_170, %c0_171] : memref<1x128xf32, #tpu.memory_space<vmem>>, vector<1x128xf32>
    %452 = vector.broadcast %451 : vector<1x128xf32> to vector<16x128xf32>
    %453 = arith.addf %450, %452 : vector<16x128xf32>
    %454 = vector.shape_cast %453 : vector<16x128xf32> to vector<2x8x128xf32>
    %c0_172 = arith.constant 0 : index
    %c0_173 = arith.constant 0 : index
    %c0_174 = arith.constant 0 : index
    %455 = vector.load %arg29[%c0_172, %c0_173, %c0_174] : memref<2x8x128xf32, #tpu.memory_space<vmem>>, vector<2x8x128xf32>
    tpu.vector_store %arg29[%c0_172, %c0_173, %c0_174], %454 {strides = array<i32>} : memref<2x8x128xf32, #tpu.memory_space<vmem>>, vector<2x8x128xf32>,
    %456 = vector.extract_strided_slice %453 {offsets = [0, 0], sizes = [16, 64], strides = [1, 1]} : vector<16x128xf32> to vector<16x64xf32>
    %cst_175 = arith.constant dense<0xFF800000> : vector<16xf32>
    %457 = vector.multi_reduction <maximumf>, %456, %cst_175 [1] : vector<16x64xf32> to vector<16xf32>
    %458 = vector.shape_cast %457 : vector<16xf32> to vector<16x1xf32>
    %459 = vector.broadcast %458 : vector<16x1xf32> to vector<16x64xf32>
    %460 = arith.subf %456, %459 : vector<16x64xf32>
    %461 = math.exp %460 : vector<16x64xf32>
    %cst_176 = arith.constant dense<0.000000e+00> : vector<16xf32>
    %462 = vector.multi_reduction <add>, %461, %cst_176 [1] : vector<16x64xf32> to vector<16xf32>
    %463 = vector.shape_cast %462 : vector<16xf32> to vector<16x1xf32>
    %464 = math.log %463 : vector<16x1xf32>
    %c0_177 = arith.constant 0 : index
    %c0_178 = arith.constant 0 : index
    %465 = vector.load %arg1[%c0_177, %c0_178] : memref<16x1xi32, #tpu.memory_space<vmem>>, vector<16x1xi32>
    %466 = vector.broadcast %465 : vector<16x1xi32> to vector<16x64xi32>
    %467 = arith.cmpi eq, %1, %466 : vector<16x64xi32>
    %cst_179 = arith.constant 0.000000e+00 : f32
    %468 = vector.broadcast %cst_179 : f32 to vector<16x64xf32>
    %469 = arith.select %467, %460, %468 : vector<16x64xi1>, vector<16x64xf32>
    %cst_180 = arith.constant dense<0.000000e+00> : vector<16xf32>
    %470 = vector.multi_reduction <add>, %469, %cst_180 [1] : vector<16x64xf32> to vector<16xf32>
    %471 = vector.shape_cast %470 : vector<16xf32> to vector<16x1xf32>
    %472 = arith.subf %464, %471 : vector<16x1xf32>
    %473 = tpu.iota {dimensions = array<i32: 1>} : vector<2x8x1xi32>
    %474 = vector.shape_cast %473 : vector<2x8x1xi32> to vector<16x1xi32>
    %c7_i32 = arith.constant 7 : i32
    %475 = vector.broadcast %c7_i32 : i32 to vector<16x1xi32>
    %476 = arith.cmpi slt, %474, %475 : vector<16x1xi32>
    %cst_181 = arith.constant 1.000000e+00 : f32
    %cst_182 = arith.constant 0.000000e+00 : f32
    %477 = vector.broadcast %cst_181 : f32 to vector<16x1xf32>
    %478 = vector.broadcast %cst_182 : f32 to vector<16x1xf32>
    %479 = arith.select %476, %477, %478 : vector<16x1xi1>, vector<16x1xf32>
    %480 = arith.mulf %472, %479 : vector<16x1xf32>
    %cst_183 = arith.constant dense<0.000000e+00> : vector<1xf32>
    %481 = vector.multi_reduction <add>, %480, %cst_183 [0] : vector<16x1xf32> to vector<1xf32>
    %482 = vector.shape_cast %481 : vector<1xf32> to vector<1x1xf32>
    %cst_184 = arith.constant 1.400000e+01 : f32
    %483 = vector.broadcast %cst_184 : f32 to vector<1x1xf32>
    %484 = arith.divf %482, %483 : vector<1x1xf32>
    %c0_185 = arith.constant 0 : index
    %c0_186 = arith.constant 0 : index
    %485 = vector.load %arg30[%c0_185, %c0_186] : memref<1x1xf32, #tpu.memory_space<vmem>>, vector<1x1xf32>
    tpu.vector_store %arg30[%c0_185, %c0_186], %484 {strides = array<i32>} : memref<1x1xf32, #tpu.memory_space<vmem>>, vector<1x1xf32>,
    return
  }
}

</mosaic_0001>

<bundles_post_ra>
// kernel: neurocache_forward.1
= control target key start
LH: loop header
LB: loop body
LE: loop exit
PB: predicated region body
PF: predicated region fallthrough
CT: control target
= control target key end

     0   :  { %s4697_s6 = smov 1   ;;  %s4698_s10 = smov 2   ;;  %s5705_s0 = inlined_call_operand.smem [shape: u32[31], index: -1, kind: input, shape index: {}] }
   0x1   :  { %s4754_s5 = sld [smem:[%s5705_s0]]   ;;  %s4699_s14 = smov 3  }
   0x2   :  { %s4759_s9 = sld [smem:[%s5705_s0 + %s4697_s6]]   ;;  %s4700_s18 = smov 4  }
   0x3   :  { %s4764_s13 = sld [smem:[%s5705_s0 + %s4698_s10]]   ;;  %s4701_s22 = smov 5  }
   0x4   :  { %s4769_s17 = sld [smem:[%s5705_s0 + %s4699_s14]]   ;;  %s4702_s26 = smov 6  }
   0x5   :  { %s4774_s21 = sld [smem:[%s5705_s0 + %s4700_s18]]   ;;  %s4703_s30 = smov 7  }
   0x6   :  { %s4779_s25 = sld [smem:[%s5705_s0 + %s4701_s22]]   ;;  %s4704_s4 = smov 8  }
   0x7   :  { %s4784_s29 = sld [smem:[%s5705_s0 + %s4702_s26]]   ;;  %s4705_s10 = smov 9  }
   0x8   :  { %5710 = sst [smem:[#allocation21_spill]] %s4759_s9  ;;  %s4706_s15 = smov 10  }
   0x9   :  { %s4789_s3 = sld [smem:[%s5705_s0 + %s4703_s30]]   ;;  %s4707_s20 = smov 11  }
   0xa   :  { %s4794_s8 = sld [smem:[%s5705_s0 + %s4704_s4]]   ;;  %s4708_s26 = smov 12  }
   0xb   :  { %s4799_s14 = sld [smem:[%s5705_s0 + %s4705_s10]]   ;;  %s4709_s1 = smov 13  }
   0xc   :  { %s4804_s19 = sld [smem:[%s5705_s0 + %s4706_s15]]   ;;  %s4710_s7 = smov 14  }
   0xd   :  { %s4809_s24 = sld [smem:[%s5705_s0 + %s4707_s20]]   ;;  %s4711_s15 = smov 15  }
   0xe   :  { %s4814_s30 = sld [smem:[%s5705_s0 + %s4708_s26]]   ;;  %s4712_s22 = smov 16  }
   0xf   :  { %s4819_s6 = sld [smem:[%s5705_s0 + %s4709_s1]]   ;;  %s4713_s28 = smov 17  }
  0x10   :  { %s4824_s12 = sld [smem:[%s5705_s0 + %s4710_s7]]   ;;  %s4714_s7 = smov 18  }
  0x11   :  { %s4829_s20 = sld [smem:[%s5705_s0 + %s4711_s15]]   ;;  %s4715_s15 = smov 19  }
  0x12   :  { %s4834_s27 = sld [smem:[%s5705_s0 + %s4712_s22]]   ;;  %s4716_s22 = smov 20  }
  0x13   :  { %s4839_s4 = sld [smem:[%s5705_s0 + %s4713_s28]]   ;;  %s4717_s28 = smov 21  }
  0x14   :  { %s4844_s9 = sld [smem:[%s5705_s0 + %s4714_s7]]   ;;  %s4718_s7 = smov 22  }
  0x15   :  { %5711 = sst [smem:[#allocation22_spill]] %s4819_s6 }
  0x17   :  { %5712 = sst [smem:[#allocation23_spill]] %s4829_s20 }
  0x18   :  { %5713 = sst [smem:[#allocation24_spill]] %s4834_s27 }
  0x19   :  { %5714 = sst [smem:[#allocation25_spill]] %s4839_s4 }
  0x1a   :  { %5715 = sst [smem:[#allocation26_spill]] %s4844_s9 }
  0x1b   :  { %s4849_s20 = sld [smem:[%s5705_s0 + %s4715_s15]]   ;;  %s4719_s15 = smov 23  }
  0x1c   :  { %s4854_s27 = sld [smem:[%s5705_s0 + %s4716_s22]]   ;;  %s4720_s22 = smov 24  }
  0x1d   :  { %s4859_s4 = sld [smem:[%s5705_s0 + %s4717_s28]]   ;;  %s4721_s28 = smov 25  }
  0x1e   :  { %s4864_s9 = sld [smem:[%s5705_s0 + %s4718_s7]]   ;;  %s4722_s7 = smov 26  }
  0x1f   :  { %s4869_s6 = sld [smem:[%s5705_s0 + %s4719_s15]]   ;;  %s4723_s15 = smov 27  }
  0x22   :  { %5716 = sst [smem:[#allocation27_spill]] %s4854_s27 }
  0x23   :  { %5717 = sst [smem:[#allocation28_spill]] %s4859_s4 }
  0x24   :  { %5718 = sst [smem:[#allocation29_spill]] %s4864_s9 }
  0x25   :  { %5719 = sst [smem:[#allocation30_spill]] %s4869_s6 }
  0x26   :  { %s4874_s27 = sld [smem:[%s5705_s0 + %s4720_s22]]   ;;  %s4724_s22 = smov 28  }
  0x27   :  { %s4879_s4 = sld [smem:[%s5705_s0 + %s4721_s28]]   ;;  %s4725_s28 = smov 29  }
  0x28   :  { %s4884_s9 = sld [smem:[%s5705_s0 + %s4722_s7]]   ;;  %s4726_s7 = smov 30  }
  0x29   :  { %s4889_s6 = sld [smem:[%s5705_s0 + %s4723_s15]]  }
  0x2c   :  { %5720 = sst [smem:[#allocation31_spill]] %s4874_s27 }
  0x2d   :  { %5721 = sst [smem:[#allocation32_spill]] %s4879_s4 }
  0x2e   :  { %5722 = sst [smem:[#allocation33_spill]] %s4884_s9 }
  0x2f   :  { %s4894_s27 = sld [smem:[%s5705_s0 + %s4724_s22]]  }
  0x30   :  { %s4899_s4 = sld [smem:[%s5705_s0 + %s4725_s28]]  }
  0x31   :  { %s4904_s9 = sld [smem:[%s5705_s0 + %s4726_s7]]  }
  0x32   :  { %67 = vsyncpa [#allocation5], 0 }
  0x33   :  { %68 = vsyncpa [#allocation3], 0 }
  0x34   :  { %69 = vsyncpa [#allocation8], 0 }
  0x35   :  { %70 = vsyncpa [#allocation11], 0 }
  0x36   :  { %71 = vsyncpa [#allocation4], 0 }
  0x37   :  { %72 = vsyncpa [#allocation14], 0  ;;  %s83_s15 = sshll.u32 %s4764_s13, 4  ;;  %s4727_s16 = smov [#allocation7]   ;;  %s84_s15 = int_to_ptr.vmem [resolvable:$true] %s83_s15 }
  0x38   :  { %s108_s18 = sshll.u32 %s4727_s16, 4  ;;  %s4541_s22 = scalar_lea.hbm %s4784_s29, 1024  ;;  %s109_s18 = int_to_ptr.vmem [resolvable:$true] %s108_s18 }
  0x39   :  { %p4542_p0 = scmp.ne.s32.totalorder %s4784_s29, %s4541_s22  ;;  %p4545_p1 = scmp.lt.u32.totalorder %s4541_s22, %s4784_s29 }
  0x3b   :  { %p4547_p2 = pnand %p4545_p1, %p4542_p0 }
  0x3d   :  { %4550 = shalt.err (!%p4547_p2)
}
  0x3e   :  { %s4551_s0 = scalar_lea.vmem %s109_s18, 1024  ;;  %p4556_p4 = scmp.lt.s32.totalorder %s109_s18, %s109_s18 }
  0x3f   :  { %p4552_p3 = scmp.ne.s32.totalorder %s109_s18, %s4551_s0  ;;  %p4557_p5 = scmp.lt.s32.totalorder %s4551_s0, %s4551_s0 }
  0x41   :  { %p4558_p6 = por %p4557_p5, %p4556_p4 }
  0x43   :  { %p4559_p7 = pnand %p4558_p6, %p4552_p3 }
  0x45   :  { %4562 = shalt.err (!%p4559_p7)
}
  0x46   :  { %s4728_s23 = smov 128   ;;  %s4729_s26 = smov 8  }
  0x47   :  { %114 = dma.hbm_to_vmem [thread:$0]  %s4784_s29, 1024, %s109_s18, [#allocation8], %s4728_s23, %s4728_s23, %s4729_s26  }
  0x48   :  { %s4563_s13 = scalar_lea.vmem %s84_s15, 16  ;;  %p4568_p9 = scmp.lt.s32.totalorder %s84_s15, %s84_s15 }
  0x49   :  { %p4564_p8 = scmp.ne.s32.totalorder %s84_s15, %s4563_s13  ;;  %p4569_p10 = scmp.lt.s32.totalorder %s4563_s13, %s4563_s13 }
  0x4b   :  { %p4570_p11 = por %p4569_p10, %p4568_p9 }
  0x4d   :  { %p4571_p12 = pnand %p4570_p11, %p4564_p8 }
  0x4f   :  { %4574 = shalt.err (!%p4571_p12)
}
  0x50   :  { %s4730_s28 = smov [#allocation2]   ;;  %s4731_s1 = smov [#allocation6]  }
  0x51   :  { %86 = dma.vmem_to_smem %s84_s15, 16, %s4730_s28, [#allocation5]  }
  0x52   :  { %s92_s2 = sshll.u32 %s4731_s1, 4  ;;  %s4732_s7 = smov [#allocation9]   ;;  %s93_s2 = int_to_ptr.vmem [resolvable:$true] %s92_s2 }
  0x53   :  { %s144_s10 = sshll.u32 %s4732_s7, 4  ;;  %s4575_s29 = scalar_lea.hbm %s4769_s17, 1024  ;;  %s4914_s10 = int_to_ptr.vmem [resolvable:$true] %s144_s10 }
  0x54   :  { %p4576_p13 = scmp.ne.s32.totalorder %s4769_s17, %s4575_s29  ;;  %p4579_p0 = scmp.lt.u32.totalorder %s4575_s29, %s4769_s17 }
  0x56   :  { %p4581_p1 = pnand %p4579_p0, %p4576_p13 }
  0x58   :  { %4584 = shalt.err (!%p4581_p1)
}
  0x59   :  { %s4585_s11 = scalar_lea.vmem %s93_s2, 1024  ;;  %p4590_p3 = scmp.lt.s32.totalorder %s93_s2, %s93_s2 }
  0x5a   :  { %p4586_p2 = scmp.ne.s32.totalorder %s93_s2, %s4585_s11  ;;  %p4591_p4 = scmp.lt.s32.totalorder %s4585_s11, %s4585_s11 }
  0x5c   :  { %p4592_p5 = por %p4591_p4, %p4590_p3 }
  0x5e   :  { %p4593_p6 = pnand %p4592_p5, %p4586_p2 }
  0x60   :  { %4596 = shalt.err (!%p4593_p6)
}
  0x61   :  { %98 = dma.hbm_to_vmem [thread:$0]  %s4769_s17, 1024, %s93_s2, [#allocation3], %s4728_s23, %s4728_s23, %s4729_s26  }
  0x62   :  { %s4597_s15 = scalar_lea.hbm %s4849_s20, 512 }
  0x63   :  { %p4598_p7 = scmp.ne.s32.totalorder %s4849_s20, %s4597_s15  ;;  %p4601_p8 = scmp.lt.u32.totalorder %s4597_s15, %s4849_s20 }
  0x65   :  { %p4603_p9 = pnand %p4601_p8, %p4598_p7 }
  0x67   :  { %4606 = shalt.err (!%p4603_p9)
}
  0x68   :  { %s4607_s16 = scalar_lea.vmem %s4914_s10, 512  ;;  %p4612_p11 = scmp.lt.s32.totalorder %s4914_s10, %s4914_s10 }
  0x69   :  { %p4608_p10 = scmp.ne.s32.totalorder %s4914_s10, %s4607_s16  ;;  %p4613_p12 = scmp.lt.s32.totalorder %s4607_s16, %s4607_s16 }
  0x6b   :  { %p4614_p13 = por %p4613_p12, %p4612_p11 }
  0x6d   :  { %p4615_p0 = pnand %p4614_p13, %p4608_p10 }
  0x6f   :  { %4618 = shalt.err (!%p4615_p0)
}
  0x70   :  { %150 = dma.hbm_to_vmem [thread:$0]  %s4849_s20, 512, %s4914_s10, [#allocation8], %s4728_s23, %s4728_s23, %s4729_s26  }
  0x71   :  { %s4733_s17 = smov [#allocation10]   ;;  %s4619_s22 = scalar_lea.hbm %s4889_s6, 512 }
  0x72   :  { %s170_s18 = sshll.u32 %s4733_s17, 4  ;;  %p4620_p1 = scmp.ne.s32.totalorder %s4889_s6, %s4619_s22  ;;  %s171_s18 = int_to_ptr.vmem [resolvable:$true] %s170_s18 }
  0x73   :  { %p4623_p2 = scmp.lt.u32.totalorder %s4619_s22, %s4889_s6 }
  0x75   :  { %p4625_p3 = pnand %p4623_p2, %p4620_p1 }
  0x77   :  { %4628 = shalt.err (!%p4625_p3)
}
  0x78   :  { %s4629_s0 = scalar_lea.vmem %s171_s18, 512  ;;  %p4634_p5 = scmp.lt.s32.totalorder %s171_s18, %s171_s18 }
  0x79   :  { %p4630_p4 = scmp.ne.s32.totalorder %s171_s18, %s4629_s0  ;;  %p4635_p6 = scmp.lt.s32.totalorder %s4629_s0, %s4629_s0 }
  0x7b   :  { %p4636_p7 = por %p4635_p6, %p4634_p5 }
  0x7d   :  { %p4637_p8 = pnand %p4636_p7, %p4630_p4 }
  0x7f   :  { %4640 = shalt.err (!%p4637_p8)
}
  0x80   :  { %176 = dma.hbm_to_vmem [thread:$0]  %s4889_s6, 512, %s171_s18, [#allocation11], %s4728_s23, %s4728_s23, %s4729_s26  }
  0x81   :  { %4685 = dma.done.wait [#allocation5], 16  }
  0x82   :  { %4686 = vsyncadd [#allocation5], 4294967280 }
  0x83   :  { %4687 = dma.done.wait [#allocation3], 1024  }
  0x84   :  { %4688 = vsyncadd [#allocation3], 4294966272 }
  0x85   :  { %4689 = dma.done.wait [#allocation8], 1536  }
  0x86   :  { %4690 = vsyncadd [#allocation8], 4294965760 }
  0x87   :  { %4691 = dma.done.wait [#allocation11], 512  }
  0x88   :  { %4692 = vsyncadd [#allocation11], 4294966784 }
  0x89   :  { %194 = sfence }
  0x8a   :  { %v196_v0 = vld [vmem:[%s4754_s5] sm:$0xff]  ;;  %v4734_v2 = vmov 0   ;;  %v4735_v3 = vmov 0.0   ;;  %v212_v4 = vld [vmem:[#allocation6 + $0x8] sm:$0xff]  ;;  %v213_v5 = vld [vmem:[#allocation6 + $0x10] sm:$0xff]  ;;  %vm4736_vm0 = vmmov 0   ;;  %v198_v16 = vlaneseq }
  0x8b   :  { %v211_v1 = vld [vmem:[#allocation6] sm:$0xff]  ;;  %4367 = vset.pattern.permute.xlu0 %v4734_v2  ;;  %3953 = vmatprep.subr.bf16.mxu0 %v4735_v3  ;;  %v214_v6 = vld [vmem:[#allocation6 + $0x18] sm:$0xff]  ;;  %v197_v8 = vld [vmem:[%s4754_s5 + $0x8] sm:$0xff]  ;;  %vm223_vm3 = vcmask 523264   ;;  %vm273_vm4 = vcmask 261120   ;;  %s4737_s5 = smov 120  }
  0x8c   :  { %201 = vperm.xlu0 %4367, %v196_v0   ;;  %v219_v7 = vpack.c.bf16 %v212_v4, %v211_v1  ;;  %3965 = vmatprep.subr.bf16.mxu1 %v4735_v3  ;;  %v220_v9 = vpack.c.bf16 %v214_v6, %v213_v5  ;;  %v215_v10 = vld [vmem:[#allocation6 + $0x20] sm:$0xff]  ;;  %v216_v11 = vld [vmem:[#allocation6 + $0x28] sm:$0xff]  ;;  %v217_v13 = vld [vmem:[#allocation6 + $0x30] sm:$0xff]  ;;  %v4955_v17 = vand.u32 127, %v198_v16  ;;  %s4738_s6 = smov 96   ;;  %s4739_s20 = smov 112  }
  0x8d   :  { %4428 = vset.pattern.permute.xlu1 %v4734_v2  ;;  %v221_v12 = vpack.c.bf16 %v216_v11, %v215_v10  ;;  %v218_v14 = vld [vmem:[#allocation6 + $0x38] sm:$0xff]  ;;  %3961 = vmatprep.mubr.msk.bf16.mxu0 %vm4736_vm0, %v4735_v3  ;;  %v318_v39 = vld [vmem:[#allocation7] sm:$0xff]  ;;  %v319_v40 = vld [vmem:[#allocation7 + $0x8] sm:$0xff]  ;;  %s4740_s13 = smov 104   ;;  %vm406_vm5 = vcmask 64512   ;;  %s4741_s28 = smov 64  }
  0x8e   :  { %3954 = vmatpush3.bf16.msra.mxu0 %v219_v7  ;;  %3969 = vmatprep.mubr.msk.bf16.mxu1 %vm4736_vm0, %v4735_v3  ;;  %v222_v15 = vpack.c.bf16 %v218_v14, %v217_v13  ;;  %v320_v41 = vld [vmem:[#allocation7 + $0x10] sm:$0xff]  ;;  %v322_v42 = vpack.c.bf16 %v319_v40, %v318_v39  ;;  %v321_v43 = vld [vmem:[#allocation7 + $0x18] sm:$0xff]  ;;  %v3715_v53 = vld [vmem:[%s4774_s21] ss:$0 sm:$0xff]  ;;  %vm915_vm6 = vcmask 1043456   ;;  %s4742_s1 = smov 16  }
  0x8f   :  { %3955 = vmatprep.subr.bf16.mxu0 %v4735_v3  ;;  %v323_v44 = vpack.c.bf16 %v321_v43, %v320_v41  ;;  %v3716_v57 = vld [vmem:[%s4779_s25] ss:$0 sm:$0xff]  ;;  %s4743_s2 = smov 24   ;;  %vm1321_vm8 = vcmask 130048   ;;  %vm1324_vm9 = vcmask 195584   ;;  %s5725_s7 = sld [smem:[#allocation22_spill]] }
  0x90   :  { %204 = vperm.xlu0 %4367, %v197_v8   ;;  %3966 = vmatpush3.bf16.msra.mxu1 %v322_v42  ;;  %v3717_v62 = vld [vmem:[%s4789_s3] ss:$0 sm:$0xff]  ;;  %s5726_s10 = sld [smem:[#allocation23_spill]]  ;;  %s5730_s29 = sld [smem:[#allocation25_spill]] }
  0x91   :  { %3967 = vmatprep.subr.bf16.mxu1 %v4735_v3  ;;  %s5731_s11 = sld [smem:[#allocation26_spill]]  ;;  %s5732_s15 = sld [smem:[#allocation27_spill]] }
  0x92   :  { %3956 = vmatpush3.bf16.msra.mxu0 %v220_v9  ;;  %s5733_s16 = sld [smem:[#allocation30_spill]]  ;;  %s5734_s17 = sld [smem:[#allocation31_spill]] }
  0x93   :  { %3957 = vmatprep.subr.bf16.mxu0 %v4735_v3 }
  0x94   :  { %3968 = vmatpush3.bf16.msra.mxu1 %v323_v44 }
  0x95   :  { %3973 = vmatprep.subr.bf16.mxu1 %v4735_v3 }
  0x96   :  { %3958 = vmatpush3.bf16.msra.mxu0 %v221_v12 }
  0x97   :  { %3959 = vmatprep.subr.bf16.mxu0 %v4735_v3 }
  0x9a   :  { %3960 = vmatpush3.bf16.msra.mxu0 %v222_v15 }
  0x9b   :  { %3979 = vmatprep.subr.bf16.mxu0 %v4735_v3 }
 0x10b   :  { %v202_v18 = vpop.permute.xlu0 %201 }
 0x10c   :  { %vm206_vm1 = vcmp.eq.s32.totalorder %v4955_v17, %v202_v18 }
 0x10d   :  { %v208_v20 = vsel %vm206_vm1, 1.0, %v4735_v3 }
 0x10f   :  { %v205_v19 = vpop.permute.xlu0 %204 }
 0x110   :  { %vm207_vm2 = vcmp.eq.s32.totalorder %v4955_v17, %v205_v19 }
 0x111   :  { %v209_v21 = vsel %vm207_vm2, 1.0, %v4735_v3 }
 0x112   :  { %v210_v22 = vpack.c.bf16 %v209_v21, %v208_v20 }
 0x114   :  { %3962 = vmatmul.mubr.msk.bf16.vlgmr.msra.gmra.mrb[0].mxu0 %vm223_vm3, %v210_v22 }
 0x115   :  { %3981 = vmatprep.mubr.msk.bf16.mxu0 %vm4736_vm0, %v4735_v3 }
 0x1e7   :  { %v4964_v23 = vpop.f32.mrb[0].mxu0 }
 0x1e8   :  { %v3963_v24 = vpop.f32.mrb[1].mxu0  ;;  %v274_v25 = vsel %vm273_vm4, %v4964_v23, 0.0 }
 0x1e9   :  { %275 = vadd.xlane.f32.xlu1 %v274_v25  ;;  %v4968_v26 = vpop.f32.mrb[2].mxu0 }
 0x1ea   :  { %v3964_v27 = vpop.f32.mrb[3].mxu0  ;;  %v277_v28 = vsel %vm273_vm4, %v4968_v26, 0.0 }
 0x1ed   :  { %278 = vadd.xlane.f32.xlu1 %v277_v28 }
 0x276   :  { %v276_v29 = vpop.xlane.xlu1 %275 }
 0x277   :  { %v281_v30 = vmul.f32 0.03125, %v276_v29 }
 0x279   :  { %v283_v31 = vsub.f32 %v4964_v23, %v281_v30 }
 0x27a   :  { %v279_v32 = vpop.xlane.xlu1 %278 }
 0x27b   :  { %v282_v33 = vmul.f32 0.03125, %v279_v32  ;;  %v285_v34 = vmul.f32 %v283_v31, %v283_v31 }
 0x27d   :  { %v284_v35 = vsub.f32 %v4968_v26, %v282_v33  ;;  %v287_v36 = vsel %vm273_vm4, %v285_v34, 0.0 }
 0x27e   :  { %288 = vadd.xlane.f32.xlu0 %v287_v36 }
 0x27f   :  { %v286_v37 = vmul.f32 %v284_v35, %v284_v35 }
 0x281   :  { %v290_v38 = vsel %vm273_vm4, %v286_v37, 0.0 }
 0x282   :  { %291 = vadd.xlane.f32.xlu1 %v290_v38 }
 0x30b   :  { %v289_v45 = vpop.xlane.xlu0 %288 }
 0x30c   :  { %v293_v46 = vmul.f32 0.03125, %v289_v45 }
 0x30e   :  { %v295_v47 = vadd.f32 1e-05, %v293_v46 }
 0x30f   :  { %v292_v48 = vpop.xlane.xlu1 %291 }
 0x310   :  { %4429 = vrsqrt.f32 %v295_v47  ;;  %v294_v49 = vmul.f32 0.03125, %v292_v48  ;;  %v5066_v48 = vshrl.u32 %v198_v16, 7 }
 0x312   :  { %v296_v50 = vadd.f32 1e-05, %v294_v49  ;;  %vm5070_vm7 = vcmp.le.s32.totalorder %v4955_v17, %v5066_v48 }
 0x314   :  { %4431 = vrsqrt.f32 %v296_v50 }
 0x31a   :  { %v4430_v51 = vpop.eup %4429 }
 0x31b   :  { %v299_v52 = vmul.f32 %v4430_v51, %v283_v31 }
 0x31d   :  { %v307_v56 = vmul.f32 %v3715_v53, %v299_v52 }
 0x31e   :  { %v4432_v54 = vpop.eup %4431 }
 0x31f   :  { %v300_v55 = vmul.f32 %v4432_v54, %v284_v35  ;;  %v315_v59 = vadd.f32 %v3716_v57, %v307_v56 }
 0x321   :  { %v308_v58 = vmul.f32 %v3715_v53, %v300_v55 }
 0x323   :  { %v316_v60 = vadd.f32 %v3716_v57, %v308_v58 }
 0x325   :  { %v317_v61 = vpack.c.bf16 %v316_v60, %v315_v59 }
 0x327   :  { %3970 = vmatmul.mubr.msk.bf16.vlgmr.msra.gmra.mrb[0].mxu1 %vm273_vm4, %v317_v61 }
 0x328   :  { %3975 = vmatprep.mubr.msk.bf16.mxu1 %vm4736_vm0, %v4735_v3 }
 0x3fa   :  { %v368_v63 = vpop.f32.mrb[0].mxu1 }
 0x3fb   :  { %v3971_v0 = vpop.f32.mrb[1].mxu1  ;;  %v369_v2 = vadd.f32 %v3717_v62, %v368_v63 }
 0x3fc   :  { %v371_v1 = vpop.f32.mrb[2].mxu1 }
 0x3fd   :  { %v372_v4 = vadd.f32 %v3717_v62, %v371_v1  ;;  %v3972_v5 = vpop.f32.mrb[3].mxu1  ;;  %v395_v8 = vpack.c.bf16 %v369_v2, %v369_v2 }
 0x3ff   :  { %v4368_v6 = vpack.i.bf16 %v372_v4, %v369_v2  ;;  %v396_v7 = vpack.c.bf16 %v372_v4, %v372_v4 }
 0x401   :  { %4369 = vrot.lane.b32.xlu1 %v4368_v6, %s4737_s5  ;;  %454 = vrot.lane.b32.xlu0 %v396_v7, %s4738_s6 }
 0x405   :  { %4374 = vrot.lane.b32.xlu1 %v4368_v6, %s4739_s20 }
 0x409   :  { %4379 = vrot.lane.b32.xlu1 %v4368_v6, %s4740_s13 }
 0x40d   :  { %404 = vrot.lane.b32.xlu1 %v395_v8, %s4738_s6 }
 0x473   :  { %v4370_v9 = vpop.permute.xlu1 %4369  ;;  %v455_v10 = vpop.permute.xlu0 %454 }
 0x474   :  { %v4371_v11 = vunpack.i.l.bf16 %v4370_v9  ;;  %v460_v12 = vsel %vm406_vm5, %v455_v10, 0  ;;  %v4372_v13 = vunpack.i.h.bf16 %v4370_v9 }
 0x475   :  { %3980 = vmatpush3.bf16.xpose.msra.mxu0 %v460_v12 }
 0x476   :  { %v4990_v14 = vpack.c.bf16 %v4371_v11, %v4371_v11  ;;  %3991 = vmatprep.subr.bf16.mxu0 %v4735_v3  ;;  %v4995_v19 = vpack.c.bf16 %v4372_v13, %v4372_v13 }
 0x477   :  { %v4375_v15 = vpop.permute.xlu1 %4374 }
 0x478   :  { %503 = vrot.lane.b32.xlu1 %v4990_v14, %s4738_s6  ;;  %v4376_v18 = vunpack.i.l.bf16 %v4375_v15  ;;  %v4377_v22 = vunpack.i.h.bf16 %v4375_v15 }
 0x47a   :  { %v5002_v24 = vpack.c.bf16 %v4376_v18, %v4376_v18  ;;  %v5011_v30 = vpack.c.bf16 %v4377_v22, %v4377_v22 }
 0x47b   :  { %v4380_v20 = vpop.permute.xlu1 %4379 }
 0x47c   :  { %v4382_v21 = vunpack.i.h.bf16 %v4380_v20  ;;  %552 = vrot.lane.b32.xlu1 %v4995_v19, %s4738_s6  ;;  %3982 = vmatmul.mubr.msk.bf16.vlgmr.msra.gmra.mrb[4].mxu0 %vm406_vm5, %v396_v7  ;;  %v4381_v29 = vunpack.i.l.bf16 %v4380_v20 }
 0x47d   :  { %3993 = vmatprep.mubr.msk.bf16.mxu0 %vm4736_vm0, %v4735_v3 }
 0x47e   :  { %v5004_v25 = vpack.c.bf16 %v4382_v21, %v4382_v21  ;;  %v5017_v31 = vpack.c.bf16 %v4381_v29, %v4381_v29 }
 0x47f   :  { %v405_v27 = vpop.permute.xlu1 %404 }
 0x480   :  { %v411_v28 = vsel %vm406_vm5, %v405_v27, 0  ;;  %601 = vrot.lane.b32.xlu1 %v5002_v24, %s4738_s6  ;;  %748 = vrot.lane.b32.xlu0 %v5004_v25, %s4738_s6 }
 0x481   :  { %3974 = vmatpush3.bf16.xpose.msra.mxu1 %v411_v28 }
 0x482   :  { %3985 = vmatprep.subr.bf16.mxu1 %v4735_v3 }
 0x484   :  { %650 = vrot.lane.b32.xlu1 %v5011_v30, %s4738_s6  ;;  %910 = vrot.lane.b32.xlu0 %v395_v8, %s4741_s28 }
 0x488   :  { %3976 = vmatmul.mubr.msk.bf16.vlgmr.msra.gmra.mrb[4].mxu1 %vm406_vm5, %v395_v8  ;;  %699 = vrot.lane.b32.xlu1 %v5017_v31, %s4738_s6 }
 0x489   :  { %3987 = vmatprep.mubr.msk.bf16.mxu1 %vm4736_vm0, %v4735_v3 }
 0x48c   :  { %959 = vrot.lane.b32.xlu1 %v396_v7, %s4741_s28 }
 0x4ea   :  { %v504_v32 = vpop.permute.xlu1 %503 }
 0x4eb   :  { %v509_v33 = vsel %vm406_vm5, %v504_v32, 0 }
 0x4ec   :  { %3986 = vmatpush3.bf16.xpose.msra.mxu1 %v509_v33 }
 0x4ed   :  { %3997 = vmatprep.subr.bf16.mxu1 %v4735_v3 }
 0x4ee   :  { %v553_v34 = vpop.permute.xlu1 %552 }
 0x4ef   :  { %v558_v35 = vsel %vm406_vm5, %v553_v34, 0 }
 0x4f0   :  { %3992 = vmatpush3.bf16.xpose.msra.mxu0 %v558_v35 }
 0x4f1   :  { %4003 = vmatprep.subr.bf16.mxu0 %v4735_v3 }
 0x4f2   :  { %v602_v36 = vpop.permute.xlu1 %601  ;;  %v749_v40 = vpop.permute.xlu0 %748 }
 0x4f3   :  { %v607_v37 = vsel %vm406_vm5, %v602_v36, 0  ;;  %3988 = vmatmul.mubr.msk.bf16.vlgmr.msra.gmra.mrb[8].mxu1 %vm406_vm5, %v4990_v14  ;;  %v754_v43 = vsel %vm406_vm5, %v749_v40, 0 }
 0x4f4   :  { %3998 = vmatpush3.bf16.xpose.msra.mxu1 %v607_v37  ;;  %3999 = vmatprep.mubr.msk.bf16.mxu1 %vm4736_vm0, %v4735_v3 }
 0x4f5   :  { %4009 = vmatprep.subr.bf16.mxu1 %v4735_v3 }
 0x4f6   :  { %v651_v38 = vpop.permute.xlu1 %650  ;;  %v911_v44 = vpop.permute.xlu0 %910 }
 0x4f7   :  { %v656_v39 = vsel %vm406_vm5, %v651_v38, 0  ;;  %3994 = vmatmul.mubr.msk.bf16.vlgmr.msra.gmra.mrb[8].mxu0 %vm406_vm5, %v4995_v19  ;;  %v917_v45 = vsel %vm915_vm6, %v911_v44, 0 }
 0x4f8   :  { %4004 = vmatpush3.bf16.xpose.msra.mxu0 %v656_v39  ;;  %4005 = vmatprep.mubr.msk.bf16.mxu0 %vm4736_vm0, %v4735_v3 }
 0x4f9   :  { %4015 = vmatprep.subr.bf16.mxu0 %v4735_v3 }
 0x4fa   :  { %v700_v41 = vpop.permute.xlu1 %699 }
 0x4fb   :  { %v705_v42 = vsel %vm406_vm5, %v700_v41, 0  ;;  %4000 = vmatmul.mubr.msk.bf16.vlgmr.msra.gmra.mrb[12].mxu1 %vm406_vm5, %v5002_v24 }
 0x4fc   :  { %4010 = vmatpush3.bf16.xpose.msra.mxu1 %v705_v42  ;;  %4011 = vmatprep.mubr.msk.bf16.mxu1 %vm4736_vm0, %v4735_v3 }
 0x4fd   :  { %4021 = vmatprep.subr.bf16.mxu1 %v4735_v3 }
 0x4fe   :  { %v960_v46 = vpop.permute.xlu1 %959 }
 0x4ff   :  { %4006 = vmatmul.mubr.msk.bf16.vlgmr.msra.gmra.mrb[12].mxu0 %vm406_vm5, %v5011_v30  ;;  %v965_v47 = vsel %vm915_vm6, %v960_v46, 0 }
 0x500   :  { %4016 = vmatpush3.bf16.xpose.msra.mxu0 %v754_v43  ;;  %4017 = vmatprep.mubr.msk.bf16.mxu0 %vm4736_vm0, %v4735_v3 }
 0x501   :  { %4027 = vmatprep.subr.bf16.mxu0 %v4735_v3 }
 0x503   :  { %4012 = vmatmul.mubr.msk.bf16.vlgmr.msra.gmra.mrb[16].mxu1 %vm406_vm5, %v5017_v31 }
 0x504   :  { %4022 = vmatpush3.bf16.msra.mxu1 %v917_v45  ;;  %4023 = vmatprep.mubr.msk.bf16.mxu1 %vm4736_vm0, %v4735_v3 }
 0x505   :  { %4033 = vmatprep.subr.bf16.mxu1 %v4735_v3 }
 0x507   :  { %4018 = vmatmul.mubr.msk.bf16.vlgmr.msra.gmra.mrb[16].mxu0 %vm406_vm5, %v5004_v25 }
 0x508   :  { %4028 = vmatpush3.bf16.msra.mxu0 %v965_v47  ;;  %4029 = vmatprep.mubr.msk.bf16.mxu0 %vm4736_vm0, %v4735_v3 }
 0x509   :  { %4039 = vmatprep.subr.bf16.mxu0 %v4735_v3 }
 0x54f   :  { %v496_v50 = vpop.f32.mrb[4].mxu0 }
 0x550   :  { %v797_v51 = vmul.f32 0.35355338, %v496_v50  ;;  %v3983_v52 = vpop.f32.mrb[5].mxu0 }
 0x551   :  { %v499_v53 = vpop.f32.mrb[6].mxu0 }
 0x552   :  { %v3984_v54 = vpop.f32.mrb[7].mxu0  ;;  %v5076_v55 = vsel %vm5070_vm7, %v797_v51, -1e+30 }
 0x553   :  { %v817_v56 = vsel %vm406_vm5, %v5076_v55, -inf }
 0x554   :  { %818 = vmax.xlane.f32.xlu0 %v817_v56 }
 0x55b   :  { %v447_v16 = vpop.f32.mrb[4].mxu1 }
 0x55c   :  { %v796_v57 = vmul.f32 0.35355338, %v447_v16  ;;  %v3977_v58 = vpop.f32.mrb[5].mxu1 }
 0x55d   :  { %v450_v59 = vpop.f32.mrb[6].mxu1 }
 0x55e   :  { %v3978_v60 = vpop.f32.mrb[7].mxu1  ;;  %v806_v61 = vsel %vm5070_vm7, %v796_v57, -1e+30 }
 0x55f   :  { %v814_v62 = vsel %vm406_vm5, %v806_v61, -inf }
 0x560   :  { %815 = vmax.xlane.f32.xlu1 %v814_v62 }
 0x5c6   :  { %v545_v63 = vpop.f32.mrb[8].mxu1 }
 0x5c7   :  { %v798_v0 = vmul.f32 0.35355338, %v545_v63  ;;  %v3989_v1 = vpop.f32.mrb[9].mxu1 }
 0x5c8   :  { %v548_v2 = vpop.f32.mrb[10].mxu1 }
 0x5c9   :  { %v3990_v4 = vpop.f32.mrb[11].mxu1  ;;  %v808_v5 = vsel %vm5070_vm7, %v798_v0, -1e+30 }
 0x5ca   :  { %v594_v6 = vpop.f32.mrb[8].mxu0  ;;  %v820_v7 = vsel %vm406_vm5, %v808_v5, -inf }
 0x5cb   :  { %v799_v8 = vmul.f32 0.35355338, %v594_v6  ;;  %821 = vmax.xlane.f32.xlu0 %v820_v7  ;;  %v3995_v9 = vpop.f32.mrb[9].mxu0 }
 0x5cc   :  { %v597_v10 = vpop.f32.mrb[10].mxu0 }
 0x5cd   :  { %v3996_v11 = vpop.f32.mrb[11].mxu0  ;;  %v809_v12 = vsel %vm5070_vm7, %v799_v8, -1e+30 }
 0x5ce   :  { %v643_v13 = vpop.f32.mrb[12].mxu1  ;;  %v823_v15 = vsel %vm406_vm5, %v809_v12, -inf }
 0x5cf   :  { %v800_v18 = vmul.f32 0.35355338, %v643_v13  ;;  %v4001_v20 = vpop.f32.mrb[13].mxu1  ;;  %824 = vmax.xlane.f32.xlu1 %v823_v15 }
 0x5d0   :  { %v646_v21 = vpop.f32.mrb[14].mxu1 }
 0x5d1   :  { %v4002_v22 = vpop.f32.mrb[15].mxu1  ;;  %v5091_v27 = vsel %vm5070_vm7, %v800_v18, -1e+30 }
 0x5d2   :  { %v692_v28 = vpop.f32.mrb[12].mxu0  ;;  %v826_v29 = vsel %vm406_vm5, %v5091_v27, -inf }
 0x5d3   :  { %v801_v32 = vmul.f32 0.35355338, %v692_v28  ;;  %827 = vmax.xlane.f32.xlu0 %v826_v29  ;;  %v4007_v33 = vpop.f32.mrb[13].mxu0 }
 0x5d4   :  { %v695_v34 = vpop.f32.mrb[14].mxu0 }
 0x5d5   :  { %v4008_v35 = vpop.f32.mrb[15].mxu0  ;;  %v811_v36 = vsel %vm5070_vm7, %v801_v32, -1e+30 }
 0x5d6   :  { %v741_v37 = vpop.f32.mrb[16].mxu1  ;;  %v829_v38 = vsel %vm406_vm5, %v811_v36, -inf }
 0x5d7   :  { %v802_v39 = vmul.f32 0.35355338, %v741_v37  ;;  %v4013_v40 = vpop.f32.mrb[17].mxu1  ;;  %830 = vmax.xlane.f32.xlu1 %v829_v38 }
 0x5d8   :  { %v744_v41 = vpop.f32.mrb[18].mxu1 }
 0x5d9   :  { %v4014_v42 = vpop.f32.mrb[19].mxu1  ;;  %v5100_v43 = vsel %vm5070_vm7, %v802_v39, -1e+30 }
 0x5da   :  { %v790_v44 = vpop.f32.mrb[16].mxu0  ;;  %v832_v45 = vsel %vm406_vm5, %v5100_v43, -inf }
 0x5db   :  { %v803_v46 = vmul.f32 0.35355338, %v790_v44  ;;  %833 = vmax.xlane.f32.xlu0 %v832_v45  ;;  %v4019_v47 = vpop.f32.mrb[17].mxu0 }
 0x5dc   :  { %v793_v50 = vpop.f32.mrb[18].mxu0 }
 0x5dd   :  { %v4020_v51 = vpop.f32.mrb[19].mxu0  ;;  %v813_v52 = vsel %vm5070_vm7, %v803_v46, -1e+30 }
 0x5de   :  { %v835_v53 = vsel %vm406_vm5, %v813_v52, -inf }
 0x5df   :  { %836 = vmax.xlane.f32.xlu1 %v835_v53 }
 0x5e1   :  { %v819_v16 = vpop.xlane.xlu0 %818 }
 0x5e2   :  { %v839_v57 = vsub.f32 %v5076_v55, %v819_v16 }
 0x5e4   :  { %v848_v59 = vmul.f32 1.442695, %v839_v57 }
 0x5ed   :  { %v816_v54 = vpop.xlane.xlu1 %815 }
 0x5ee   :  { %v838_v56 = vsub.f32 %v806_v61, %v816_v54 }
 0x5f0   :  { %1007 = vrot.lane.b32.xlu1 %v4990_v14, %s4741_s28  ;;  %v846_v58 = vmul.f32 1.442695, %v838_v56 }
 0x5f1   :  { %1055 = vrot.lane.b32.xlu0 %v4995_v19, %s4741_s28 }
 0x5f2   :  { %4433 = vpow2.f32 %v846_v58 }
 0x5f3   :  { %4435 = vpow2.f32 %v848_v59 }
 0x5fc   :  { %v4434_v60 = vpop.eup %4433 }
 0x5fd   :  { %v862_v62 = vsel %vm406_vm5, %v4434_v60, 0.0  ;;  %v4436_v63 = vpop.eup %4435 }
 0x5fe   :  { %v865_v0 = vsel %vm406_vm5, %v4436_v63, 0.0 }
 0x610   :  { %863 = vadd.xlane.f32.xlu0 %v862_v62 }
 0x614   :  { %866 = vadd.xlane.f32.xlu1 %v865_v0 }
 0x625   :  { %1103 = vrot.lane.b32.xlu1 %v5002_v24, %s4741_s28 }
 0x658   :  { %v822_v14 = vpop.xlane.xlu0 %821 }
 0x659   :  { %v840_v19 = vsub.f32 %v808_v5, %v822_v14 }
 0x65b   :  { %v850_v61 = vmul.f32 1.442695, %v840_v19 }
 0x65c   :  { %v825_v1 = vpop.xlane.xlu1 %824 }
 0x65d   :  { %4437 = vpow2.f32 %v850_v61  ;;  %v841_v55 = vsub.f32 %v809_v12, %v825_v1 }
 0x65f   :  { %v852_v2 = vmul.f32 1.442695, %v841_v55 }
 0x660   :  { %v828_v21 = vpop.xlane.xlu0 %827 }
 0x661   :  { %4439 = vpow2.f32 %v852_v2  ;;  %v842_v22 = vsub.f32 %v5091_v27, %v828_v21 }
 0x663   :  { %v854_v29 = vmul.f32 1.442695, %v842_v22 }
 0x664   :  { %v831_v4 = vpop.xlane.xlu1 %830 }
 0x665   :  { %v843_v6 = vsub.f32 %v811_v36, %v831_v4 }
 0x667   :  { %v5116_v7 = vpop.eup %4437  ;;  %v856_v8 = vmul.f32 1.442695, %v843_v6 }
 0x668   :  { %v868_v9 = vsel %vm406_vm5, %v5116_v7, 0.0  ;;  %v834_v28 = vpop.xlane.xlu0 %833 }
 0x669   :  { %4441 = vpow2.f32 %v856_v8  ;;  %869 = vadd.xlane.f32.xlu0 %v868_v9  ;;  %v844_v32 = vsub.f32 %v5100_v43, %v834_v28 }
 0x66b   :  { %v5120_v10 = vpop.eup %4439  ;;  %v858_v33 = vmul.f32 1.442695, %v844_v32 }
 0x66c   :  { %v837_v24 = vpop.xlane.xlu1 %836  ;;  %v871_v5 = vsel %vm406_vm5, %v5120_v10, 0.0  ;;  %v1056_v34 = vpop.permute.xlu0 %1055 }
 0x66d   :  { %v845_v11 = vsub.f32 %v813_v52, %v837_v24  ;;  %872 = vadd.xlane.f32.xlu1 %v871_v5  ;;  %v1061_v46 = vsel %vm915_vm6, %v1056_v34, 0 }
 0x66f   :  { %v860_v12 = vmul.f32 1.442695, %v845_v11 }
 0x670   :  { %v1008_v36 = vpop.permute.xlu1 %1007 }
 0x671   :  { %4443 = vpow2.f32 %v860_v12  ;;  %v1013_v43 = vsel %vm915_vm6, %v1008_v36, 0 }
 0x672   :  { %4445 = vpow2.f32 %v854_v29 }
 0x673   :  { %v5124_v13 = vpop.eup %4441  ;;  %4447 = vpow2.f32 %v858_v33 }
 0x674   :  { %v877_v15 = vsel %vm406_vm5, %v5124_v13, 0.0 }
 0x675   :  { %878 = vadd.xlane.f32.xlu1 %v877_v15 }
 0x67b   :  { %v5128_v18 = vpop.eup %4443 }
 0x67c   :  { %v883_v20 = vsel %vm406_vm5, %v5128_v18, 0.0  ;;  %v5138_v35 = vpop.eup %4445 }
 0x67d   :  { %884 = vadd.xlane.f32.xlu1 %v883_v20  ;;  %v5142_v38 = vpop.eup %4447 }
 0x67e   :  { %v880_v39 = vsel %vm406_vm5, %v5142_v38, 0.0 }
 0x67f   :  { %1151 = vrot.lane.b32.xlu0 %v5011_v30, %s4741_s28  ;;  %v874_v30 = vsel %vm406_vm5, %v5138_v35, 0.0 }
 0x68e   :  { %1199 = vrot.lane.b32.xlu1 %v5017_v31, %s4741_s28 }
 0x69d   :  { %v864_v37 = vpop.xlane.xlu0 %863 }
 0x69e   :  { %4449 = vrcp.f32 %v864_v37  ;;  %875 = vadd.xlane.f32.xlu0 %v874_v30 }
 0x6a1   :  { %v867_v27 = vpop.xlane.xlu1 %866 }
 0x6a2   :  { %4451 = vrcp.f32 %v867_v27  ;;  %881 = vadd.xlane.f32.xlu0 %v880_v39 }
 0x6a5   :  { %v1104_v47 = vpop.permute.xlu1 %1103 }
 0x6a6   :  { %v1109_v57 = vsel %vm915_vm6, %v1104_v47, 0  ;;  %v1330_v47 = vld [vmem:[%s4794_s8 + $0x10] sm:$0xff] }
 0x6a8   :  { %v4450_v31 = vpop.eup %4449 }
 0x6a9   :  { %v894_v40 = vmul.f32 %v4450_v31, %v4434_v60 }
 0x6ab   :  { %v902_v41 = vpack.c.bf16 %v894_v40, %v894_v40 }
 0x6ac   :  { %v4452_v42 = vpop.eup %4451 }
 0x6ad   :  { %v895_v44 = vmul.f32 %v4452_v42, %v4436_v63  ;;  %4024 = vmatmul.mubr.msk.bf16.vlgmr.msra.gmra.mrb[20].mxu1 %vm406_vm5, %v902_v41  ;;  %v1328_v42 = vld [vmem:[%s4794_s8] sm:$0xff] }
 0x6ae   :  { %4034 = vmatpush3.bf16.msra.mxu1 %v1013_v43  ;;  %4035 = vmatprep.mubr.msk.bf16.mxu1 %vm4736_vm0, %v4735_v3  ;;  %v1329_v43 = vld [vmem:[%s4794_s8 + $0x8] sm:$0xff] }
 0x6af   :  { %v903_v45 = vpack.c.bf16 %v895_v44, %v895_v44  ;;  %4045 = vmatprep.subr.bf16.mxu1 %v4735_v3  ;;  %v1332_v44 = vpack.c.bf16 %v1329_v43, %v1328_v42  ;;  %v1436_v42 = vld [vmem:[%s4814_s30 + $0x10] sm:$0xff]  ;;  %v1437_v43 = vld [vmem:[%s4814_s30 + $0x18] sm:$0xff] }
 0x6b1   :  { %4030 = vmatmul.mubr.msk.bf16.vlgmr.msra.gmra.mrb[20].mxu0 %vm406_vm5, %v903_v45 }
 0x6b2   :  { %4040 = vmatpush3.bf16.msra.mxu0 %v1061_v46  ;;  %4041 = vmatprep.mubr.msk.bf16.mxu0 %vm4736_vm0, %v4735_v3 }
 0x6b3   :  { %4051 = vmatprep.subr.bf16.mxu0 %v4735_v3 }
 0x6b8   :  { %1247 = vrot.lane.b32.xlu0 %v5004_v25, %s4741_s28 }
 0x6f6   :  { %v870_v50 = vpop.xlane.xlu0 %869 }
 0x6f7   :  { %4453 = vrcp.f32 %v870_v50  ;;  %v1331_v50 = vld [vmem:[%s4794_s8 + $0x18] sm:$0xff] }
 0x6fa   :  { %v873_v51 = vpop.xlane.xlu1 %872  ;;  %v1152_v59 = vpop.permute.xlu0 %1151 }
 0x6fb   :  { %4455 = vrcp.f32 %v873_v51  ;;  %v1157_v60 = vsel %vm915_vm6, %v1152_v59, 0 }
 0x701   :  { %v4454_v52 = vpop.eup %4453 }
 0x702   :  { %v896_v53 = vmul.f32 %v4454_v52, %v5116_v7  ;;  %v879_v54 = vpop.xlane.xlu1 %878  ;;  %v1333_v52 = vpack.c.bf16 %v1331_v50, %v1330_v47 }
 0x703   :  { %4457 = vrcp.f32 %v879_v54 }
 0x704   :  { %v904_v56 = vpack.c.bf16 %v896_v53, %v896_v53 }
 0x705   :  { %v4456_v16 = vpop.eup %4455 }
 0x706   :  { %v897_v58 = vmul.f32 %v4456_v16, %v5120_v10  ;;  %4036 = vmatmul.mubr.msk.bf16.vlgmr.msra.gmra.mrb[24].mxu1 %vm406_vm5, %v904_v56 }
 0x707   :  { %4046 = vmatpush3.bf16.msra.mxu1 %v1109_v57  ;;  %4047 = vmatprep.mubr.msk.bf16.mxu1 %vm4736_vm0, %v4735_v3 }
 0x708   :  { %v905_v25 = vpack.c.bf16 %v897_v58, %v897_v58  ;;  %4057 = vmatprep.subr.bf16.mxu1 %v4735_v3 }
 0x70a   :  { %4042 = vmatmul.mubr.msk.bf16.vlgmr.msra.gmra.mrb[24].mxu0 %vm406_vm5, %v905_v25  ;;  %v885_v14 = vpop.xlane.xlu1 %884 }
 0x70b   :  { %4052 = vmatpush3.bf16.msra.mxu0 %v1157_v60  ;;  %4053 = vmatprep.mubr.msk.bf16.mxu0 %vm4736_vm0, %v4735_v3  ;;  %4459 = vrcp.f32 %v885_v14 }
 0x70c   :  { %4063 = vmatprep.subr.bf16.mxu0 %v4735_v3 }
 0x70d   :  { %v4458_v62 = vpop.eup %4457 }
 0x70e   :  { %v899_v63 = vmul.f32 %v4458_v62, %v5124_v13  ;;  %v1200_v9 = vpop.permute.xlu1 %1199 }
 0x70f   :  { %v1205_v5 = vsel %vm915_vm6, %v1200_v9, 0 }
 0x710   :  { %v907_v0 = vpack.c.bf16 %v899_v63, %v899_v63 }
 0x712   :  { %4054 = vmatmul.mubr.msk.bf16.vlgmr.msra.gmra.mrb[28].mxu0 %vm406_vm5, %v907_v0 }
 0x713   :  { %4065 = vmatprep.mubr.msk.bf16.mxu0 %vm4736_vm0, %v4735_v3 }
 0x715   :  { %v4460_v61 = vpop.eup %4459 }
 0x716   :  { %v901_v55 = vmul.f32 %v4460_v61, %v5128_v18 }
 0x718   :  { %v909_v7 = vpack.c.bf16 %v901_v55, %v901_v55 }
 0x72b   :  { %v876_v19 = vpop.xlane.xlu0 %875 }
 0x72c   :  { %4461 = vrcp.f32 %v876_v19 }
 0x72f   :  { %v882_v1 = vpop.xlane.xlu0 %881 }
 0x730   :  { %4463 = vrcp.f32 %v882_v1 }
 0x733   :  { %v1248_v2 = vpop.permute.xlu0 %1247 }
 0x734   :  { %v1253_v4 = vsel %vm915_vm6, %v1248_v2, 0 }
 0x735   :  { %4064 = vmatpush3.bf16.msra.mxu0 %v1253_v4 }
 0x736   :  { %v4462_v6 = vpop.eup %4461  ;;  %4077 = vmatprep.subr.bf16.mxu0 %v4735_v3 }
 0x737   :  { %v898_v8 = vmul.f32 %v4462_v6, %v5138_v35 }
 0x738   :  { %4066 = vmatmul.mubr.msk.bf16.vlgmr.msra.gmra.mrb[32].mxu0 %vm406_vm5, %v909_v7 }
 0x739   :  { %v906_v10 = vpack.c.bf16 %v898_v8, %v898_v8  ;;  %4081 = vmatprep.mubr.msk.bf16.mxu0 %vm4736_vm0, %v4735_v3 }
 0x73a   :  { %v4464_v24 = vpop.eup %4463 }
 0x73b   :  { %4048 = vmatmul.mubr.msk.bf16.vlgmr.msra.gmra.mrb[28].mxu1 %vm406_vm5, %v906_v10  ;;  %v900_v11 = vmul.f32 %v4464_v24, %v5142_v38 }
 0x73c   :  { %4058 = vmatpush3.bf16.msra.mxu1 %v1205_v5  ;;  %4059 = vmatprep.mubr.msk.bf16.mxu1 %vm4736_vm0, %v4735_v3 }
 0x73d   :  { %4069 = vmatprep.subr.bf16.mxu1 %v4735_v3  ;;  %v908_v12 = vpack.c.bf16 %v900_v11, %v900_v11 }
 0x743   :  { %4060 = vmatmul.mubr.msk.bf16.vlgmr.msra.gmra.mrb[32].mxu1 %vm406_vm5, %v908_v12 }
 0x744   :  { %4073 = vmatprep.mubr.msk.bf16.mxu1 %vm4736_vm0, %v4735_v3  ;;  %4070 = vmatpush3.bf16.msra.mxu1 %v1332_v44  ;;  %v1439_v44 = vpack.c.bf16 %v1437_v43, %v1436_v42  ;;  %v3742_v43 = vld [vmem:[%s5726_s10] ss:$0 sm:$0xff] }
 0x745   :  { %4071 = vmatprep.subr.bf16.mxu1 %v4735_v3 }
 0x748   :  { %4072 = vmatpush3.bf16.msra.mxu1 %v1333_v52 }
 0x749   :  { %4085 = vmatprep.subr.bf16.mxu1 %v4735_v3 }
 0x780   :  { %v953_v13 = vpop.f32.mrb[20].mxu1 }
 0x781   :  { %v4025_v15 = vpop.f32.mrb[21].mxu1 }
 0x782   :  { %v956_v18 = vpop.f32.mrb[22].mxu1  ;;  %v3736_v15 = vld [vmem:[%s4799_s14] ss:$0 sm:$0xff] }
 0x783   :  { %v4026_v20 = vpop.f32.mrb[23].mxu1 }
 0x784   :  { %v1001_v21 = vpop.f32.mrb[20].mxu0 }
 0x785   :  { %v4031_v22 = vpop.f32.mrb[21].mxu0 }
 0x786   :  { %v1004_v28 = vpop.f32.mrb[22].mxu0 }
 0x787   :  { %v4032_v29 = vpop.f32.mrb[23].mxu0 }
 0x7d9   :  { %v1049_v32 = vpop.f32.mrb[24].mxu1 }
 0x7da   :  { %v4037_v33 = vpop.f32.mrb[25].mxu1 }
 0x7db   :  { %v1052_v34 = vpop.f32.mrb[26].mxu1 }
 0x7dc   :  { %v4038_v35 = vpop.f32.mrb[27].mxu1 }
 0x7dd   :  { %v1097_v36 = vpop.f32.mrb[24].mxu0 }
 0x7de   :  { %v4383_v37 = vpack.i.bf16 %v1097_v36, %v1049_v32  ;;  %v4043_v30 = vpop.f32.mrb[25].mxu0 }
 0x7df   :  { %v1100_v38 = vpop.f32.mrb[26].mxu0 }
 0x7e0   :  { %4384 = vrot.lane.b32.xlu1 %v4383_v37, %s4729_s26  ;;  %v4044_v27 = vpop.f32.mrb[27].mxu0 }
 0x7e5   :  { %v1193_v39 = vpop.f32.mrb[28].mxu0 }
 0x7e6   :  { %v4055_v31 = vpop.f32.mrb[29].mxu0 }
 0x7e7   :  { %v1196_v40 = vpop.f32.mrb[30].mxu0  ;;  %v1434_v31 = vld [vmem:[%s4814_s30] sm:$0xff] }
 0x7e8   :  { %v4056_v41 = vpop.f32.mrb[31].mxu0  ;;  %v1435_v40 = vld [vmem:[%s4814_s30 + $0x8] sm:$0xff] }
 0x7e9   :  { %v1438_v41 = vpack.c.bf16 %v1435_v40, %v1434_v31 }
 0x7eb   :  { %4078 = vmatpush3.bf16.msra.mxu0 %v1438_v41 }
 0x7ec   :  { %4079 = vmatprep.subr.bf16.mxu0 %v4735_v3 }
 0x7ef   :  { %4080 = vmatpush3.bf16.msra.mxu0 %v1439_v44 }
 0x7f0   :  { %4097 = vmatprep.subr.bf16.mxu0 %v4735_v3 }
 0x80b   :  { %v1289_v45 = vpop.f32.mrb[32].mxu0 }
 0x80c   :  { %v4067_v46 = vpop.f32.mrb[33].mxu0 }
 0x80d   :  { %v1292_v51 = vpop.f32.mrb[34].mxu0 }
 0x80e   :  { %v1145_v53 = vpop.f32.mrb[28].mxu1  ;;  %v4068_v54 = vpop.f32.mrb[35].mxu0 }
 0x80f   :  { %v4388_v56 = vpack.i.bf16 %v1193_v39, %v1145_v53  ;;  %v4049_v16 = vpop.f32.mrb[29].mxu1 }
 0x810   :  { %v1148_v57 = vpop.f32.mrb[30].mxu1 }
 0x811   :  { %v4050_v58 = vpop.f32.mrb[31].mxu1  ;;  %4389 = vrot.lane.b32.xlu0 %v4388_v56, %s4742_s1  ;;  %v3737_v56 = vld [vmem:[%s4804_s19] ss:$0 sm:$0xff] }
 0x816   :  { %v1241_v59 = vpop.f32.mrb[32].mxu1 }
 0x817   :  { %v4393_v25 = vpack.i.bf16 %v1289_v45, %v1241_v59  ;;  %v4061_v60 = vpop.f32.mrb[33].mxu1  ;;  %v3738_v59 = vld [vmem:[%s4809_s24] ss:$0 sm:$0xff] }
 0x818   :  { %v1244_v62 = vpop.f32.mrb[34].mxu1 }
 0x819   :  { %v4062_v63 = vpop.f32.mrb[35].mxu1  ;;  %4394 = vrot.lane.b32.xlu1 %v4393_v25, %s4743_s2 }
 0x852   :  { %v4385_v0 = vpop.permute.xlu1 %4384 }
 0x853   :  { %v4387_v19 = vunpack.i.h.bf16 %v4385_v0  ;;  %v4386_v61 = vunpack.i.l.bf16 %v4385_v0  ;;  %v1510_v0 = vld [vmem:[%s4824_s12] sm:$0xff] }
 0x855   :  { %v1320_v4 = vsel %vm406_vm5, %v1001_v21, %v4387_v19  ;;  %v1319_v6 = vsel %vm406_vm5, %v953_v13, %v4386_v61  ;;  %v1512_v61 = vld [vmem:[%s4824_s12 + $0x10] sm:$0xff] }
 0x883   :  { %v4390_v14 = vpop.permute.xlu0 %4389 }
 0x884   :  { %v4392_v1 = vunpack.i.h.bf16 %v4390_v14  ;;  %v4391_v55 = vunpack.i.l.bf16 %v4390_v14  ;;  %v1511_v14 = vld [vmem:[%s4824_s12 + $0x8] sm:$0xff] }
 0x885   :  { %v1518_v19 = vpack.c.bf16 %v1511_v14, %v1510_v0  ;;  %v1626_v0 = vld [vmem:[#allocation7 + $0x28] sm:$0xff] }
 0x886   :  { %v1323_v9 = vsel %vm1321_vm8, %v1320_v4, %v4392_v1  ;;  %v1322_v10 = vsel %vm1321_vm8, %v1319_v6, %v4391_v55  ;;  %v1513_v1 = vld [vmem:[%s4824_s12 + $0x18] sm:$0xff]  ;;  %v1515_v4 = vld [vmem:[%s4824_s12 + $0x28] sm:$0xff] }
 0x887   :  { %v1519_v55 = vpack.c.bf16 %v1513_v1, %v1512_v61  ;;  %v1628_v61 = vld [vmem:[#allocation7 + $0x38] sm:$0xff] }
 0x88b   :  { %v4395_v2 = vpop.permute.xlu1 %4394 }
 0x88c   :  { %v4397_v7 = vunpack.i.h.bf16 %v4395_v2  ;;  %v4396_v8 = vunpack.i.l.bf16 %v4395_v2  ;;  %v1514_v2 = vld [vmem:[%s4824_s12 + $0x20] sm:$0xff] }
 0x88d   :  { %v1520_v6 = vpack.c.bf16 %v1515_v4, %v1514_v2 }
 0x88e   :  { %v1326_v24 = vsel %vm1324_vm9, %v1323_v9, %v4397_v7  ;;  %v1325_v5 = vsel %vm1324_vm9, %v1322_v10, %v4396_v8  ;;  %v1516_v7 = vld [vmem:[%s4824_s12 + $0x30] sm:$0xff]  ;;  %v1517_v8 = vld [vmem:[%s4824_s12 + $0x38] sm:$0xff]  ;;  %v3739_v10 = vld [vmem:[%s5725_s7] ss:$0 sm:$0xff] }
 0x88f   :  { %v1327_v11 = vpack.c.bf16 %v1326_v24, %v1325_v5  ;;  %v1521_v9 = vpack.c.bf16 %v1517_v8, %v1516_v7 }
 0x891   :  { %4074 = vmatmul.mubr.msk.bf16.vlgmr.msra.gmra.mrb[36].mxu1 %vm273_vm4, %v1327_v11 }
 0x892   :  { %4093 = vmatprep.mubr.msk.bf16.mxu1 %vm4736_vm0, %v4735_v3  ;;  %4086 = vmatpush3.bf16.msra.mxu1 %v1518_v19  ;;  %v1627_v19 = vld [vmem:[#allocation7 + $0x30] sm:$0xff] }
 0x893   :  { %4087 = vmatprep.subr.bf16.mxu1 %v4735_v3  ;;  %v1630_v1 = vpack.c.bf16 %v1628_v61, %v1627_v19 }
 0x896   :  { %4088 = vmatpush3.bf16.msra.mxu1 %v1519_v55 }
 0x897   :  { %4089 = vmatprep.subr.bf16.mxu1 %v4735_v3 }
 0x89a   :  { %4090 = vmatpush3.bf16.msra.mxu1 %v1520_v6 }
 0x89b   :  { %4091 = vmatprep.subr.bf16.mxu1 %v4735_v3 }
 0x89e   :  { %4092 = vmatpush3.bf16.msra.mxu1 %v1521_v9 }
 0x89f   :  { %4111 = vmatprep.subr.bf16.mxu1 %v4735_v3 }
 0x964   :  { %v1371_v12 = vpop.f32.mrb[36].mxu1 }
 0x965   :  { %v1378_v13 = vadd.f32 %v1371_v12, %v4964_v23  ;;  %v4075_v18 = vpop.f32.mrb[37].mxu1 }
 0x966   :  { %v1374_v20 = vpop.f32.mrb[38].mxu1 }
 0x967   :  { %v5210_v21 = vadd.f32 %v3736_v15, %v1378_v13  ;;  %v1379_v22 = vadd.f32 %v1374_v20, %v4968_v26  ;;  %v4076_v28 = vpop.f32.mrb[39].mxu1 }
 0x969   :  { %v5213_v29 = vadd.f32 %v3736_v15, %v1379_v22  ;;  %v1391_v32 = vsel %vm273_vm4, %v5210_v21, 0.0 }
 0x96a   :  { %1392 = vadd.xlane.f32.xlu0 %v1391_v32 }
 0x96b   :  { %v1394_v33 = vsel %vm273_vm4, %v5213_v29, 0.0 }
 0x96c   :  { %1395 = vadd.xlane.f32.xlu1 %v1394_v33 }
 0x9f7   :  { %v1393_v23 = vpop.xlane.xlu0 %1392 }
 0x9f8   :  { %v1397_v34 = vmul.f32 0.03125, %v1393_v23 }
 0x9f9   :  { %v1396_v35 = vpop.xlane.xlu1 %1395 }
 0x9fa   :  { %v1399_v26 = vsub.f32 %v5210_v21, %v1397_v34  ;;  %v1398_v36 = vmul.f32 0.03125, %v1396_v35 }
 0x9fc   :  { %v1400_v37 = vsub.f32 %v5213_v29, %v1398_v36  ;;  %v1401_v30 = vmul.f32 %v1399_v26, %v1399_v26 }
 0x9fe   :  { %v1403_v38 = vsel %vm273_vm4, %v1401_v30, 0.0  ;;  %v1402_v27 = vmul.f32 %v1400_v37, %v1400_v37 }
 0x9ff   :  { %1404 = vadd.xlane.f32.xlu0 %v1403_v38 }
 0xa00   :  { %v1406_v39 = vsel %vm273_vm4, %v1402_v27, 0.0 }
 0xa03   :  { %1407 = vadd.xlane.f32.xlu0 %v1406_v39 }
 0xa8c   :  { %v1405_v45 = vpop.xlane.xlu0 %1404 }
 0xa8d   :  { %v1409_v46 = vmul.f32 0.03125, %v1405_v45 }
 0xa8f   :  { %v1411_v47 = vadd.f32 1e-05, %v1409_v46 }
 0xa90   :  { %v1408_v50 = vpop.xlane.xlu0 %1407 }
 0xa91   :  { %4465 = vrsqrt.f32 %v1411_v47  ;;  %v1410_v51 = vmul.f32 0.03125, %v1408_v50 }
 0xa93   :  { %v1412_v52 = vadd.f32 1e-05, %v1410_v51 }
 0xa95   :  { %4467 = vrsqrt.f32 %v1412_v52 }
 0xa9b   :  { %v4466_v53 = vpop.eup %4465 }
 0xa9c   :  { %v1415_v54 = vmul.f32 %v4466_v53, %v1399_v26 }
 0xa9e   :  { %v1423_v57 = vmul.f32 %v3737_v56, %v1415_v54 }
 0xa9f   :  { %v4468_v16 = vpop.eup %4467 }
 0xaa0   :  { %v1416_v58 = vmul.f32 %v4468_v16, %v1400_v37  ;;  %v1431_v60 = vadd.f32 %v3738_v59, %v1423_v57 }
 0xaa2   :  { %v1424_v25 = vmul.f32 %v3737_v56, %v1416_v58 }
 0xaa4   :  { %v1432_v62 = vadd.f32 %v3738_v59, %v1424_v25 }
 0xaa6   :  { %v1433_v63 = vpack.c.bf16 %v1432_v62, %v1431_v60 }
 0xaa8   :  { %4082 = vmatmul.mubr.msk.bf16.vlgmr.msra.gmra.mrb[36].mxu0 %vm273_vm4, %v1433_v63  ;;  %v1625_v63 = vld [vmem:[#allocation7 + $0x20] sm:$0xff] }
 0xaa9   :  { %4101 = vmatprep.mubr.msk.bf16.mxu0 %vm4736_vm0, %v4735_v3  ;;  %v1629_v14 = vpack.c.bf16 %v1626_v0, %v1625_v63 }
 0xaab   :  { %4098 = vmatpush3.bf16.msra.mxu0 %v1629_v14 }
 0xaac   :  { %4099 = vmatprep.subr.bf16.mxu0 %v4735_v3 }
 0xaaf   :  { %4100 = vmatpush3.bf16.msra.mxu0 %v1630_v1 }
 0xab0   :  { %4105 = vmatprep.subr.bf16.mxu0 %v4735_v3 }
 0xb7b   :  { %v1484_v24 = vpop.f32.mrb[36].mxu0 }
 0xb7c   :  { %v1485_v5 = vadd.f32 %v3739_v10, %v1484_v24  ;;  %v4083_v11 = vpop.f32.mrb[37].mxu0 }
 0xb7d   :  { %v1487_v12 = vpop.f32.mrb[38].mxu0 }
 0xb7e   :  { %v1491_v15 = vmul.f32 %v1485_v5, %v1485_v5  ;;  %v1488_v13 = vadd.f32 %v3739_v10, %v1487_v12  ;;  %v4084_v18 = vpop.f32.mrb[39].mxu0  ;;  %v3745_v10 = vld [vmem:[%s4774_s21 + $0x1] ss:$0 sm:$0xff]  ;;  %s5727_s21 = sld [smem:[#allocation28_spill]] }
 0xb80   :  { %v1493_v20 = vmul.f32 %v1491_v15, %v1485_v5  ;;  %v1492_v22 = vmul.f32 %v1488_v13, %v1488_v13  ;;  %v3746_v15 = vld [vmem:[%s4779_s25 + $0x1] ss:$0 sm:$0xff]  ;;  %s5728_s25 = sld [smem:[#allocation24_spill]] }
 0xb82   :  { %v1495_v28 = vmul.f32 0.044715, %v1493_v20  ;;  %v1494_v32 = vmul.f32 %v1492_v22, %v1488_v13 }
 0xb84   :  { %v1497_v33 = vadd.f32 %v1495_v28, %v1485_v5  ;;  %v1496_v23 = vmul.f32 0.044715, %v1494_v32  ;;  %v3748_v28 = vld [vmem:[%s4789_s3 + $0x1] ss:$0 sm:$0xff]  ;;  %s2693_s3 = sld [smem:[#allocation2]] }
 0xb86   :  { %v1499_v34 = vmul.f32 0.7978846, %v1497_v33  ;;  %v1498_v35 = vadd.f32 %v1496_v23, %v1488_v13 }
 0xb88   :  { %4469 = vtanh.f32 %v1499_v34  ;;  %v1500_v26 = vmul.f32 0.7978846, %v1498_v35 }
 0xb8a   :  { %4471 = vtanh.f32 %v1500_v26 }
 0xb92   :  { %v4470_v36 = vpop.eup %4469 }
 0xb93   :  { %v1503_v37 = vadd.f32 1.0, %v4470_v36 }
 0xb94   :  { %v4472_v30 = vpop.eup %4471 }
 0xb95   :  { %v1505_v38 = vmul.f32 0.5, %v1503_v37  ;;  %v1504_v27 = vadd.f32 1.0, %v4472_v30 }
 0xb97   :  { %v1506_v39 = vmul.f32 0.5, %v1504_v27  ;;  %v1507_v31 = vmul.f32 %v1505_v38, %v1485_v5 }
 0xb99   :  { %v1508_v40 = vmul.f32 %v1506_v39, %v1488_v13 }
 0xb9b   :  { %v1509_v41 = vpack.c.bf16 %v1508_v40, %v1507_v31 }
 0xb9d   :  { %4094 = vmatmul.mubr.msk.bf16.vlgmr.msra.gmra.mrb[40].mxu1 %vm223_vm3, %v1509_v41 }
 0xb9e   :  { %4113 = vmatprep.mubr.msk.bf16.mxu1 %vm4736_vm0, %v4735_v3 }
 0xc70   :  { %v1559_v42 = vpop.f32.mrb[40].mxu1 }
 0xc71   :  { %v1566_v44 = vadd.f32 %v1559_v42, %v5210_v21  ;;  %v4095_v45 = vpop.f32.mrb[41].mxu1 }
 0xc72   :  { %v1562_v46 = vpop.f32.mrb[42].mxu1 }
 0xc73   :  { %v5252_v47 = vadd.f32 %v3742_v43, %v1566_v44  ;;  %v1567_v50 = vadd.f32 %v1562_v46, %v5213_v29  ;;  %v4096_v51 = vpop.f32.mrb[43].mxu1 }
 0xc75   :  { %v5255_v52 = vadd.f32 %v3742_v43, %v1567_v50  ;;  %v1581_v53 = vsel %vm273_vm4, %v5252_v47, 0.0 }
 0xc76   :  { %1582 = vadd.xlane.f32.xlu1 %v1581_v53 }
 0xc77   :  { %v1584_v54 = vsel %vm273_vm4, %v5255_v52, 0.0 }
 0xc78   :  { %1585 = vadd.xlane.f32.xlu0 %v1584_v54 }
 0xd03   :  { %v1583_v56 = vpop.xlane.xlu1 %1582 }
 0xd04   :  { %v1587_v16 = vmul.f32 0.03125, %v1583_v56 }
 0xd05   :  { %v1586_v21 = vpop.xlane.xlu0 %1585 }
 0xd06   :  { %v1589_v57 = vsub.f32 %v5252_v47, %v1587_v16  ;;  %v1588_v58 = vmul.f32 0.03125, %v1586_v21 }
 0xd08   :  { %v1590_v59 = vsub.f32 %v5255_v52, %v1588_v58  ;;  %v1591_v29 = vmul.f32 %v1589_v57, %v1589_v57 }
 0xd0a   :  { %v1593_v25 = vsel %vm273_vm4, %v1591_v29, 0.0  ;;  %v1592_v60 = vmul.f32 %v1590_v59, %v1590_v59 }
 0xd0b   :  { %1594 = vadd.xlane.f32.xlu1 %v1593_v25 }
 0xd0c   :  { %v1596_v62 = vsel %vm273_vm4, %v1592_v60, 0.0 }
 0xd0d   :  { %1597 = vadd.xlane.f32.xlu0 %v1596_v62 }
 0xd98   :  { %v1595_v55 = vpop.xlane.xlu1 %1594 }
 0xd99   :  { %v1599_v2 = vmul.f32 0.03125, %v1595_v55 }
 0xd9a   :  { %v1598_v4 = vpop.xlane.xlu0 %1597 }
 0xd9b   :  { %v1601_v6 = vadd.f32 1e-05, %v1599_v2  ;;  %v1600_v7 = vmul.f32 0.03125, %v1598_v4 }
 0xd9d   :  { %4473 = vrsqrt.f32 %v1601_v6  ;;  %v1602_v8 = vadd.f32 1e-05, %v1600_v7 }
 0xd9f   :  { %4475 = vrsqrt.f32 %v1602_v8 }
 0xda7   :  { %v4474_v9 = vpop.eup %4473 }
 0xda8   :  { %v1605_v24 = vmul.f32 %v4474_v9, %v1589_v57 }
 0xda9   :  { %v4476_v5 = vpop.eup %4475 }
 0xdaa   :  { %v1613_v11 = vmul.f32 %v3745_v10, %v1605_v24  ;;  %v1606_v12 = vmul.f32 %v4476_v5, %v1590_v59 }
 0xdac   :  { %v1614_v13 = vmul.f32 %v3745_v10, %v1606_v12  ;;  %v1621_v18 = vadd.f32 %v3746_v15, %v1613_v11 }
 0xdae   :  { %v1622_v20 = vadd.f32 %v3746_v15, %v1614_v13 }
 0xdb0   :  { %v1623_v22 = vpack.c.bf16 %v1622_v20, %v1621_v18 }
 0xdb2   :  { %4102 = vmatmul.mubr.msk.bf16.vlgmr.msra.gmra.mrb[40].mxu0 %vm273_vm4, %v1623_v22 }
 0xdb3   :  { %4107 = vmatprep.mubr.msk.bf16.mxu0 %vm4736_vm0, %v4735_v3 }
 0xe85   :  { %v1676_v32 = vpop.f32.mrb[40].mxu0 }
 0xe86   :  { %v4103_v33 = vpop.f32.mrb[41].mxu0  ;;  %v1677_v34 = vadd.f32 %v3748_v28, %v1676_v32 }
 0xe87   :  { %v1679_v23 = vpop.f32.mrb[42].mxu0 }
 0xe88   :  { %v1680_v35 = vadd.f32 %v3748_v28, %v1679_v23  ;;  %v4104_v26 = vpop.f32.mrb[43].mxu0  ;;  %v1703_v30 = vpack.c.bf16 %v1677_v34, %v1677_v34 }
 0xe8a   :  { %v4403_v36 = vpack.i.bf16 %v1680_v35, %v1677_v34  ;;  %v1704_v37 = vpack.c.bf16 %v1680_v35, %v1680_v35 }
 0xe8c   :  { %4404 = vrot.lane.b32.xlu0 %v4403_v36, %s4739_s20  ;;  %4399 = vrot.lane.b32.xlu1 %v4403_v36, %s4737_s5 }
 0xe90   :  { %4409 = vrot.lane.b32.xlu1 %v4403_v36, %s4740_s13  ;;  %1761 = vrot.lane.b32.xlu0 %v1704_v37, %s4738_s6 }
 0xe94   :  { %1712 = vrot.lane.b32.xlu1 %v1703_v30, %s4738_s6 }
 0xefe   :  { %v4405_v38 = vpop.permute.xlu0 %4404  ;;  %v4400_v27 = vpop.permute.xlu1 %4399 }
 0xeff   :  { %v4402_v39 = vunpack.i.h.bf16 %v4400_v27  ;;  %v4401_v31 = vunpack.i.l.bf16 %v4400_v27  ;;  %v4407_v40 = vunpack.i.h.bf16 %v4405_v38  ;;  %v4406_v41 = vunpack.i.l.bf16 %v4405_v38 }
 0xf01   :  { %v5278_v42 = vpack.c.bf16 %v4402_v39, %v4402_v39  ;;  %v5280_v43 = vpack.c.bf16 %v4401_v31, %v4401_v31  ;;  %v5287_v50 = vpack.c.bf16 %v4407_v40, %v4407_v40  ;;  %v5289_v51 = vpack.c.bf16 %v4406_v41, %v4406_v41 }
 0xf02   :  { %v4410_v44 = vpop.permute.xlu1 %4409  ;;  %v1762_v45 = vpop.permute.xlu0 %1761 }
 0xf03   :  { %v1767_v46 = vsel %vm406_vm5, %v1762_v45, 0  ;;  %1810 = vrot.lane.b32.xlu1 %v5280_v43, %s4738_s6  ;;  %1859 = vrot.lane.b32.xlu0 %v5278_v42, %s4738_s6  ;;  %v4412_v53 = vunpack.i.h.bf16 %v4410_v44  ;;  %v4411_v54 = vunpack.i.l.bf16 %v4410_v44 }
 0xf04   :  { %4112 = vmatpush3.bf16.xpose.msra.mxu1 %v1767_v46 }
 0xf05   :  { %4123 = vmatprep.subr.bf16.mxu1 %v4735_v3  ;;  %v5297_v21 = vpack.c.bf16 %v4412_v53, %v4412_v53  ;;  %v5299_v57 = vpack.c.bf16 %v4411_v54, %v4411_v54 }
 0xf06   :  { %v1713_v56 = vpop.permute.xlu1 %1712 }
 0xf07   :  { %v1718_v16 = vsel %vm406_vm5, %v1713_v56, 0  ;;  %1908 = vrot.lane.b32.xlu1 %v5289_v51, %s4738_s6  ;;  %1957 = vrot.lane.b32.xlu0 %v5287_v50, %s4738_s6 }
 0xf08   :  { %4106 = vmatpush3.bf16.xpose.msra.mxu0 %v1718_v16 }
 0xf09   :  { %4117 = vmatprep.subr.bf16.mxu0 %v4735_v3 }
 0xf0b   :  { %2006 = vrot.lane.b32.xlu1 %v5299_v57, %s4738_s6  ;;  %2055 = vrot.lane.b32.xlu0 %v5297_v21, %s4738_s6 }
 0xf0c   :  { %4114 = vmatmul.mubr.msk.bf16.vlgmr.msra.gmra.mrb[44].mxu1 %vm406_vm5, %v1704_v37 }
 0xf0d   :  { %4125 = vmatprep.mubr.msk.bf16.mxu1 %vm4736_vm0, %v4735_v3 }
 0xf0f   :  { %4108 = vmatmul.mubr.msk.bf16.vlgmr.msra.gmra.mrb[44].mxu0 %vm406_vm5, %v1703_v30  ;;  %2263 = vrot.lane.b32.xlu1 %v1704_v37, %s4741_s28 }
 0xf10   :  { %2215 = vrot.lane.b32.xlu0 %v1703_v30, %s4741_s28  ;;  %4119 = vmatprep.mubr.msk.bf16.mxu0 %vm4736_vm0, %v4735_v3 }
 0xf75   :  { %v1811_v58 = vpop.permute.xlu1 %1810  ;;  %v1860_v59 = vpop.permute.xlu0 %1859 }
 0xf76   :  { %v1816_v29 = vsel %vm406_vm5, %v1811_v58, 0  ;;  %v1865_v25 = vsel %vm406_vm5, %v1860_v59, 0 }
 0xf77   :  { %4118 = vmatpush3.bf16.xpose.msra.mxu0 %v1816_v29  ;;  %4124 = vmatpush3.bf16.xpose.msra.mxu1 %v1865_v25 }
 0xf78   :  { %4129 = vmatprep.subr.bf16.mxu0 %v4735_v3  ;;  %4135 = vmatprep.subr.bf16.mxu1 %v4735_v3 }
 0xf79   :  { %v1909_v60 = vpop.permute.xlu1 %1908  ;;  %v1958_v62 = vpop.permute.xlu0 %1957 }
 0xf7a   :  { %v1914_v63 = vsel %vm406_vm5, %v1909_v60, 0  ;;  %v1963_v0 = vsel %vm406_vm5, %v1958_v62, 0 }
 0xf7d   :  { %v2007_v14 = vpop.permute.xlu1 %2006  ;;  %v2056_v19 = vpop.permute.xlu0 %2055 }
 0xf7e   :  { %4120 = vmatmul.mubr.msk.bf16.vlgmr.msra.gmra.mrb[48].mxu0 %vm406_vm5, %v5280_v43  ;;  %4126 = vmatmul.mubr.msk.bf16.vlgmr.msra.gmra.mrb[48].mxu1 %vm406_vm5, %v5278_v42  ;;  %v2012_v61 = vsel %vm406_vm5, %v2007_v14, 0  ;;  %v2061_v1 = vsel %vm406_vm5, %v2056_v19, 0 }
 0xf7f   :  { %4130 = vmatpush3.bf16.xpose.msra.mxu0 %v1914_v63  ;;  %4136 = vmatpush3.bf16.xpose.msra.mxu1 %v1963_v0 }
 0xf80   :  { %4131 = vmatprep.mubr.msk.bf16.mxu0 %vm4736_vm0, %v4735_v3  ;;  %4137 = vmatprep.mubr.msk.bf16.mxu1 %vm4736_vm0, %v4735_v3 }
 0xf81   :  { %4141 = vmatprep.subr.bf16.mxu0 %v4735_v3  ;;  %4147 = vmatprep.subr.bf16.mxu1 %v4735_v3  ;;  %v2264_v55 = vpop.permute.xlu1 %2263 }
 0xf82   :  { %v2216_v2 = vpop.permute.xlu0 %2215  ;;  %v2269_v4 = vsel %vm915_vm6, %v2264_v55, 0 }
 0xf83   :  { %v2221_v6 = vsel %vm915_vm6, %v2216_v2, 0 }
 0xf86   :  { %4132 = vmatmul.mubr.msk.bf16.vlgmr.msra.gmra.mrb[52].mxu0 %vm406_vm5, %v5289_v51  ;;  %4138 = vmatmul.mubr.msk.bf16.vlgmr.msra.gmra.mrb[52].mxu1 %vm406_vm5, %v5287_v50 }
 0xf87   :  { %4142 = vmatpush3.bf16.xpose.msra.mxu0 %v2012_v61  ;;  %4148 = vmatpush3.bf16.xpose.msra.mxu1 %v2061_v1 }
 0xf88   :  { %4143 = vmatprep.mubr.msk.bf16.mxu0 %vm4736_vm0, %v4735_v3  ;;  %4149 = vmatprep.mubr.msk.bf16.mxu1 %vm4736_vm0, %v4735_v3 }
 0xf89   :  { %4153 = vmatprep.subr.bf16.mxu0 %v4735_v3  ;;  %4159 = vmatprep.subr.bf16.mxu1 %v4735_v3 }
 0xf8e   :  { %4144 = vmatmul.mubr.msk.bf16.vlgmr.msra.gmra.mrb[56].mxu0 %vm406_vm5, %v5299_v57  ;;  %4150 = vmatmul.mubr.msk.bf16.vlgmr.msra.gmra.mrb[56].mxu1 %vm406_vm5, %v5297_v21 }
 0xf8f   :  { %4154 = vmatpush3.bf16.msra.mxu0 %v2221_v6  ;;  %4160 = vmatpush3.bf16.msra.mxu1 %v2269_v4 }
 0xf90   :  { %4155 = vmatprep.mubr.msk.bf16.mxu0 %vm4736_vm0, %v4735_v3  ;;  %4161 = vmatprep.mubr.msk.bf16.mxu1 %vm4736_vm0, %v4735_v3 }
 0xf91   :  { %4165 = vmatprep.subr.bf16.mxu0 %v4735_v3  ;;  %4171 = vmatprep.subr.bf16.mxu1 %v4735_v3 }
 0xfdf   :  { %v1803_v7 = vpop.f32.mrb[44].mxu1 }
 0xfe0   :  { %v2104_v8 = vmul.f32 0.35355338, %v1803_v7  ;;  %v4115_v9 = vpop.f32.mrb[45].mxu1 }
 0xfe1   :  { %v1806_v10 = vpop.f32.mrb[46].mxu1 }
 0xfe2   :  { %v4116_v24 = vpop.f32.mrb[47].mxu1  ;;  %v1754_v5 = vpop.f32.mrb[44].mxu0  ;;  %v5356_v11 = vsel %vm5070_vm7, %v2104_v8, -1e+30 }
 0xfe3   :  { %v2103_v12 = vmul.f32 0.35355338, %v1754_v5  ;;  %v2122_v15 = vsel %vm406_vm5, %v5356_v11, -inf  ;;  %v4109_v13 = vpop.f32.mrb[45].mxu0 }
 0xfe4   :  { %2123 = vmax.xlane.f32.xlu0 %v2122_v15  ;;  %v1757_v18 = vpop.f32.mrb[46].mxu0 }
 0xfe5   :  { %v4110_v20 = vpop.f32.mrb[47].mxu0  ;;  %v2111_v22 = vsel %vm5070_vm7, %v2103_v12, -1e+30 }
 0xfe6   :  { %v2119_v28 = vsel %vm406_vm5, %v2111_v22, -inf }
 0xfe7   :  { %2120 = vmax.xlane.f32.xlu1 %v2119_v28 }
0x1051   :  { %v1852_v32 = vpop.f32.mrb[48].mxu0  ;;  %v1901_v33 = vpop.f32.mrb[48].mxu1 }
0x1052   :  { %v2105_v23 = vmul.f32 0.35355338, %v1852_v32  ;;  %v2106_v34 = vmul.f32 0.35355338, %v1901_v33  ;;  %v4121_v35 = vpop.f32.mrb[49].mxu0  ;;  %v4127_v26 = vpop.f32.mrb[49].mxu1 }
0x1053   :  { %v1855_v36 = vpop.f32.mrb[50].mxu0  ;;  %v1904_v37 = vpop.f32.mrb[50].mxu1 }
0x1054   :  { %v4122_v30 = vpop.f32.mrb[51].mxu0  ;;  %v4128_v38 = vpop.f32.mrb[51].mxu1  ;;  %v2114_v27 = vsel %vm5070_vm7, %v2106_v34, -1e+30  ;;  %v2113_v39 = vsel %vm5070_vm7, %v2105_v23, -1e+30 }
0x1055   :  { %v2128_v31 = vsel %vm406_vm5, %v2114_v27, -inf  ;;  %v2125_v40 = vsel %vm406_vm5, %v2113_v39, -inf }
0x1056   :  { %2129 = vmax.xlane.f32.xlu1 %v2128_v31  ;;  %2126 = vmax.xlane.f32.xlu0 %v2125_v40 }
0x1059   :  { %v1950_v41 = vpop.f32.mrb[52].mxu0  ;;  %v1999_v44 = vpop.f32.mrb[52].mxu1 }
0x105a   :  { %v2107_v45 = vmul.f32 0.35355338, %v1950_v41  ;;  %v2108_v46 = vmul.f32 0.35355338, %v1999_v44  ;;  %v4133_v53 = vpop.f32.mrb[53].mxu0  ;;  %v4139_v54 = vpop.f32.mrb[53].mxu1 }
0x105b   :  { %v1953_v56 = vpop.f32.mrb[54].mxu0  ;;  %v2002_v16 = vpop.f32.mrb[54].mxu1 }
0x105c   :  { %v4134_v58 = vpop.f32.mrb[55].mxu0  ;;  %v4140_v59 = vpop.f32.mrb[55].mxu1  ;;  %v2116_v29 = vsel %vm5070_vm7, %v2108_v46, -1e+30  ;;  %v5373_v25 = vsel %vm5070_vm7, %v2107_v45, -1e+30 }
0x105d   :  { %v2134_v60 = vsel %vm406_vm5, %v2116_v29, -inf  ;;  %v2131_v62 = vsel %vm406_vm5, %v5373_v25, -inf }
0x105e   :  { %2135 = vmax.xlane.f32.xlu1 %v2134_v60  ;;  %2132 = vmax.xlane.f32.xlu0 %v2131_v62 }
0x1061   :  { %v2048_v63 = vpop.f32.mrb[56].mxu0  ;;  %v2097_v0 = vpop.f32.mrb[56].mxu1 }
0x1062   :  { %v2109_v14 = vmul.f32 0.35355338, %v2048_v63  ;;  %v2110_v19 = vmul.f32 0.35355338, %v2097_v0  ;;  %v4145_v61 = vpop.f32.mrb[57].mxu0  ;;  %v4151_v1 = vpop.f32.mrb[57].mxu1 }
0x1063   :  { %v2051_v55 = vpop.f32.mrb[58].mxu0  ;;  %v2100_v2 = vpop.f32.mrb[58].mxu1 }
0x1064   :  { %v4146_v4 = vpop.f32.mrb[59].mxu0  ;;  %v4152_v6 = vpop.f32.mrb[59].mxu1  ;;  %v2118_v7 = vsel %vm5070_vm7, %v2110_v19, -1e+30  ;;  %v2117_v8 = vsel %vm5070_vm7, %v2109_v14, -1e+30 }
0x1065   :  { %v2140_v9 = vsel %vm406_vm5, %v2118_v7, -inf  ;;  %v2137_v10 = vsel %vm406_vm5, %v2117_v8, -inf }
0x1066   :  { %2141 = vmax.xlane.f32.xlu1 %v2140_v9  ;;  %2138 = vmax.xlane.f32.xlu0 %v2137_v10 }
0x1071   :  { %v2124_v24 = vpop.xlane.xlu0 %2123 }
0x1072   :  { %v2144_v12 = vsub.f32 %v5356_v11, %v2124_v24 }
0x1074   :  { %v2121_v5 = vpop.xlane.xlu1 %2120  ;;  %v2153_v13 = vmul.f32 1.442695, %v2144_v12 }
0x1075   :  { %v2143_v15 = vsub.f32 %v2111_v22, %v2121_v5 }
0x1076   :  { %4477 = vpow2.f32 %v2153_v13 }
0x1077   :  { %2311 = vrot.lane.b32.xlu1 %v5280_v43, %s4741_s28  ;;  %v2151_v49 = vmul.f32 1.442695, %v2143_v15 }
0x1079   :  { %4479 = vpow2.f32 %v2151_v49 }
0x107c   :  { %2359 = vrot.lane.b32.xlu0 %v5278_v42, %s4741_s28 }
0x1080   :  { %v4478_v18 = vpop.eup %4477 }
0x1081   :  { %v2170_v28 = vsel %vm406_vm5, %v4478_v18, 0.0 }
0x1083   :  { %v4480_v20 = vpop.eup %4479 }
0x1084   :  { %v2167_v32 = vsel %vm406_vm5, %v4480_v20, 0.0 }
0x109b   :  { %2171 = vadd.xlane.f32.xlu1 %v2170_v28  ;;  %2168 = vadd.xlane.f32.xlu0 %v2167_v32 }
0x10ac   :  { %2407 = vrot.lane.b32.xlu1 %v5289_v51, %s4741_s28 }
0x10e3   :  { %v2130_v42 = vpop.xlane.xlu1 %2129  ;;  %v2127_v43 = vpop.xlane.xlu0 %2126 }
0x10e4   :  { %v2146_v33 = vsub.f32 %v2114_v27, %v2130_v42  ;;  %v2145_v11 = vsub.f32 %v2113_v39, %v2127_v43 }
0x10e6   :  { %v2157_v22 = vmul.f32 1.442695, %v2146_v33  ;;  %v2155_v23 = vmul.f32 1.442695, %v2145_v11 }
0x10e8   :  { %4481 = vpow2.f32 %v2157_v22 }
0x10e9   :  { %4483 = vpow2.f32 %v2155_v23 }
0x10eb   :  { %v2136_v34 = vpop.xlane.xlu1 %2135  ;;  %v2133_v45 = vpop.xlane.xlu0 %2132 }
0x10ec   :  { %v2148_v35 = vsub.f32 %v2116_v29, %v2136_v34  ;;  %v2147_v46 = vsub.f32 %v5373_v25, %v2133_v45 }
0x10ee   :  { %v2161_v26 = vmul.f32 1.442695, %v2148_v35  ;;  %v2159_v54 = vmul.f32 1.442695, %v2147_v46 }
0x10f0   :  { %4485 = vpow2.f32 %v2161_v26 }
0x10f2   :  { %v5393_v36 = vpop.eup %4481 }
0x10f3   :  { %v5395_v37 = vpop.eup %4483  ;;  %v2142_v30 = vpop.xlane.xlu1 %2141  ;;  %v2176_v51 = vsel %vm406_vm5, %v5393_v36, 0.0 }
0x10f4   :  { %v2150_v38 = vsub.f32 %v2118_v7, %v2142_v30  ;;  %2177 = vadd.xlane.f32.xlu1 %v2176_v51  ;;  %v2173_v27 = vsel %vm406_vm5, %v5395_v37, 0.0  ;;  %v2139_v53 = vpop.xlane.xlu0 %2138 }
0x10f5   :  { %2174 = vadd.xlane.f32.xlu0 %v2173_v27  ;;  %v2149_v56 = vsub.f32 %v2117_v8, %v2139_v53 }
0x10f6   :  { %v2165_v39 = vmul.f32 1.442695, %v2150_v38 }
0x10f7   :  { %v2163_v16 = vmul.f32 1.442695, %v2149_v56  ;;  %v2312_v58 = vpop.permute.xlu1 %2311 }
0x10f8   :  { %4487 = vpow2.f32 %v2165_v39  ;;  %v2360_v59 = vpop.permute.xlu0 %2359  ;;  %v2317_v2 = vsel %vm915_vm6, %v2312_v58, 0 }
0x10f9   :  { %4489 = vpow2.f32 %v2159_v54  ;;  %v2365_v55 = vsel %vm915_vm6, %v2360_v59, 0 }
0x10fa   :  { %v5401_v31 = vpop.eup %4485  ;;  %4491 = vpow2.f32 %v2163_v16 }
0x10fb   :  { %v2182_v40 = vsel %vm406_vm5, %v5401_v31, 0.0 }
0x10fc   :  { %2183 = vadd.xlane.f32.xlu1 %v2182_v40 }
0x1102   :  { %v5405_v41 = vpop.eup %4487 }
0x1103   :  { %v2188_v44 = vsel %vm406_vm5, %v5405_v41, 0.0  ;;  %v5414_v29 = vpop.eup %4489 }
0x1104   :  { %2189 = vadd.xlane.f32.xlu1 %v2188_v44  ;;  %v5418_v25 = vpop.eup %4491 }
0x110b   :  { %2455 = vrot.lane.b32.xlu0 %v5287_v50, %s4741_s28  ;;  %v2179_v50 = vsel %vm406_vm5, %v5414_v29, 0.0 }
0x1115   :  { %2503 = vrot.lane.b32.xlu1 %v5299_v57, %s4741_s28  ;;  %v2185_v57 = vsel %vm406_vm5, %v5418_v25, 0.0 }
0x1128   :  { %v2172_v60 = vpop.xlane.xlu1 %2171  ;;  %v2169_v62 = vpop.xlane.xlu0 %2168 }
0x1129   :  { %4493 = vrcp.f32 %v2172_v60 }
0x112a   :  { %4495 = vrcp.f32 %v2169_v62  ;;  %2180 = vadd.xlane.f32.xlu0 %v2179_v50 }
0x112c   :  { %v2408_v4 = vpop.permute.xlu1 %2407 }
0x112e   :  { %2186 = vadd.xlane.f32.xlu0 %v2185_v57 }
0x1133   :  { %v4494_v63 = vpop.eup %4493 }
0x1134   :  { %v4496_v0 = vpop.eup %4495  ;;  %v2200_v14 = vmul.f32 %v4494_v63, %v4478_v18 }
0x1135   :  { %v2199_v19 = vmul.f32 %v4496_v0, %v4480_v20 }
0x1136   :  { %v2208_v61 = vpack.c.bf16 %v2200_v14, %v2200_v14  ;;  %v3766_v14 = vld [vmem:[%s4794_s8 + $0x20] sm:$0xff] }
0x1137   :  { %v2207_v1 = vpack.c.bf16 %v2199_v19, %v2199_v19  ;;  %v3767_v19 = vld [vmem:[%s4794_s8 + $0x28] sm:$0xff] }
0x1138   :  { %4162 = vmatmul.mubr.msk.bf16.vlgmr.msra.gmra.mrb[60].mxu1 %vm406_vm5, %v2208_v61  ;;  %v2635_v61 = vpack.c.bf16 %v3767_v19, %v3766_v14 }
0x1139   :  { %4156 = vmatmul.mubr.msk.bf16.vlgmr.msra.gmra.mrb[60].mxu0 %vm406_vm5, %v2207_v1  ;;  %4172 = vmatpush3.bf16.msra.mxu1 %v2365_v55 }
0x113a   :  { %4166 = vmatpush3.bf16.msra.mxu0 %v2317_v2  ;;  %4167 = vmatprep.mubr.msk.bf16.mxu0 %vm4736_vm0, %v4735_v3  ;;  %v3768_v2 = vld [vmem:[%s4794_s8 + $0x30] sm:$0xff] }
0x113b   :  { %4173 = vmatprep.mubr.msk.bf16.mxu1 %vm4736_vm0, %v4735_v3  ;;  %4177 = vmatprep.subr.bf16.mxu0 %v4735_v3 }
0x113c   :  { %4183 = vmatprep.subr.bf16.mxu1 %v4735_v3 }
0x1144   :  { %2551 = vrot.lane.b32.xlu0 %v5297_v21, %s4741_s28  ;;  %v2413_v21 = vsel %vm915_vm6, %v2408_v4, 0  ;;  %v3769_v4 = vld [vmem:[%s4794_s8 + $0x38] sm:$0xff]  ;;  %s3773_s8 = sld [smem:[#allocation2 + $0x1]] }
0x1181   :  { %v2178_v6 = vpop.xlane.xlu1 %2177 }
0x1182   :  { %4497 = vrcp.f32 %v2178_v6  ;;  %v2175_v7 = vpop.xlane.xlu0 %2174 }
0x1183   :  { %4499 = vrcp.f32 %v2175_v7  ;;  %v2636_v7 = vpack.c.bf16 %v3769_v4, %v3768_v2  ;;  %v2704_v2 = vld [vmem:[%s5728_s25 + $0x38] sm:$0xff] }
0x1186   :  { %v2456_v12 = vpop.permute.xlu0 %2455 }
0x1187   :  { %v2461_v49 = vsel %vm915_vm6, %v2456_v12, 0 }
0x1189   :  { %v2184_v8 = vpop.xlane.xlu1 %2183 }
0x118a   :  { %4501 = vrcp.f32 %v2184_v8 }
0x118c   :  { %v4498_v9 = vpop.eup %4497 }
0x118d   :  { %v4500_v10 = vpop.eup %4499  ;;  %v2202_v24 = vmul.f32 %v4498_v9, %v5393_v36 }
0x118e   :  { %v2201_v5 = vmul.f32 %v4500_v10, %v5395_v37 }
0x118f   :  { %v2210_v15 = vpack.c.bf16 %v2202_v24, %v2202_v24 }
0x1190   :  { %v2209_v13 = vpack.c.bf16 %v2201_v5, %v2201_v5 }
0x1191   :  { %4174 = vmatmul.mubr.msk.bf16.vlgmr.msra.gmra.mrb[64].mxu1 %vm406_vm5, %v2210_v15  ;;  %v2190_v32 = vpop.xlane.xlu1 %2189 }
0x1192   :  { %4168 = vmatmul.mubr.msk.bf16.vlgmr.msra.gmra.mrb[64].mxu0 %vm406_vm5, %v2209_v13  ;;  %4184 = vmatpush3.bf16.msra.mxu1 %v2461_v49  ;;  %4503 = vrcp.f32 %v2190_v32 }
0x1193   :  { %4178 = vmatpush3.bf16.msra.mxu0 %v2413_v21  ;;  %4185 = vmatprep.mubr.msk.bf16.mxu1 %vm4736_vm0, %v4735_v3 }
0x1194   :  { %v4502_v18 = vpop.eup %4501  ;;  %4195 = vmatprep.subr.bf16.mxu1 %v4735_v3  ;;  %4179 = vmatprep.mubr.msk.bf16.mxu0 %vm4736_vm0, %v4735_v3 }
0x1195   :  { %v2204_v20 = vmul.f32 %v4502_v18, %v5401_v31  ;;  %4189 = vmatprep.subr.bf16.mxu0 %v4735_v3  ;;  %v2504_v36 = vpop.permute.xlu1 %2503 }
0x1196   :  { %v2509_v51 = vsel %vm915_vm6, %v2504_v36, 0 }
0x1197   :  { %v2212_v28 = vpack.c.bf16 %v2204_v20, %v2204_v20 }
0x1199   :  { %4186 = vmatmul.mubr.msk.bf16.vlgmr.msra.gmra.mrb[68].mxu1 %vm406_vm5, %v2212_v28 }
0x119a   :  { %4197 = vmatprep.mubr.msk.bf16.mxu1 %vm4736_vm0, %v4735_v3 }
0x119c   :  { %v4504_v43 = vpop.eup %4503 }
0x119d   :  { %v2206_v11 = vmul.f32 %v4504_v43, %v5405_v41 }
0x119f   :  { %v2214_v35 = vpack.c.bf16 %v2206_v11, %v2206_v11 }
0x11b7   :  { %v2181_v42 = vpop.xlane.xlu0 %2180 }
0x11b8   :  { %4505 = vrcp.f32 %v2181_v42 }
0x11bb   :  { %v2187_v33 = vpop.xlane.xlu0 %2186 }
0x11bc   :  { %4507 = vrcp.f32 %v2187_v33 }
0x11bf   :  { %v2552_v22 = vpop.permute.xlu0 %2551 }
0x11c0   :  { %v2557_v23 = vsel %vm915_vm6, %v2552_v22, 0 }
0x11c1   :  { %4196 = vmatpush3.bf16.msra.mxu1 %v2557_v23 }
0x11c2   :  { %v4506_v34 = vpop.eup %4505  ;;  %4209 = vmatprep.subr.bf16.mxu1 %v4735_v3 }
0x11c3   :  { %v2203_v26 = vmul.f32 %v4506_v34, %v5414_v29 }
0x11c4   :  { %4198 = vmatmul.mubr.msk.bf16.vlgmr.msra.gmra.mrb[72].mxu1 %vm406_vm5, %v2214_v35 }
0x11c5   :  { %v2211_v37 = vpack.c.bf16 %v2203_v26, %v2203_v26  ;;  %4213 = vmatprep.mubr.msk.bf16.mxu1 %vm4736_vm0, %v4735_v3 }
0x11c6   :  { %v4508_v30 = vpop.eup %4507 }
0x11c7   :  { %4180 = vmatmul.mubr.msk.bf16.vlgmr.msra.gmra.mrb[68].mxu0 %vm406_vm5, %v2211_v37  ;;  %v2205_v38 = vmul.f32 %v4508_v30, %v5418_v25 }
0x11c8   :  { %4190 = vmatpush3.bf16.msra.mxu0 %v2509_v51  ;;  %4191 = vmatprep.mubr.msk.bf16.mxu0 %vm4736_vm0, %v4735_v3 }
0x11c9   :  { %4201 = vmatprep.subr.bf16.mxu0 %v4735_v3  ;;  %v2213_v27 = vpack.c.bf16 %v2205_v38, %v2205_v38 }
0x11cf   :  { %4192 = vmatmul.mubr.msk.bf16.vlgmr.msra.gmra.mrb[72].mxu0 %vm406_vm5, %v2213_v27  ;;  %v3772_v27 = vld [vmem:[%s4799_s14 + $0x1] ss:$0 sm:$0xff]  ;;  %s5729_s14 = sld [smem:[#allocation29_spill]] }
0x11d0   :  { %4205 = vmatprep.mubr.msk.bf16.mxu0 %vm4736_vm0, %v4735_v3  ;;  %4202 = vmatpush3.bf16.msra.mxu0 %v2635_v61 }
0x11d1   :  { %4203 = vmatprep.subr.bf16.mxu0 %v4735_v3 }
0x11d4   :  { %4204 = vmatpush3.bf16.msra.mxu0 %v2636_v7  ;;  %v2705_v7 = vld [vmem:[%s5728_s25 + $0x40] sm:$0xff] }
0x120b   :  { %v2305_v39 = vpop.f32.mrb[60].mxu1 }
0x120c   :  { %v2257_v31 = vpop.f32.mrb[60].mxu0  ;;  %v4163_v40 = vpop.f32.mrb[61].mxu1 }
0x120d   :  { %v4157_v41 = vpop.f32.mrb[61].mxu0  ;;  %v2308_v44 = vpop.f32.mrb[62].mxu1 }
0x120e   :  { %v2260_v45 = vpop.f32.mrb[62].mxu0  ;;  %v4164_v46 = vpop.f32.mrb[63].mxu1 }
0x120f   :  { %v4158_v53 = vpop.f32.mrb[63].mxu0 }
0x1264   :  { %v2401_v54 = vpop.f32.mrb[64].mxu1 }
0x1265   :  { %v2353_v56 = vpop.f32.mrb[64].mxu0  ;;  %v4175_v16 = vpop.f32.mrb[65].mxu1 }
0x1266   :  { %v4413_v58 = vpack.i.bf16 %v2401_v54, %v2353_v56  ;;  %v4169_v59 = vpop.f32.mrb[65].mxu0  ;;  %v2404_v29 = vpop.f32.mrb[66].mxu1  ;;  %v2839_v54 = vld [vmem:[%s5727_s21] sm:$0xff] }
0x1267   :  { %v2356_v60 = vpop.f32.mrb[66].mxu0  ;;  %v4176_v62 = vpop.f32.mrb[67].mxu1  ;;  %v2840_v56 = vpack.c.bf16 %v2839_v54, %v2839_v54  ;;  %v2697_v16 = vld [vmem:[%s5728_s25] sm:$0xff]  ;;  %v2699_v59 = vld [vmem:[%s5728_s25 + $0x10] sm:$0xff]  ;;  %v2700_v29 = vld [vmem:[%s5728_s25 + $0x18] sm:$0xff] }
0x1268   :  { %4414 = vrot.lane.b32.xlu1 %v4413_v58, %s4729_s26  ;;  %v4170_v50 = vpop.f32.mrb[67].mxu0  ;;  %v2698_v58 = vld [vmem:[%s5728_s25 + $0x8] sm:$0xff]  ;;  %v2701_v60 = vld [vmem:[%s5728_s25 + $0x20] sm:$0xff]  ;;  %v2777_v54 = vld [vmem:[#allocation9 + $0x18] sm:$0xff] }
0x1269   :  { %4317 = vmatprep.subr.msk.bf16.mxu0 %vm915_vm6, %v2840_v56  ;;  %v2702_v62 = vld [vmem:[%s5728_s25 + $0x28] sm:$0xff]  ;;  %v2694_v50 = vstv %s2693_s3 }
0x126a   :  { %v2717_v14 = vmul.f32 %v2701_v60, %v2694_v50  ;;  %v2718_v19 = vmul.f32 %v2702_v62, %v2694_v50 }
0x126c   :  { %v2497_v25 = vpop.f32.mrb[68].mxu1  ;;  %v2833_v4 = vpack.c.bf16 %v2718_v19, %v2717_v14 }
0x126d   :  { %v4187_v57 = vpop.f32.mrb[69].mxu1 }
0x126e   :  { %v2500_v63 = vpop.f32.mrb[70].mxu1  ;;  %v2714_v57 = vmul.f32 %v2698_v58, %v2694_v50 }
0x126f   :  { %v4188_v0 = vpop.f32.mrb[71].mxu1  ;;  %v2715_v63 = vmul.f32 %v2699_v59, %v2694_v50 }
0x1270   :  { %v2716_v0 = vmul.f32 %v2700_v29, %v2694_v50 }
0x1297   :  { %v2593_v1 = vpop.f32.mrb[72].mxu1 }
0x1298   :  { %v4199_v55 = vpop.f32.mrb[73].mxu1 }
0x1299   :  { %v2596_v6 = vpop.f32.mrb[74].mxu1  ;;  %v2703_v55 = vld [vmem:[%s5728_s25 + $0x30] sm:$0xff] }
0x129a   :  { %v2449_v8 = vpop.f32.mrb[68].mxu0  ;;  %v4200_v9 = vpop.f32.mrb[75].mxu1  ;;  %v2696_v6 = vstv %s3773_s8 }
0x129b   :  { %v4418_v10 = vpack.i.bf16 %v2497_v25, %v2449_v8  ;;  %v4181_v24 = vpop.f32.mrb[69].mxu0  ;;  %v2713_v25 = vmul.f32 %v2697_v16, %v2694_v50  ;;  %v2706_v8 = vld [vmem:[%s5728_s25 + $0x48] sm:$0xff]  ;;  %v2719_v9 = vmul.f32 %v2703_v55, %v2694_v50 }
0x129c   :  { %v2452_v5 = vpop.f32.mrb[70].mxu0  ;;  %v2721_v24 = vmul.f32 %v2705_v7, %v2696_v6 }
0x129d   :  { %4419 = vrot.lane.b32.xlu0 %v4418_v10, %s4742_s1  ;;  %v4182_v12 = vpop.f32.mrb[71].mxu0  ;;  %v2831_v61 = vpack.c.bf16 %v2714_v57, %v2713_v25  ;;  %v2720_v10 = vmul.f32 %v2704_v2, %v2694_v50  ;;  %v2722_v5 = vmul.f32 %v2706_v8, %v2696_v6 }
0x129f   :  { %v2834_v12 = vpack.c.bf16 %v2720_v10, %v2719_v9 }
0x12a2   :  { %v2545_v15 = vpop.f32.mrb[72].mxu0 }
0x12a3   :  { %v4423_v13 = vpack.i.bf16 %v2593_v1, %v2545_v15  ;;  %v4193_v49 = vpop.f32.mrb[73].mxu0  ;;  %v2832_v1 = vpack.c.bf16 %v2716_v0, %v2715_v63  ;;  %v2835_v15 = vpack.c.bf16 %v2722_v5, %v2721_v24 }
0x12a4   :  { %v2548_v21 = vpop.f32.mrb[74].mxu0  ;;  %v2708_v49 = vld [vmem:[%s5728_s25 + $0x58] sm:$0xff] }
0x12a5   :  { %4424 = vrot.lane.b32.xlu1 %v4423_v13, %s4743_s2  ;;  %v4194_v18 = vpop.f32.mrb[75].mxu0  ;;  %v2707_v13 = vld [vmem:[%s5728_s25 + $0x50] sm:$0xff]  ;;  %v2709_v21 = vld [vmem:[%s5728_s25 + $0x60] sm:$0xff] }
0x12a6   :  { %v2710_v18 = vld [vmem:[%s5728_s25 + $0x68] sm:$0xff] }
0x12da   :  { %v4415_v20 = vpop.permute.xlu1 %4414 }
0x12db   :  { %v4417_v32 = vunpack.i.h.bf16 %v4415_v20  ;;  %v4416_v42 = vunpack.i.l.bf16 %v4415_v20  ;;  %v2723_v20 = vmul.f32 %v2707_v13, %v2696_v6 }
0x12dd   :  { %v2624_v22 = vsel %vm406_vm5, %v2305_v39, %v4417_v32  ;;  %v2623_v23 = vsel %vm406_vm5, %v2257_v31, %v4416_v42  ;;  %v2725_v32 = vmul.f32 %v2709_v21, %v2696_v6  ;;  %v2726_v42 = vmul.f32 %v2710_v18, %v2696_v6 }
0x130f   :  { %v4420_v28 = vpop.permute.xlu0 %4419 }
0x1310   :  { %v4422_v43 = vunpack.i.h.bf16 %v4420_v28  ;;  %v4421_v33 = vunpack.i.l.bf16 %v4420_v28  ;;  %v2724_v28 = vmul.f32 %v2708_v49, %v2696_v6 }
0x1312   :  { %v2626_v26 = vsel %vm1321_vm8, %v2624_v22, %v4422_v43  ;;  %v2625_v36 = vsel %vm1321_vm8, %v2623_v23, %v4421_v33  ;;  %v2836_v43 = vpack.c.bf16 %v2724_v28, %v2723_v20  ;;  %v2837_v33 = vpack.c.bf16 %v2726_v42, %v2725_v32  ;;  %v2712_v22 = vld [vmem:[%s5728_s25 + $0x78] sm:$0xff] }
0x1317   :  { %v4425_v11 = vpop.permute.xlu1 %4424 }
0x1318   :  { %v4427_v34 = vunpack.i.h.bf16 %v4425_v11  ;;  %v4426_v35 = vunpack.i.l.bf16 %v4425_v11  ;;  %v2711_v11 = vld [vmem:[%s5728_s25 + $0x70] sm:$0xff] }
0x1319   :  { %v2727_v23 = vmul.f32 %v2711_v11, %v2696_v6 }
0x131a   :  { %v2628_v37 = vsel %vm1324_vm9, %v2626_v26, %v4427_v34  ;;  %v2627_v30 = vsel %vm1324_vm9, %v2625_v36, %v4426_v35  ;;  %v2728_v34 = vmul.f32 %v2712_v22, %v2696_v6 }
0x131b   :  { %v2629_v51 = vpack.c.bf16 %v2628_v37, %v2627_v30 }
0x131c   :  { %v2838_v35 = vpack.c.bf16 %v2728_v34, %v2727_v23 }
0x131d   :  { %4206 = vmatmul.mubr.msk.bf16.vlgmr.msra.gmra.mrb[76].mxu0 %vm273_vm4, %v2629_v51 }
0x131e   :  { %4219 = vmatprep.mubr.msk.bf16.mxu0 %vm406_vm5, %v2831_v61 }
0x13f0   :  { %v2674_v38 = vpop.f32.mrb[76].mxu0 }
0x13f1   :  { %v2681_v39 = vadd.f32 %v2674_v38, %v5252_v47  ;;  %v4207_v40 = vpop.f32.mrb[77].mxu0 }
0x13f2   :  { %v2677_v31 = vpop.f32.mrb[78].mxu0 }
0x13f3   :  { %v5483_v41 = vadd.f32 %v3772_v27, %v2681_v39  ;;  %v2682_v44 = vadd.f32 %v2677_v31, %v5255_v52  ;;  %v4208_v45 = vpop.f32.mrb[79].mxu0  ;;  %v2873_v52 = vsel %vm915_vm6, %v2840_v56, 0 }
0x13f4   :  { %4218 = vmatpush3.bf16.msra.mxu0 %v2873_v52  ;;  %v2775_v45 = vld [vmem:[#allocation9 + $0x8] sm:$0xff]  ;;  %v3778_v52 = vld [vmem:[%s5729_s14] ss:$0 sm:$0xff] }
0x13f5   :  { %v5486_v46 = vadd.f32 %v3772_v27, %v2682_v44  ;;  %v2731_v53 = vsel %vm273_vm4, %v5483_v41, 0.0  ;;  %4247 = vmatprep.subr.bf16.mxu0 %v4735_v3  ;;  %v2774_v44 = vld [vmem:[#allocation9] sm:$0xff] }
0x13f6   :  { %2732 = vadd.xlane.f32.xlu0 %v2731_v53  ;;  %v2778_v53 = vpack.c.bf16 %v2775_v45, %v2774_v44 }
0x13f7   :  { %v2734_v47 = vsel %vm273_vm4, %v5486_v46, 0.0  ;;  %4220 = vmatmul.mubr.msk.bf16.vlgmr.msra.gmra.mrb[80].mxu0 %vm406_vm5, %v2832_v1 }
0x13f8   :  { %2735 = vadd.xlane.f32.xlu1 %v2734_v47  ;;  %4223 = vmatprep.mubr.msk.bf16.mxu0 %vm406_vm5, %v2833_v4  ;;  %v2776_v47 = vld [vmem:[#allocation9 + $0x10] sm:$0xff] }
0x13f9   :  { %4210 = vmatpush3.bf16.msra.mxu1 %v2778_v53  ;;  %v2779_v56 = vpack.c.bf16 %v2777_v54, %v2776_v47  ;;  %v3774_v53 = vld [vmem:[%s5730_s29] ss:$0 sm:$0xff] }
0x13fa   :  { %4211 = vmatprep.subr.bf16.mxu1 %v4735_v3 }
0x13fd   :  { %4212 = vmatpush3.bf16.msra.mxu1 %v2779_v56 }
0x13fe   :  { %4235 = vmatprep.subr.bf16.mxu1 %v4735_v3 }
0x13ff   :  { %4224 = vmatmul.mubr.msk.bf16.gmra.mrb[84].mxu0 %vm406_vm5, %v2834_v12 }
0x1400   :  { %4227 = vmatprep.mubr.msk.bf16.mxu0 %vm406_vm5, %v2835_v15 }
0x1407   :  { %4228 = vmatmul.mubr.msk.bf16.gmra.mrb[88].mxu0 %vm406_vm5, %v2836_v43 }
0x1408   :  { %4231 = vmatprep.mubr.msk.bf16.mxu0 %vm406_vm5, %v2837_v33 }
0x140f   :  { %4232 = vmatmul.mubr.msk.bf16.gmra.mrb[92].mxu0 %vm406_vm5, %v2838_v35 }
0x1410   :  { %4255 = vmatprep.mubr.msk.bf16.mxu0 %vm4736_vm0, %v4735_v3 }
0x1483   :  { %v2733_v26 = vpop.xlane.xlu0 %2732 }
0x1484   :  { %v2737_v36 = vmul.f32 0.03125, %v2733_v26 }
0x1485   :  { %v2736_v37 = vpop.xlane.xlu1 %2735 }
0x1486   :  { %v5523_v30 = vsub.f32 %v5483_v41, %v2737_v36  ;;  %v2738_v51 = vmul.f32 0.03125, %v2736_v37 }
0x1488   :  { %v5526_v38 = vsub.f32 %v5486_v46, %v2738_v51  ;;  %v2741_v27 = vmul.f32 %v5523_v30, %v5523_v30 }
0x148a   :  { %v2743_v39 = vsel %vm273_vm4, %v2741_v27, 0.0  ;;  %v2742_v40 = vmul.f32 %v5526_v38, %v5526_v38 }
0x148b   :  { %2744 = vadd.xlane.f32.xlu0 %v2743_v39 }
0x148c   :  { %v2746_v31 = vsel %vm273_vm4, %v2742_v40, 0.0 }
0x148f   :  { %2747 = vadd.xlane.f32.xlu0 %v2746_v31 }
0x14ca   :  { %v4221_v16 = vpop.f32.mrb[80].mxu0 }
0x14cb   :  { %v2918_v58 = vadd.f32 %v4221_v16, %v3778_v52  ;;  %v2909_v59 = vpop.f32.mrb[81].mxu0 }
0x14cc   :  { %v2910_v29 = vadd.f32 %v3778_v52, %v2909_v59  ;;  %v4222_v60 = vpop.f32.mrb[82].mxu0 }
0x14cd   :  { %v2921_v62 = vadd.f32 %v4222_v60, %v3778_v52  ;;  %v2912_v50 = vpop.f32.mrb[83].mxu0 }
0x14ce   :  { %v2913_v25 = vadd.f32 %v3778_v52, %v2912_v50  ;;  %v3776_v50 = vld [vmem:[%s5732_s15] ss:$0 sm:$0xff] }
0x14cf   :  { %v5537_v57 = vpack.c.bf16 %v2921_v62, %v2918_v58 }
0x14d0   :  { %v5539_v63 = vpack.c.bf16 %v2913_v25, %v2910_v29 }
0x14d2   :  { %v4225_v0 = vpop.f32.mrb[84].mxu0  ;;  %v2986_v60 = vsel %vm406_vm5, %v5539_v63, 0 }
0x14d3   :  { %v2934_v14 = vadd.f32 %v4225_v0, %v3778_v52  ;;  %v2925_v19 = vpop.f32.mrb[85].mxu0 }
0x14d4   :  { %v2926_v61 = vadd.f32 %v3778_v52, %v2925_v19  ;;  %v4226_v1 = vpop.f32.mrb[86].mxu0 }
0x14d5   :  { %v2937_v55 = vadd.f32 %v4226_v1, %v3778_v52  ;;  %v2928_v2 = vpop.f32.mrb[87].mxu0 }
0x14d6   :  { %v2929_v4 = vadd.f32 %v3778_v52, %v2928_v2 }
0x14d7   :  { %v5541_v6 = vpack.c.bf16 %v2937_v55, %v2934_v14 }
0x14d8   :  { %v5543_v7 = vpack.c.bf16 %v2929_v4, %v2926_v61 }
0x14d9   :  { %v2995_v62 = vsel %vm406_vm5, %v5541_v6, 0 }
0x14da   :  { %v4229_v8 = vpop.f32.mrb[88].mxu0 }
0x14db   :  { %v2950_v9 = vadd.f32 %v4229_v8, %v3778_v52  ;;  %v2941_v10 = vpop.f32.mrb[89].mxu0 }
0x14dc   :  { %v2942_v24 = vadd.f32 %v3778_v52, %v2941_v10  ;;  %v4230_v5 = vpop.f32.mrb[90].mxu0 }
0x14dd   :  { %v2953_v12 = vadd.f32 %v4230_v5, %v3778_v52  ;;  %v2944_v15 = vpop.f32.mrb[91].mxu0 }
0x14de   :  { %v2945_v13 = vadd.f32 %v3778_v52, %v2944_v15 }
0x14df   :  { %v5545_v49 = vpack.c.bf16 %v2953_v12, %v2950_v9 }
0x14e0   :  { %v5547_v21 = vpack.c.bf16 %v2945_v13, %v2942_v24 }
0x14e1   :  { %v3044_v34 = vsel %vm406_vm5, %v5545_v49, 0 }
0x14e2   :  { %v3041_v18 = vsel %vm406_vm5, %v5547_v21, 0  ;;  %v4233_v20 = vpop.f32.mrb[92].mxu0 }
0x14e3   :  { %4248 = vmatpush3.bf16.xpose.msra.mxu0 %v3041_v18  ;;  %v2966_v28 = vadd.f32 %v4233_v20, %v3778_v52  ;;  %v2957_v32 = vpop.f32.mrb[93].mxu0 }
0x14e4   :  { %4249 = vmatprep.subr.bf16.mxu0 %v4735_v3  ;;  %v2958_v42 = vadd.f32 %v3778_v52, %v2957_v32  ;;  %v4234_v43 = vpop.f32.mrb[94].mxu0 }
0x14e5   :  { %v2969_v33 = vadd.f32 %v4234_v43, %v3778_v52  ;;  %v2960_v11 = vpop.f32.mrb[95].mxu0 }
0x14e6   :  { %v2961_v22 = vadd.f32 %v3778_v52, %v2960_v11  ;;  %v3775_v52 = vld [vmem:[%s5731_s11] ss:$0 sm:$0xff] }
0x14e7   :  { %v5552_v23 = vpack.c.bf16 %v2969_v33, %v2966_v28 }
0x14e8   :  { %v5556_v35 = vpack.c.bf16 %v2961_v22, %v2958_v42 }
0x14e9   :  { %v3050_v39 = vsel %vm406_vm5, %v5552_v23, 0 }
0x14ea   :  { %v3047_v26 = vsel %vm406_vm5, %v5556_v35, 0 }
0x14eb   :  { %4250 = vmatpush3.bf16.xpose.msra.mxu0 %v3044_v34 }
0x14ec   :  { %4251 = vmatprep.subr.bf16.mxu0 %v4735_v3 }
0x14f3   :  { %4252 = vmatpush3.bf16.xpose.msra.mxu0 %v3047_v26 }
0x14f4   :  { %4253 = vmatprep.subr.bf16.mxu0 %v4735_v3 }
0x14fb   :  { %4254 = vmatpush3.bf16.xpose.msra.mxu0 %v3050_v39 }
0x14fc   :  { %4271 = vmatprep.subr.bf16.mxu0 %v4735_v3 }
0x1518   :  { %v2745_v36 = vpop.xlane.xlu0 %2744 }
0x1519   :  { %v2749_v37 = vmul.f32 0.03125, %v2745_v36 }
0x151b   :  { %v2751_v51 = vadd.f32 1e-05, %v2749_v37 }
0x151c   :  { %v2748_v27 = vpop.xlane.xlu0 %2747 }
0x151d   :  { %4509 = vrsqrt.f32 %v2751_v51  ;;  %v2750_v40 = vmul.f32 0.03125, %v2748_v27 }
0x151f   :  { %v2752_v31 = vadd.f32 1e-05, %v2750_v40 }
0x1521   :  { %4511 = vrsqrt.f32 %v2752_v31  ;;  %v3237_v31 = vld [vmem:[%s5733_s16] sm:$0xff] }
0x1527   :  { %v4510_v44 = vpop.eup %4509 }
0x1528   :  { %v2755_v45 = vmul.f32 %v4510_v44, %v5523_v30  ;;  %v2989_v30 = vsel %vm406_vm5, %v5537_v57, 0  ;;  %v3238_v44 = vpack.c.bf16 %v3237_v31, %v3237_v31 }
0x152a   :  { %v2763_v54 = vmul.f32 %v3774_v53, %v2755_v45 }
0x152b   :  { %v4512_v47 = vpop.eup %4511 }
0x152c   :  { %v2756_v56 = vmul.f32 %v4512_v47, %v5526_v38  ;;  %v2771_v58 = vadd.f32 %v3775_v52, %v2763_v54  ;;  %v2992_v38 = vsel %vm406_vm5, %v5543_v7, 0 }
0x152e   :  { %v2764_v16 = vmul.f32 %v3774_v53, %v2756_v56 }
0x1530   :  { %v2772_v59 = vadd.f32 %v3775_v52, %v2764_v16 }
0x1532   :  { %v2773_v29 = vpack.c.bf16 %v2772_v59, %v2771_v58 }
0x1534   :  { %4214 = vmatmul.mubr.msk.bf16.vlgmr.msra.gmra.mrb[76].mxu1 %vm273_vm4, %v2773_v29 }
0x1535   :  { %4236 = vmatpush3.bf16.xpose.msra.mxu1 %v2986_v60  ;;  %4243 = vmatprep.mubr.msk.bf16.mxu1 %vm4736_vm0, %v4735_v3 }
0x1536   :  { %4237 = vmatprep.subr.bf16.mxu1 %v4735_v3 }
0x153d   :  { %4238 = vmatpush3.bf16.xpose.msra.mxu1 %v2989_v30 }
0x153e   :  { %4239 = vmatprep.subr.bf16.mxu1 %v4735_v3 }
0x1545   :  { %4240 = vmatpush3.bf16.xpose.msra.mxu1 %v2992_v38 }
0x1546   :  { %4241 = vmatprep.subr.bf16.mxu1 %v4735_v3 }
0x154d   :  { %4242 = vmatpush3.bf16.xpose.msra.mxu1 %v2995_v62 }
0x154e   :  { %4259 = vmatprep.subr.bf16.mxu1 %v4735_v3 }
0x1607   :  { %v2824_v25 = vpop.f32.mrb[76].mxu1 }
0x1608   :  { %v2825_v0 = vadd.f32 %v3776_v50, %v2824_v25  ;;  %v4215_v14 = vpop.f32.mrb[77].mxu1 }
0x1609   :  { %v2827_v19 = vpop.f32.mrb[78].mxu1 }
0x160a   :  { %v2972_v61 = vpack.c.bf16 %v2825_v0, %v2825_v0  ;;  %v2828_v1 = vadd.f32 %v3776_v50, %v2827_v19  ;;  %v4216_v55 = vpop.f32.mrb[79].mxu1  ;;  %v3791_v50 = vld [vmem:[%s5734_s17] ss:$0 sm:$0xff] }
0x160c   :  { %v2973_v2 = vpack.c.bf16 %v2828_v1, %v2828_v1  ;;  %4244 = vmatmul.mubr.msk.bf16.vlgmr.msra.gmra.mrb[80].mxu1 %vm406_vm5, %v2972_v61 }
0x160d   :  { %4267 = vmatprep.mubr.msk.bf16.mxu1 %vm4736_vm0, %v4735_v3 }
0x160e   :  { %4256 = vmatmul.mubr.msk.bf16.vlgmr.msra.gmra.mrb[96].mxu0 %vm406_vm5, %v2973_v2 }
0x160f   :  { %4279 = vmatprep.mubr.msk.bf16.mxu0 %vm4736_vm0, %v4735_v3 }
0x16df   :  { %v3031_v4 = vpop.f32.mrb[80].mxu1 }
0x16e0   :  { %v3092_v8 = vmul.f32 0.35355338, %v3031_v4  ;;  %v4245_v9 = vpop.f32.mrb[81].mxu1 }
0x16e1   :  { %v3034_v10 = vpop.f32.mrb[82].mxu1  ;;  %v3086_v24 = vpop.f32.mrb[96].mxu0 }
0x16e2   :  { %v3093_v5 = vmul.f32 0.35355338, %v3086_v24  ;;  %v4246_v12 = vpop.f32.mrb[83].mxu1  ;;  %v4257_v15 = vpop.f32.mrb[97].mxu0  ;;  %v3094_v13 = vsel %vm223_vm3, %v3092_v8, -inf }
0x16e3   :  { %v3089_v18 = vpop.f32.mrb[98].mxu0  ;;  %3095 = vmax.xlane.f32.xlu1 %v3094_v13 }
0x16e4   :  { %v4258_v20 = vpop.f32.mrb[99].mxu0  ;;  %v3097_v28 = vsel %vm223_vm3, %v3093_v5, -inf }
0x16e5   :  { %3098 = vmax.xlane.f32.xlu0 %v3097_v28  ;;  %v3797_v20 = vld [vmem:[%s4814_s30 + $0x20] sm:$0xff]  ;;  %v3798_v28 = vld [vmem:[%s4814_s30 + $0x28] sm:$0xff] }
0x16f4   :  { %3122 = vrot.lane.b32.xlu1 %v5539_v63, %s4737_s5 }
0x16f8   :  { %3124 = vrot.lane.b32.xlu1 %v5537_v57, %s4737_s5 }
0x16fb   :  { %3181 = vrot.lane.b32.xlu0 %v5547_v21, %s4737_s5 }
0x16fc   :  { %3183 = vrot.lane.b32.xlu1 %v5545_v49, %s4737_s5 }
0x16ff   :  { %3126 = vrot.lane.b32.xlu0 %v5543_v7, %s4737_s5 }
0x1700   :  { %3185 = vrot.lane.b32.xlu1 %v5556_v35, %s4737_s5 }
0x1770   :  { %v3096_v32 = vpop.xlane.xlu1 %3095 }
0x1771   :  { %v3100_v42 = vsub.f32 %v3092_v8, %v3096_v32  ;;  %v3347_v32 = vpack.c.bf16 %v3798_v28, %v3797_v20 }
0x1772   :  { %v3099_v43 = vpop.xlane.xlu0 %3098 }
0x1773   :  { %v3102_v33 = vmul.f32 1.442695, %v3100_v42  ;;  %v3101_v63 = vsub.f32 %v3093_v5, %v3099_v43  ;;  %v3799_v42 = vld [vmem:[%s4814_s30 + $0x30] sm:$0xff]  ;;  %v3800_v43 = vld [vmem:[%s4814_s30 + $0x38] sm:$0xff]  ;;  %s5737_s30 = sld [smem:[#allocation21_spill]] }
0x1774   :  { %v3123_v11 = vpop.permute.xlu1 %3122 }
0x1775   :  { %4513 = vpow2.f32 %v3102_v33  ;;  %v3104_v57 = vmul.f32 1.442695, %v3101_v63  ;;  %4260 = vmatpush3.bf16.msra.mxu1 %v3123_v11  ;;  %v3348_v33 = vpack.c.bf16 %v3800_v43, %v3799_v42  ;;  %v3814_v42 = vld [vmem:[%s5726_s10 + $0x1] ss:$0 sm:$0xff] }
0x1776   :  { %v3182_v22 = vpop.permute.xlu0 %3181  ;;  %4261 = vmatprep.subr.bf16.mxu1 %v4735_v3 }
0x1777   :  { %4515 = vpow2.f32 %v3104_v57  ;;  %4272 = vmatpush3.bf16.msra.mxu0 %v3182_v22 }
0x1778   :  { %v3125_v49 = vpop.permute.xlu1 %3124  ;;  %4273 = vmatprep.subr.bf16.mxu0 %v4735_v3 }
0x1779   :  { %4262 = vmatpush3.bf16.msra.mxu1 %v3125_v49 }
0x177a   :  { %4263 = vmatprep.subr.bf16.mxu1 %v4735_v3  ;;  %v3127_v7 = vpop.permute.xlu0 %3126 }
0x177c   :  { %v3184_v21 = vpop.permute.xlu1 %3183 }
0x177d   :  { %4264 = vmatpush3.bf16.msra.mxu1 %v3127_v7  ;;  %4274 = vmatpush3.bf16.msra.mxu0 %v3184_v21 }
0x177e   :  { %4275 = vmatprep.subr.bf16.mxu0 %v4735_v3  ;;  %4265 = vmatprep.subr.bf16.mxu1 %v4735_v3 }
0x177f   :  { %v4514_v34 = vpop.eup %4513 }
0x1780   :  { %v3186_v35 = vpop.permute.xlu1 %3185  ;;  %v3106_v26 = vsel %vm223_vm3, %v4514_v34, 0.0 }
0x1781   :  { %v4516_v36 = vpop.eup %4515  ;;  %3107 = vadd.xlane.f32.xlu1 %v3106_v26  ;;  %4276 = vmatpush3.bf16.msra.mxu0 %v3186_v35  ;;  %v3795_v35 = vld [vmem:[%s4804_s19 + $0x1] ss:$0 sm:$0xff]  ;;  %s5735_s19 = sld [smem:[#allocation32_spill]] }
0x1782   :  { %v3109_v37 = vsel %vm223_vm3, %v4516_v36, 0.0  ;;  %4277 = vmatprep.subr.bf16.mxu0 %v4735_v3 }
0x1783   :  { %3110 = vadd.xlane.f32.xlu0 %v3109_v37 }
0x1792   :  { %3187 = vrot.lane.b32.xlu1 %v5552_v23, %s4737_s5 }
0x1799   :  { %3128 = vrot.lane.b32.xlu0 %v5541_v6, %s4737_s5  ;;  %v3250_v6 = vsel %vm915_vm6, %v3238_v44, 0  ;;  %v3804_v44 = vld [vmem:[%s4824_s12 + $0x40] sm:$0xff] }
0x180e   :  { %v3108_v51 = vpop.xlane.xlu1 %3107 }
0x180f   :  { %4517 = vrcp.f32 %v3108_v51  ;;  %v3796_v51 = vld [vmem:[%s4809_s24 + $0x1] ss:$0 sm:$0xff]  ;;  %s5736_s24 = sld [smem:[#allocation33_spill]] }
0x1810   :  { %v3111_v27 = vpop.xlane.xlu0 %3110 }
0x1811   :  { %4519 = vrcp.f32 %v3111_v27 }
0x1812   :  { %v3188_v39 = vpop.permute.xlu1 %3187 }
0x1813   :  { %4278 = vmatpush3.bf16.msra.mxu0 %v3188_v39 }
0x1814   :  { %v3129_v40 = vpop.permute.xlu0 %3128  ;;  %4289 = vmatprep.subr.bf16.mxu0 %v4735_v3 }
0x1815   :  { %4266 = vmatpush3.bf16.msra.mxu1 %v3129_v40 }
0x1816   :  { %4283 = vmatprep.subr.bf16.mxu1 %v4735_v3 }
0x1819   :  { %v4518_v45 = vpop.eup %4517 }
0x181a   :  { %v3114_v53 = vmul.f32 %v4518_v45, %v4514_v34  ;;  %v3805_v45 = vld [vmem:[%s4824_s12 + $0x48] sm:$0xff] }
0x181b   :  { %v4520_v23 = vpop.eup %4519 }
0x181c   :  { %v3115_v47 = vmul.f32 %v4520_v23, %v4516_v36  ;;  %v3116_v54 = vpack.c.bf16 %v3114_v53, %v3114_v53  ;;  %v3429_v53 = vpack.c.bf16 %v3805_v45, %v3804_v44  ;;  %v3806_v23 = vld [vmem:[%s4824_s12 + $0x50] sm:$0xff] }
0x181d   :  { %v3536_v45 = vld [vmem:[#allocation10 + $0x10] sm:$0xff] }
0x181e   :  { %4268 = vmatmul.mubr.msk.bf16.vlgmr.msra.gmra.mrb[84].mxu1 %vm223_vm3, %v3116_v54  ;;  %v3117_v56 = vpack.c.bf16 %v3115_v47, %v3115_v47  ;;  %v3807_v47 = vld [vmem:[%s4824_s12 + $0x58] sm:$0xff] }
0x181f   :  { %4284 = vmatpush3.bf16.msra.mxu1 %v3250_v6  ;;  %4285 = vmatprep.mubr.msk.bf16.mxu1 %vm4736_vm0, %v4735_v3  ;;  %v3430_v54 = vpack.c.bf16 %v3807_v47, %v3806_v23  ;;  %v3808_v6 = vld [vmem:[%s4824_s12 + $0x60] sm:$0xff] }
0x1820   :  { %4280 = vmatmul.mubr.msk.bf16.vlgmr.msra.gmra.mrb[100].mxu0 %vm223_vm3, %v3117_v56  ;;  %4297 = vmatprep.subr.bf16.mxu1 %v4735_v3  ;;  %v3809_v56 = vld [vmem:[%s4824_s12 + $0x68] sm:$0xff] }
0x1821   :  { %4293 = vmatprep.mubr.msk.bf16.mxu0 %vm4736_vm0, %v4735_v3  ;;  %4290 = vmatpush3.bf16.msra.mxu0 %v3347_v32 }
0x1822   :  { %4291 = vmatprep.subr.bf16.mxu0 %v4735_v3 }
0x1825   :  { %4292 = vmatpush3.bf16.msra.mxu0 %v3348_v33 }
0x1826   :  { %4309 = vmatprep.subr.bf16.mxu0 %v4735_v3 }
0x18f1   :  { %v3171_v52 = vpop.f32.mrb[84].mxu1 }
0x18f2   :  { %v4269_v16 = vpop.f32.mrb[85].mxu1 }
0x18f3   :  { %v3174_v58 = vpop.f32.mrb[86].mxu1  ;;  %v3230_v59 = vpop.f32.mrb[100].mxu0  ;;  %v3810_v16 = vld [vmem:[%s4824_s12 + $0x70] sm:$0xff] }
0x18f4   :  { %v3236_v29 = vpack.c.bf16 %v3230_v59, %v3171_v52  ;;  %v4270_v60 = vpop.f32.mrb[87].mxu1  ;;  %v4281_v30 = vpop.f32.mrb[101].mxu0  ;;  %v3431_v52 = vpack.c.bf16 %v3809_v56, %v3808_v6  ;;  %v3811_v58 = vld [vmem:[%s4824_s12 + $0x78] sm:$0xff]  ;;  %s4744_s12 = smov [#allocation12]  }
0x18f5   :  { %v3233_v38 = vpop.f32.mrb[102].mxu0  ;;  %v3432_v59 = vpack.c.bf16 %v3811_v58, %v3810_v16 }
0x18f6   :  { %v4282_v62 = vpop.f32.mrb[103].mxu0  ;;  %4286 = vmatmul.mubr.msk.bf16.vlgmr.msra.gmra.mrb[88].mxu1 %vm406_vm5, %v3236_v29  ;;  %v3802_v29 = vld [vmem:[%s5725_s7 + $0x1] ss:$0 sm:$0xff] }
0x18f7   :  { %4305 = vmatprep.mubr.msk.bf16.mxu1 %vm4736_vm0, %v4735_v3  ;;  %4298 = vmatpush3.bf16.msra.mxu1 %v3429_v53  ;;  %v3537_v53 = vld [vmem:[#allocation10 + $0x18] sm:$0xff] }
0x18f8   :  { %4299 = vmatprep.subr.bf16.mxu1 %v4735_v3  ;;  %v3539_v23 = vpack.c.bf16 %v3537_v53, %v3536_v45 }
0x18fb   :  { %4300 = vmatpush3.bf16.msra.mxu1 %v3430_v54 }
0x18fc   :  { %4301 = vmatprep.subr.bf16.mxu1 %v4735_v3 }
0x18ff   :  { %4302 = vmatpush3.bf16.msra.mxu1 %v3431_v52 }
0x1900   :  { %4303 = vmatprep.subr.bf16.mxu1 %v4735_v3 }
0x1903   :  { %4304 = vmatpush3.bf16.msra.mxu1 %v3432_v59  ;;  %v3815_v59 = vld [vmem:[%s5735_s19] ss:$0 sm:$0xff] }
0x19c9   :  { %v3286_v25 = vpop.f32.mrb[88].mxu1 }
0x19ca   :  { %v3287_v0 = vadd.f32 %v3791_v50, %v3286_v25  ;;  %v4287_v14 = vpop.f32.mrb[89].mxu1 }
0x19cb   :  { %v3289_v19 = vpop.f32.mrb[90].mxu1 }
0x19cc   :  { %v5633_v61 = vadd.f32 %v3287_v0, %v5483_v41  ;;  %v3290_v1 = vadd.f32 %v3791_v50, %v3289_v19  ;;  %v4288_v55 = vpop.f32.mrb[91].mxu1 }
0x19ce   :  { %v5636_v2 = vadd.f32 %v3290_v1, %v5486_v46  ;;  %v3299_v4 = vsel %vm273_vm4, %v5633_v61, 0.0 }
0x19cf   :  { %3300 = vadd.xlane.f32.xlu0 %v3299_v4 }
0x19d0   :  { %v3302_v8 = vsel %vm273_vm4, %v5636_v2, 0.0 }
0x19d1   :  { %3303 = vadd.xlane.f32.xlu1 %v3302_v8 }
0x1a5c   :  { %v3301_v9 = vpop.xlane.xlu0 %3300 }
0x1a5d   :  { %v3305_v10 = vmul.f32 0.03125, %v3301_v9 }
0x1a5e   :  { %v3304_v41 = vpop.xlane.xlu1 %3303 }
0x1a5f   :  { %v3307_v24 = vsub.f32 %v5633_v61, %v3305_v10  ;;  %v3306_v5 = vmul.f32 0.03125, %v3304_v41 }
0x1a61   :  { %v3308_v46 = vsub.f32 %v5636_v2, %v3306_v5  ;;  %v3309_v12 = vmul.f32 %v3307_v24, %v3307_v24 }
0x1a63   :  { %v3311_v15 = vsel %vm273_vm4, %v3309_v12, 0.0  ;;  %v3310_v13 = vmul.f32 %v3308_v46, %v3308_v46 }
0x1a64   :  { %3312 = vadd.xlane.f32.xlu0 %v3311_v15 }
0x1a65   :  { %v3314_v18 = vsel %vm273_vm4, %v3310_v13, 0.0 }
0x1a68   :  { %3315 = vadd.xlane.f32.xlu0 %v3314_v18 }
0x1af1   :  { %v3313_v63 = vpop.xlane.xlu0 %3312 }
0x1af2   :  { %v3317_v11 = vmul.f32 0.03125, %v3313_v63 }
0x1af4   :  { %v3319_v57 = vadd.f32 1e-05, %v3317_v11 }
0x1af5   :  { %v3316_v22 = vpop.xlane.xlu0 %3315 }
0x1af6   :  { %4521 = vrsqrt.f32 %v3319_v57  ;;  %v3318_v49 = vmul.f32 0.03125, %v3316_v22 }
0x1af8   :  { %v3320_v7 = vadd.f32 1e-05, %v3318_v49 }
0x1afa   :  { %4523 = vrsqrt.f32 %v3320_v7 }
0x1b00   :  { %v4522_v21 = vpop.eup %4521 }
0x1b01   :  { %v3323_v34 = vmul.f32 %v4522_v21, %v3307_v24 }
0x1b03   :  { %v3331_v36 = vmul.f32 %v3795_v35, %v3323_v34 }
0x1b04   :  { %v4524_v26 = vpop.eup %4523 }
0x1b05   :  { %v3324_v37 = vmul.f32 %v4524_v26, %v3308_v46  ;;  %v3339_v39 = vadd.f32 %v3796_v51, %v3331_v36 }
0x1b07   :  { %v3332_v27 = vmul.f32 %v3795_v35, %v3324_v37 }
0x1b09   :  { %v3340_v40 = vadd.f32 %v3796_v51, %v3332_v27 }
0x1b0b   :  { %v3341_v31 = vpack.c.bf16 %v3340_v40, %v3339_v39  ;;  %v3534_v40 = vld [vmem:[#allocation10] sm:$0xff] }
0x1b0d   :  { %4294 = vmatmul.mubr.msk.bf16.vlgmr.msra.gmra.mrb[104].mxu0 %vm273_vm4, %v3341_v31  ;;  %v3535_v31 = vld [vmem:[#allocation10 + $0x8] sm:$0xff] }
0x1b0e   :  { %4313 = vmatprep.mubr.msk.bf16.mxu0 %vm4736_vm0, %v4735_v3  ;;  %v3538_v44 = vpack.c.bf16 %v3535_v31, %v3534_v40 }
0x1b10   :  { %4310 = vmatpush3.bf16.msra.mxu0 %v3538_v44 }
0x1b11   :  { %4311 = vmatprep.subr.bf16.mxu0 %v4735_v3 }
0x1b14   :  { %4312 = vmatpush3.bf16.msra.mxu0 %v3539_v23 }
0x1be0   :  { %v3394_v60 = vpop.f32.mrb[104].mxu0 }
0x1be1   :  { %v3395_v30 = vadd.f32 %v3802_v29, %v3394_v60  ;;  %v4295_v38 = vpop.f32.mrb[105].mxu0 }
0x1be2   :  { %v3397_v62 = vpop.f32.mrb[106].mxu0 }
0x1be3   :  { %v3401_v50 = vmul.f32 %v3395_v30, %v3395_v30  ;;  %v3398_v25 = vadd.f32 %v3802_v29, %v3397_v62  ;;  %v4296_v0 = vpop.f32.mrb[107].mxu0  ;;  %v3816_v62 = vld [vmem:[%s5736_s24] ss:$0 sm:$0xff] }
0x1be5   :  { %v3403_v14 = vmul.f32 %v3401_v50, %v3395_v30  ;;  %v3402_v19 = vmul.f32 %v3398_v25, %v3398_v25 }
0x1be7   :  { %v3405_v1 = vmul.f32 0.044715, %v3403_v14  ;;  %v3404_v55 = vmul.f32 %v3402_v19, %v3398_v25  ;;  %v3817_v19 = vld [vmem:[%s4894_s27] ss:$0 sm:$0xff]  ;;  %s3655_s27 = sshll.u32 %s4744_s12, 4  ;;  %s3656_s27 = int_to_ptr.vmem [resolvable:$true] %s3655_s27 }
0x1be8   :  { %s4641_s18 = scalar_lea.vmem %s3656_s27, 256  ;;  %p4646_p10 = scmp.lt.s32.totalorder %s3656_s27, %s3656_s27 }
0x1be9   :  { %v3407_v4 = vadd.f32 %v3405_v1, %v3395_v30  ;;  %v3406_v8 = vmul.f32 0.044715, %v3404_v55  ;;  %p4642_p9 = scmp.ne.s32.totalorder %s3656_s27, %s4641_s18  ;;  %p4647_p11 = scmp.lt.s32.totalorder %s4641_s18, %s4641_s18 }
0x1beb   :  { %v3409_v9 = vmul.f32 0.7978846, %v3407_v4  ;;  %v3408_v10 = vadd.f32 %v3406_v8, %v3398_v25  ;;  %p4648_p12 = por %p4647_p11, %p4646_p10 }
0x1bed   :  { %4525 = vtanh.f32 %v3409_v9  ;;  %v3410_v41 = vmul.f32 0.7978846, %v3408_v10  ;;  %p4649_p13 = pnand %p4648_p12, %p4642_p9 }
0x1bef   :  { %4527 = vtanh.f32 %v3410_v41 }
0x1bf7   :  { %v4526_v24 = vpop.eup %4525 }
0x1bf8   :  { %v3413_v5 = vadd.f32 1.0, %v4526_v24 }
0x1bf9   :  { %v4528_v46 = vpop.eup %4527 }
0x1bfa   :  { %v3415_v12 = vmul.f32 0.5, %v3413_v5  ;;  %v3414_v15 = vadd.f32 1.0, %v4528_v46  ;;  %v3615_v5 = vld [vmem:[%s5737_s30] sm:$0xff]  ;;  %v3616_v46 = vld [vmem:[%s5737_s30 + $0x8] sm:$0xff] }
0x1bfc   :  { %v3416_v13 = vmul.f32 0.5, %v3414_v15  ;;  %v3417_v18 = vmul.f32 %v3415_v12, %v3395_v30 }
0x1bfe   :  { %v3418_v20 = vmul.f32 %v3416_v13, %v3398_v25 }
0x1c00   :  { %v3419_v28 = vpack.c.bf16 %v3418_v20, %v3417_v18 }
0x1c02   :  { %4306 = vmatmul.mubr.msk.bf16.vlgmr.msra.gmra.mrb[92].mxu1 %vm223_vm3, %v3419_v28 }
0x1cd5   :  { %v3470_v32 = vpop.f32.mrb[92].mxu1 }
0x1cd6   :  { %v3477_v43 = vadd.f32 %v3470_v32, %v5633_v61  ;;  %v4307_v33 = vpop.f32.mrb[93].mxu1 }
0x1cd7   :  { %v3473_v63 = vpop.f32.mrb[94].mxu1 }
0x1cd8   :  { %v3487_v11 = vadd.f32 %v3814_v42, %v3477_v43  ;;  %v3478_v57 = vadd.f32 %v3473_v63, %v5636_v2  ;;  %v4308_v22 = vpop.f32.mrb[95].mxu1 }
0x1cda   :  { %v3488_v49 = vadd.f32 %v3814_v42, %v3478_v57  ;;  %v3491_v7 = vsel %vm273_vm4, %v3487_v11, 0.0 }
0x1cdb   :  { %3492 = vadd.xlane.f32.xlu1 %v3491_v7 }
0x1cdc   :  { %v3494_v21 = vsel %vm273_vm4, %v3488_v49, 0.0 }
0x1cdd   :  { %3495 = vadd.xlane.f32.xlu0 %v3494_v21 }
0x1d68   :  { %v3493_v34 = vpop.xlane.xlu1 %3492 }
0x1d69   :  { %v3497_v35 = vmul.f32 0.03125, %v3493_v34 }
0x1d6a   :  { %v3496_v26 = vpop.xlane.xlu0 %3495 }
0x1d6b   :  { %v3499_v36 = vsub.f32 %v3487_v11, %v3497_v35  ;;  %v3498_v37 = vmul.f32 0.03125, %v3496_v26 }
0x1d6d   :  { %v3500_v51 = vsub.f32 %v3488_v49, %v3498_v37  ;;  %v3501_v61 = vmul.f32 %v3499_v36, %v3499_v36 }
0x1d6f   :  { %v3503_v27 = vsel %vm273_vm4, %v3501_v61, 0.0  ;;  %v3502_v39 = vmul.f32 %v3500_v51, %v3500_v51 }
0x1d70   :  { %3504 = vadd.xlane.f32.xlu1 %v3503_v27 }
0x1d71   :  { %v3506_v2 = vsel %vm273_vm4, %v3502_v39, 0.0 }
0x1d72   :  { %3507 = vadd.xlane.f32.xlu0 %v3506_v2 }
0x1dfd   :  { %v3505_v47 = vpop.xlane.xlu1 %3504 }
0x1dfe   :  { %v3509_v54 = vmul.f32 0.03125, %v3505_v47 }
0x1dff   :  { %v3508_v6 = vpop.xlane.xlu0 %3507 }
0x1e00   :  { %v3511_v56 = vadd.f32 1e-05, %v3509_v54  ;;  %v3510_v52 = vmul.f32 0.03125, %v3508_v6 }
0x1e02   :  { %4529 = vrsqrt.f32 %v3511_v56  ;;  %v3512_v16 = vadd.f32 1e-05, %v3510_v52 }
0x1e04   :  { %4531 = vrsqrt.f32 %v3512_v16 }
0x1e0c   :  { %v4530_v58 = vpop.eup %4529 }
0x1e0d   :  { %v3515_v29 = vmul.f32 %v4530_v58, %v3499_v36 }
0x1e0e   :  { %v4532_v60 = vpop.eup %4531 }
0x1e0f   :  { %v3523_v30 = vmul.f32 %v3815_v59, %v3515_v29  ;;  %v3516_v38 = vmul.f32 %v4532_v60, %v3500_v51 }
0x1e11   :  { %v3524_v50 = vmul.f32 %v3815_v59, %v3516_v38  ;;  %v3531_v25 = vadd.f32 %v3816_v62, %v3523_v30 }
0x1e13   :  { %v3532_v0 = vadd.f32 %v3816_v62, %v3524_v50 }
0x1e15   :  { %v3533_v14 = vpack.c.bf16 %v3532_v0, %v3531_v25 }
0x1e17   :  { %4314 = vmatmul.mubr.msk.bf16.vlgmr.msra.gmra.mrb[108].mxu0 %vm273_vm4, %v3533_v14 }
0x1eea   :  { %v3584_v1 = vpop.f32.mrb[108].mxu0 }
0x1eeb   :  { %v3585_v55 = vadd.f32 %v3817_v19, %v3584_v1  ;;  %v4315_v4 = vpop.f32.mrb[109].mxu0 }
0x1eec   :  { %v3587_v8 = vpop.f32.mrb[110].mxu0 }
0x1eed   :  { %3591 = vst [vmem:[#allocation12] sm:$0xff] %v3585_v55  ;;  %v3588_v9 = vadd.f32 %v3817_v19, %v3587_v8  ;;  %v4316_v10 = vpop.f32.mrb[111].mxu0  ;;  %v3593_v41 = vsel %vm223_vm3, %v3585_v55, -inf }
0x1eee   :  { %3594 = vmax.xlane.f32.xlu1 %v3593_v41 }
0x1eef   :  { %3592 = vst [vmem:[#allocation12 + $0x8] sm:$0xff] %v3588_v9  ;;  %v3596_v24 = vsel %vm223_vm3, %v3588_v9, -inf }
0x1ef0   :  { %3597 = vmax.xlane.f32.xlu0 %v3596_v24 }
0x1eff   :  { %3618 = vperm.xlu1 %4428, %v3615_v5  }
0x1f06   :  { %3621 = vperm.xlu0 %4367, %v3616_v46  }
0x1f7b   :  { %v3595_v12 = vpop.xlane.xlu1 %3594 }
0x1f7c   :  { %v3599_v15 = vsub.f32 %v3585_v55, %v3595_v12 }
0x1f7d   :  { %v3598_v13 = vpop.xlane.xlu0 %3597 }
0x1f7e   :  { %v3601_v18 = vmul.f32 1.442695, %v3599_v15  ;;  %v3600_v20 = vsub.f32 %v3588_v9, %v3598_v13 }
0x1f7f   :  { %v3619_v32 = vpop.permute.xlu1 %3618 }
0x1f80   :  { %4533 = vpow2.f32 %v3601_v18  ;;  %v3603_v28 = vmul.f32 1.442695, %v3600_v20  ;;  %vm3623_vm10 = vcmp.eq.s32.totalorder %v4955_v17, %v3619_v32 }
0x1f81   :  { %v3625_v11 = vsel %vm3623_vm10, %v3599_v15, 0.0 }
0x1f82   :  { %4535 = vpow2.f32 %v3603_v28  ;;  %v3627_v49 = vsel %vm223_vm3, %v3625_v11, 0.0 }
0x1f85   :  { %v3622_v42 = vpop.permute.xlu0 %3621 }
0x1f86   :  { %vm3624_vm11 = vcmp.eq.s32.totalorder %v4955_v17, %v3622_v42 }
0x1f87   :  { %v3626_v22 = vsel %vm3624_vm11, %v3600_v20, 0.0 }
0x1f88   :  { %v3630_v7 = vsel %vm223_vm3, %v3626_v22, 0.0 }
0x1f8a   :  { %v4534_v43 = vpop.eup %4533 }
0x1f8b   :  { %v3605_v33 = vsel %vm223_vm3, %v4534_v43, 0.0 }
0x1f8c   :  { %v4536_v63 = vpop.eup %4535  ;;  %3606 = vadd.xlane.f32.xlu1 %v3605_v33 }
0x1f8d   :  { %v3608_v57 = vsel %vm223_vm3, %v4536_v63, 0.0 }
0x1f8e   :  { %3609 = vadd.xlane.f32.xlu0 %v3608_v57 }
0x1f90   :  { %3628 = vadd.xlane.f32.xlu1 %v3627_v49 }
0x1f92   :  { %3631 = vadd.xlane.f32.xlu0 %v3630_v7 }
0x1f93   :  { %4652 = shalt.err (!%p4649_p13)
}
0x1f94   :  { %s4653_s22 = scalar_lea.hbm %s4899_s4, 256 }
0x1f95   :  { %p4654_p0 = scmp.ne.s32.totalorder %s4899_s4, %s4653_s22  ;;  %p4657_p1 = scmp.lt.u32.totalorder %s4653_s22, %s4899_s4 }
0x1f97   :  { %p4659_p2 = pnand %p4657_p1, %p4654_p0 }
0x1f99   :  { %4662 = shalt.err (!%p4659_p2)
}
0x1f9a   :  { %3661 = dma.vmem_to_hbm [thread:$0]  %s3656_s27, 256, %s4899_s4, [#allocation4], %s4728_s23, %s4728_s23, %s4729_s26   ;;  %vm3635_vm12 = vcmp.lt.s32.totalorder %v5066_v48, 7  ;;  %vm3648_vm13 = vcmask 0  }
0x1f9b   :  { %v3636_v61 = vsel %vm3635_vm12, 1.0, %v4735_v3  ;;  %s4745_s4 = smov [#allocation13]  }
0x1f9c   :  { %s3668_s23 = sshll.u32 %s4745_s4, 4  ;;  %s3669_s23 = int_to_ptr.vmem [resolvable:$true] %s3668_s23 }
0x1f9d   :  { %s4663_s26 = scalar_lea.vmem %s3669_s23, 16  ;;  %s4667_s0 = scalar_lea.vmem %s3669_s23, 32 }
0x1f9e   :  { %p4664_p3 = scmp.ne.s32.totalorder %s3669_s23, %s4663_s26  ;;  %p4668_p4 = scmp.lt.s32.totalorder %s3669_s23, %s3669_s23 }
0x1f9f   :  { %p4669_p5 = scmp.lt.s32.totalorder %s4667_s0, %s4663_s26 }
0x1fa1   :  { %p4670_p6 = por %p4669_p5, %p4668_p4 }
0x1fa3   :  { %p4671_p7 = pnand %p4670_p6, %p4664_p3 }
0x2019   :  { %v3607_v17 = vpop.xlane.xlu1 %3606 }
0x201a   :  { %4537 = vlog2.f32 %v3607_v17 }
0x201b   :  { %v3610_v21 = vpop.xlane.xlu0 %3609 }
0x201c   :  { %4539 = vlog2.f32 %v3610_v21 }
0x201d   :  { %v3629_v36 = vpop.xlane.xlu1 %3628 }
0x201f   :  { %v3632_v27 = vpop.xlane.xlu0 %3631 }
0x2024   :  { %v4538_v34 = vpop.eup %4537 }
0x2025   :  { %v3612_v35 = vmul.f32 0.6931472, %v4538_v34 }
0x2026   :  { %v4540_v26 = vpop.eup %4539 }
0x2027   :  { %v3633_v37 = vsub.f32 %v3612_v35, %v3629_v36  ;;  %v3614_v51 = vmul.f32 0.6931472, %v4540_v26 }
0x2029   :  { %v3634_v39 = vsub.f32 %v3614_v51, %v3632_v27  ;;  %v3637_v2 = vmul.f32 %v3636_v61, %v3633_v37 }
0x202b   :  { %v3638_v40 = vmul.f32 %v3636_v61, %v3634_v39 }
0x202d   :  { %v3639_v31 = vadd.f32 %v3638_v40, %v3637_v2 }
0x202f   :  { %v3640_v44 = vrot.slane %v3639_v31, 4 }
0x2031   :  { %v3641_v45 = vadd.f32 %v3640_v44, %v3639_v31 }
0x2033   :  { %v3642_v53 = vrot.slane %v3641_v45, 2 }
0x2035   :  { %v3643_v23 = vadd.f32 %v3642_v53, %v3641_v45 }
0x2037   :  { %v3644_v47 = vrot.slane %v3643_v23, 1 }
0x2039   :  { %v3645_v54 = vadd.f32 %v3644_v47, %v3643_v23 }
0x203b   :  { %v3647_v48 = vmul.f32 0.071428575, %v3645_v54 }
0x203d   :  { %3649 = vst.msk [vmem:[#allocation13] sm:$0x1] %vm3648_vm13, %v3647_v48 }
0x203e   :  { %4674 = shalt.err (!%p4671_p7)
}
0x203f   :  { %s4675_s5 = scalar_lea.hbm %s4904_s9, 16 }
0x2040   :  { %p4676_p8 = scmp.ne.s32.totalorder %s4904_s9, %s4675_s5  ;;  %p4679_p9 = scmp.lt.u32.totalorder %s4675_s5, %s4904_s9 }
0x2042   :  { %p4681_p10 = pnand %p4679_p9, %p4676_p8 }
0x2044   :  { %4684 = shalt.err (!%p4681_p10)
}
0x2045   :  { %3671 = dma.vmem_to_hbm [thread:$0]  %s3669_s23, 16, %s4904_s9, [#allocation14]  }
0x2046   :  { %4693 = dma.done.wait [#allocation4], 256  }
0x2047   :  { %4694 = vsyncadd [#allocation4], 4294967040 }
0x2048   :  { %4695 = dma.done.wait [#allocation14], 16  }
0x2049   :  { %4696 = vsyncadd [#allocation14], 4294967280 }
0x204a   :  { %3678 = vsyncpa [#allocation3], 1 }
0x204b   :  { %3679 = vsyncpa [#allocation8], 1 }
0x204c   :  { %3680 = vsyncpa [#allocation11], 1 }
0x204d   :  { %3681 = vsyncpa [#allocation4], 1 }
0x204e   :  { %3682 = vsyncpa [#allocation14], 1 }
0x204f   :  { %3683 = vsyncpa [#allocation5], 1 }

</bundles_post_ra>
